<compile_context>
chip_gen: v6e
topology: v6e:2x2x1
jax: 0.10.0
libtpu: 0.0.40
codegen_flags: <defaults>
</compile_context>

<pallas_src>
import jax
import jax.numpy as jnp
from jax import lax
from jax.experimental import pallas as pl
from jax.experimental.pallas import tpu as pltpu


def basic_block_kernel(x_ref, w1_ref, w2_ref, s1_ref, b1_ref, s2_ref, b2_ref,
                       out_ref, xpad_ref, midpad_ref, acc_ref):
    _, H, W, CP = x_ref.shape
    Hp, Wp = H + 2, W + 2
    mxu_dtype = w1_ref.dtype

    # ---- zero only the 1-pixel halo of the padded scratches (thin stores) ----
    zrow = jnp.zeros((1, Wp, CP), jnp.float32)
    zcol = jnp.zeros((Hp, 1, CP), jnp.float32)
    for pad_ref in (xpad_ref, midpad_ref):
        pad_ref[0:1, :, :] = zrow
        pad_ref[Hp - 1:Hp, :, :] = zrow
        pad_ref[:, 0:1, :] = zcol
        pad_ref[:, Wp - 1:Wp, :] = zcol

    # in-kernel spatial pad: interior <- input block (input hits HBM once)
    xpad_ref[1:H + 1, 1:W + 1, :] = x_ref[0]

    def conv3x3(src_ref, w_ref):
        """3x3 / stride-1 conv of the zero-padded slab -> acc_ref (f32)."""
        first = True
        # 3 kw-shifted slabs (one sublane shift each), each reused for the
        # 3 row taps (cheap outer-dim slices + layout-compatible reshape).
        for kw in range(3):
            slab = src_ref[:, kw:kw + W, :].astype(mxu_dtype)      # (Hp, W, CP)
            for kh in range(3):
                patch = slab[kh:kh + H].reshape(H * W, CP)
                contrib = jnp.dot(patch, w_ref[kh * 3 + kw],
                                  preferred_element_type=jnp.float32)
                if first:
                    acc_ref[...] = contrib                          # init from tap 0
                    first = False
                else:
                    acc_ref[...] += contrib

    # conv1 -> bn1 (folded) -> relu
    conv3x3(xpad_ref, w1_ref)
    h1 = jnp.maximum(acc_ref[...] * s1_ref[...] + b1_ref[...], 0.0)
    midpad_ref[1:H + 1, 1:W + 1, :] = h1.reshape(H, W, CP)

    # conv2 -> bn2 (folded) -> + identity -> relu
    conv3x3(midpad_ref, w2_ref)
    ident = x_ref[0].reshape(H * W, CP)
    out = jnp.maximum(acc_ref[...] * s2_ref[...] + b2_ref[...] + ident, 0.0)
    out_ref[...] = out.reshape(1, H, W, CP).astype(out_ref.dtype)


def basic_block_forward(x_nchw, w1, w2, bn1, bn2, eps=1e-5,
                        mxu_dtype=jnp.bfloat16):
    """BasicBlock forward (stride=1, identity residual).

    x_nchw: (N, C, H, W).  w1, w2: HWIO (3, 3, C, C), no bias.
    bn1/bn2: (gamma, beta, running_mean, running_var).
    """
    g1, be1, m1, v1 = bn1
    g2, be2, m2, v2 = bn2
    # fold BN (inference) into per-channel scale / bias
    s1 = g1 / jnp.sqrt(v1 + eps)
    b1 = be1 - m1 * s1
    s2 = g2 / jnp.sqrt(v2 + eps)
    b2 = be2 - m2 * s2

    x = jnp.transpose(x_nchw, (0, 2, 3, 1)).astype(jnp.float32)    # NCHW -> NHWC
    N, H, W, C = x.shape
    assert w1.shape == (3, 3, C, C) and w2.shape == (3, 3, C, C), (
        "identity residual requires in_planes == planes")

    LANE = 128
    CP = ((C + LANE - 1) // LANE) * LANE         # lane-dense channel count

    def pad_c(a):
        if CP == C:
            return a
        return jnp.pad(a, [(0, 0)] * (a.ndim - 1) + [(0, CP - C)])

    xp = pad_c(x)                                                   # (N, H, W, CP)

    def prep_w(w):
        wp = w if CP == C else jnp.pad(w, ((0, 0), (0, 0), (0, CP - C), (0, CP - C)))
        return wp.reshape(9, CP, CP).astype(mxu_dtype)              # tap = kh*3 + kw

    w1p, w2p = prep_w(w1), prep_w(w2)
    s1p = pad_c(s1.reshape(1, -1)).astype(jnp.float32)
    b1p = pad_c(b1.reshape(1, -1)).astype(jnp.float32)
    s2p = pad_c(s2.reshape(1, -1)).astype(jnp.float32)
    b2p = pad_c(b2.reshape(1, -1)).astype(jnp.float32)

    w_bytes = 2 * 9 * CP * CP * jnp.dtype(mxu_dtype).itemsize
    cost = pl.CostEstimate(
        flops=2 * (2 * 9 * H * W * CP * CP) * N,     # two 3x3 convs
        transcendentals=0,
        bytes_accessed=2 * N * H * W * CP * 4 + w_bytes + 4 * CP * 4)

    wmap = lambda n: (0, 0, 0)    # weights resident across the grid
    vmap = lambda n: (0, 0)       # BN scale/bias resident across the grid

    out_p = pl.pallas_call(
        basic_block_kernel,
        out_shape=jax.ShapeDtypeStruct((N, H, W, CP), jnp.float32),
        grid=(N,),                                                  # one image / step
        in_specs=[
            pl.BlockSpec((1, H, W, CP), lambda n: (n, 0, 0, 0)),    # x
            pl.BlockSpec((9, CP, CP), wmap),                        # conv1 weights
            pl.BlockSpec((9, CP, CP), wmap),                        # conv2 weights
            pl.BlockSpec((1, CP), vmap),                            # bn1 scale
            pl.BlockSpec((1, CP), vmap),                            # bn1 bias
            pl.BlockSpec((1, CP), vmap),                            # bn2 scale
            pl.BlockSpec((1, CP), vmap),                            # bn2 bias
        ],
        out_specs=pl.BlockSpec((1, H, W, CP), lambda n: (n, 0, 0, 0)),
        scratch_shapes=[
            pltpu.VMEM((H + 2, W + 2, CP), jnp.float32),   # zero-padded input
            pltpu.VMEM((H + 2, W + 2, CP), jnp.float32),   # zero-padded intermediate
            pltpu.VMEM((H * W, CP), jnp.float32),          # matmul accumulator
        ],
        compiler_params=pltpu.CompilerParams(
            dimension_semantics=("parallel",)),            # megacore-shard on v7x
        cost_estimate=cost,
    )(xp, w1p, w2p, s1p, b1p, s2p, b2p)

    out = out_p[..., :C]                                   # crop lane padding
    return jnp.transpose(out, (0, 3, 1, 2))                # NHWC -> NCHW


def reference_forward(x_nchw, w1, w2, bn1, bn2, eps=1e-5):
    """Pure-JAX f32 reference (same semantics) for a correctness check."""
    g1, be1, m1, v1 = bn1
    g2, be2, m2, v2 = bn2
    x = jnp.transpose(x_nchw, (0, 2, 3, 1)).astype(jnp.float32)

    def conv(inp, w):
        return lax.conv_general_dilated(
            inp, w, window_strides=(1, 1), padding=((1, 1), (1, 1)),
            dimension_numbers=('NHWC', 'HWIO', 'NHWC'))

    def bn(inp, g, b, m, v):
        return (inp - m) / jnp.sqrt(v + eps) * g + b

    h = jax.nn.relu(bn(conv(x, w1), g1, be1, m1, v1))
    h = bn(conv(h, w2), g2, be2, m2, v2)
    h = jax.nn.relu(h + x)
    return jnp.transpose(h, (0, 3, 1, 2))


if __name__ == "__main__":
    # Small deterministic setup consistent with BasicBlock(in_planes=4, planes=4)
    N, C, H, W = 2, 4, 16, 16
    key = jax.random.PRNGKey(0)
    kx, kw1, kw2, kb1, kb2 = jax.random.split(key, 5)

    x = jax.random.normal(kx, (N, C, H, W), jnp.float32)

    # conv weights, HWIO layout, no bias (conv3x3)
    w1 = 0.1 * jax.random.normal(kw1, (3, 3, C, C), jnp.float32)
    w2 = 0.1 * jax.random.normal(kw2, (3, 3, C, C), jnp.float32)

    # BatchNorm params: (gamma, beta, running_mean, running_var)
    k1a, k1b, k1c, k1d = jax.random.split(kb1, 4)
    bn1 = (jax.random.uniform(k1a, (C,), jnp.float32, 0.5, 1.5),
           0.1 * jax.random.normal(k1b, (C,), jnp.float32),
           0.1 * jax.random.normal(k1c, (C,), jnp.float32),
           jax.random.uniform(k1d, (C,), jnp.float32, 0.5, 1.5))
    k2a, k2b, k2c, k2d = jax.random.split(kb2, 4)
    bn2 = (jax.random.uniform(k2a, (C,), jnp.float32, 0.5, 1.5),
           0.1 * jax.random.normal(k2b, (C,), jnp.float32),
           0.1 * jax.random.normal(k2c, (C,), jnp.float32),
           jax.random.uniform(k2d, (C,), jnp.float32, 0.5, 1.5))

    ref = reference_forward(x, w1, w2, bn1, bn2)

    # f32 MXU operands: tight check vs the f32 reference
    out_f32 = jax.block_until_ready(
        basic_block_forward(x, w1, w2, bn1, bn2, mxu_dtype=jnp.float32))
    assert out_f32.shape == (N, C, H, W)
    assert jnp.allclose(out_f32, ref, atol=1e-3, rtol=1e-3), "f32 mismatch vs reference"

    # bf16 MXU operands (default; recommended on v6e/v7x), f32 accumulation/epilogue
    out_bf16 = jax.block_until_ready(basic_block_forward(x, w1, w2, bn1, bn2))
    assert out_bf16.shape == (N, C, H, W)
    assert jnp.allclose(out_bf16, ref, atol=3e-2, rtol=3e-2), "bf16 mismatch vs reference"

    print("KERNEL_OK")
</pallas_src>

<mosaic_0001>
module attributes {stable_mosaic.version = 11 : i64} {
  func.func @basic_block_kernel(%arg0: i32, %arg1: memref<1x16x16x128xf32, #tpu.memory_space<vmem>>, %arg2: memref<9x128x128xf32, #tpu.memory_space<vmem>>, %arg3: memref<9x128x128xf32, #tpu.memory_space<vmem>>, %arg4: memref<1x128xf32, #tpu.memory_space<vmem>>, %arg5: memref<1x128xf32, #tpu.memory_space<vmem>>, %arg6: memref<1x128xf32, #tpu.memory_space<vmem>>, %arg7: memref<1x128xf32, #tpu.memory_space<vmem>>, %arg8: memref<1x16x16x128xf32, #tpu.memory_space<vmem>>, %arg9: memref<18x18x128xf32, #tpu.memory_space<vmem>>, %arg10: memref<18x18x128xf32, #tpu.memory_space<vmem>>, %arg11: memref<256x128xf32, #tpu.memory_space<vmem>>) attributes {dimension_semantics = [#tpu.dimension_semantics<parallel>], iteration_bounds = array<i64: 2>, scalar_prefetch = 0 : i64, scratch_operands = 3 : i64, tpu.core_type = #tpu.core_type<tc>, window_params = [{transform_indices = @transform_0, window_bounds = array<i64: 1, 16, 16, 128>}, {pipeline_mode = #tpu.pipeline_mode<synchronous>, transform_indices = @transform_1, window_bounds = array<i64: 9, 128, 128>}, {pipeline_mode = #tpu.pipeline_mode<synchronous>, transform_indices = @transform_2, window_bounds = array<i64: 9, 128, 128>}, {pipeline_mode = #tpu.pipeline_mode<synchronous>, transform_indices = @transform_3, window_bounds = array<i64: 1, 128>}, {pipeline_mode = #tpu.pipeline_mode<synchronous>, transform_indices = @transform_4, window_bounds = array<i64: 1, 128>}, {pipeline_mode = #tpu.pipeline_mode<synchronous>, transform_indices = @transform_5, window_bounds = array<i64: 1, 128>}, {pipeline_mode = #tpu.pipeline_mode<synchronous>, transform_indices = @transform_6, window_bounds = array<i64: 1, 128>}, {transform_indices = @transform_7, window_bounds = array<i64: 1, 16, 16, 128>}]} {
    %cst = arith.constant 0.000000e+00 : f32
    %0 = vector.broadcast %cst : f32 to vector<1x18x128xf32>
    %cst_0 = arith.constant 0.000000e+00 : f32
    %1 = vector.broadcast %cst_0 : f32 to vector<18x1x128xf32>
    %c0 = arith.constant 0 : index
    %c0_1 = arith.constant 0 : index
    %c0_2 = arith.constant 0 : index
    %2 = vector.load %arg9[%c0, %c0_1, %c0_2] : memref<18x18x128xf32, #tpu.memory_space<vmem>>, vector<1x18x128xf32>
    tpu.vector_store %arg9[%c0, %c0_1, %c0_2], %0 {strides = array<i32>} : memref<18x18x128xf32, #tpu.memory_space<vmem>>, vector<1x18x128xf32>,
    %c17 = arith.constant 17 : index
    %c0_3 = arith.constant 0 : index
    %c0_4 = arith.constant 0 : index
    %3 = vector.load %arg9[%c17, %c0_3, %c0_4] : memref<18x18x128xf32, #tpu.memory_space<vmem>>, vector<1x18x128xf32>
    tpu.vector_store %arg9[%c17, %c0_3, %c0_4], %0 {strides = array<i32>} : memref<18x18x128xf32, #tpu.memory_space<vmem>>, vector<1x18x128xf32>,
    %c0_5 = arith.constant 0 : index
    %c0_6 = arith.constant 0 : index
    %c0_7 = arith.constant 0 : index
    %4 = vector.load %arg9[%c0_5, %c0_6, %c0_7] : memref<18x18x128xf32, #tpu.memory_space<vmem>>, vector<18x1x128xf32>
    tpu.vector_store %arg9[%c0_5, %c0_6, %c0_7], %1 {strides = array<i32>} : memref<18x18x128xf32, #tpu.memory_space<vmem>>, vector<18x1x128xf32>,
    %c0_8 = arith.constant 0 : index
    %c17_9 = arith.constant 17 : index
    %c0_10 = arith.constant 0 : index
    %5 = vector.load %arg9[%c0_8, %c17_9, %c0_10] : memref<18x18x128xf32, #tpu.memory_space<vmem>>, vector<18x1x128xf32>
    tpu.vector_store %arg9[%c0_8, %c17_9, %c0_10], %1 {strides = array<i32>} : memref<18x18x128xf32, #tpu.memory_space<vmem>>, vector<18x1x128xf32>,
    %c0_11 = arith.constant 0 : index
    %c0_12 = arith.constant 0 : index
    %c0_13 = arith.constant 0 : index
    %6 = vector.load %arg10[%c0_11, %c0_12, %c0_13] : memref<18x18x128xf32, #tpu.memory_space<vmem>>, vector<1x18x128xf32>
    tpu.vector_store %arg10[%c0_11, %c0_12, %c0_13], %0 {strides = array<i32>} : memref<18x18x128xf32, #tpu.memory_space<vmem>>, vector<1x18x128xf32>,
    %c17_14 = arith.constant 17 : index
    %c0_15 = arith.constant 0 : index
    %c0_16 = arith.constant 0 : index
    %7 = vector.load %arg10[%c17_14, %c0_15, %c0_16] : memref<18x18x128xf32, #tpu.memory_space<vmem>>, vector<1x18x128xf32>
    tpu.vector_store %arg10[%c17_14, %c0_15, %c0_16], %0 {strides = array<i32>} : memref<18x18x128xf32, #tpu.memory_space<vmem>>, vector<1x18x128xf32>,
    %c0_17 = arith.constant 0 : index
    %c0_18 = arith.constant 0 : index
    %c0_19 = arith.constant 0 : index
    %8 = vector.load %arg10[%c0_17, %c0_18, %c0_19] : memref<18x18x128xf32, #tpu.memory_space<vmem>>, vector<18x1x128xf32>
    tpu.vector_store %arg10[%c0_17, %c0_18, %c0_19], %1 {strides = array<i32>} : memref<18x18x128xf32, #tpu.memory_space<vmem>>, vector<18x1x128xf32>,
    %c0_20 = arith.constant 0 : index
    %c17_21 = arith.constant 17 : index
    %c0_22 = arith.constant 0 : index
    %9 = vector.load %arg10[%c0_20, %c17_21, %c0_22] : memref<18x18x128xf32, #tpu.memory_space<vmem>>, vector<18x1x128xf32>
    tpu.vector_store %arg10[%c0_20, %c17_21, %c0_22], %1 {strides = array<i32>} : memref<18x18x128xf32, #tpu.memory_space<vmem>>, vector<18x1x128xf32>,
    %c0_23 = arith.constant 0 : index
    %c0_24 = arith.constant 0 : index
    %c0_25 = arith.constant 0 : index
    %c0_26 = arith.constant 0 : index
    %10 = vector.load %arg1[%c0_23, %c0_24, %c0_25, %c0_26] : memref<1x16x16x128xf32, #tpu.memory_space<vmem>>, vector<1x16x16x128xf32>
    %11 = vector.shape_cast %10 : vector<1x16x16x128xf32> to vector<16x16x128xf32>
    %c1 = arith.constant 1 : index
    %c1_27 = arith.constant 1 : index
    %c0_28 = arith.constant 0 : index
    %12 = vector.load %arg9[%c1, %c1_27, %c0_28] : memref<18x18x128xf32, #tpu.memory_space<vmem>>, vector<16x16x128xf32>
    tpu.vector_store %arg9[%c1, %c1_27, %c0_28], %11 {strides = array<i32>} : memref<18x18x128xf32, #tpu.memory_space<vmem>>, vector<16x16x128xf32>,
    %c0_29 = arith.constant 0 : index
    %c0_30 = arith.constant 0 : index
    %c0_31 = arith.constant 0 : index
    %13 = vector.load %arg9[%c0_29, %c0_30, %c0_31] : memref<18x18x128xf32, #tpu.memory_space<vmem>>, vector<18x16x128xf32>
    %14 = vector.extract_strided_slice %13 {offsets = [0, 0, 0], sizes = [16, 16, 128], strides = [1, 1, 1]} : vector<18x16x128xf32> to vector<16x16x128xf32>
    %15 = vector.shape_cast %14 : vector<16x16x128xf32> to vector<256x128xf32>
    %c0_32 = arith.constant 0 : index
    %c0_33 = arith.constant 0 : index
    %c0_34 = arith.constant 0 : index
    %16 = vector.load %arg2[%c0_32, %c0_33, %c0_34] : memref<9x128x128xf32, #tpu.memory_space<vmem>>, vector<1x128x128xf32>
    %17 = vector.shape_cast %16 : vector<1x128x128xf32> to vector<128x128xf32>
    %cst_35 = arith.constant dense<0.000000e+00> : vector<256x128xf32>
    %18 = tpu.matmul %15, %17, %cst_35 {dimension_numbers = #tpu.dot_dimension_numbers<[1], [0], [0], [1], [0, 0, 1, 1], [], []>} : vector<256x128xf32>, vector<128x128xf32>, vector<256x128xf32> -> vector<256x128xf32>
    %c0_36 = arith.constant 0 : index
    %c0_37 = arith.constant 0 : index
    %19 = vector.load %arg11[%c0_36, %c0_37] : memref<256x128xf32, #tpu.memory_space<vmem>>, vector<256x128xf32>
    tpu.vector_store %arg11[%c0_36, %c0_37], %18 {strides = array<i32>} : memref<256x128xf32, #tpu.memory_space<vmem>>, vector<256x128xf32>,
    %20 = vector.extract_strided_slice %13 {offsets = [1, 0, 0], sizes = [16, 16, 128], strides = [1, 1, 1]} : vector<18x16x128xf32> to vector<16x16x128xf32>
    %21 = vector.shape_cast %20 : vector<16x16x128xf32> to vector<256x128xf32>
    %c3 = arith.constant 3 : index
    %c0_38 = arith.constant 0 : index
    %c0_39 = arith.constant 0 : index
    %22 = vector.load %arg2[%c3, %c0_38, %c0_39] : memref<9x128x128xf32, #tpu.memory_space<vmem>>, vector<1x128x128xf32>
    %23 = vector.shape_cast %22 : vector<1x128x128xf32> to vector<128x128xf32>
    %cst_40 = arith.constant dense<0.000000e+00> : vector<256x128xf32>
    %24 = tpu.matmul %21, %23, %cst_40 {dimension_numbers = #tpu.dot_dimension_numbers<[1], [0], [0], [1], [0, 0, 1, 1], [], []>} : vector<256x128xf32>, vector<128x128xf32>, vector<256x128xf32> -> vector<256x128xf32>
    %c0_41 = arith.constant 0 : index
    %c0_42 = arith.constant 0 : index
    %25 = vector.load %arg11[%c0_41, %c0_42] : memref<256x128xf32, #tpu.memory_space<vmem>>, vector<256x128xf32>
    %26 = arith.addf %25, %24 : vector<256x128xf32>
    %c0_43 = arith.constant 0 : index
    %c0_44 = arith.constant 0 : index
    %27 = vector.load %arg11[%c0_43, %c0_44] : memref<256x128xf32, #tpu.memory_space<vmem>>, vector<256x128xf32>
    tpu.vector_store %arg11[%c0_43, %c0_44], %26 {strides = array<i32>} : memref<256x128xf32, #tpu.memory_space<vmem>>, vector<256x128xf32>,
    %28 = vector.extract_strided_slice %13 {offsets = [2, 0, 0], sizes = [16, 16, 128], strides = [1, 1, 1]} : vector<18x16x128xf32> to vector<16x16x128xf32>
    %29 = vector.shape_cast %28 : vector<16x16x128xf32> to vector<256x128xf32>
    %c6 = arith.constant 6 : index
    %c0_45 = arith.constant 0 : index
    %c0_46 = arith.constant 0 : index
    %30 = vector.load %arg2[%c6, %c0_45, %c0_46] : memref<9x128x128xf32, #tpu.memory_space<vmem>>, vector<1x128x128xf32>
    %31 = vector.shape_cast %30 : vector<1x128x128xf32> to vector<128x128xf32>
    %cst_47 = arith.constant dense<0.000000e+00> : vector<256x128xf32>
    %32 = tpu.matmul %29, %31, %cst_47 {dimension_numbers = #tpu.dot_dimension_numbers<[1], [0], [0], [1], [0, 0, 1, 1], [], []>} : vector<256x128xf32>, vector<128x128xf32>, vector<256x128xf32> -> vector<256x128xf32>
    %c0_48 = arith.constant 0 : index
    %c0_49 = arith.constant 0 : index
    %33 = vector.load %arg11[%c0_48, %c0_49] : memref<256x128xf32, #tpu.memory_space<vmem>>, vector<256x128xf32>
    %34 = arith.addf %33, %32 : vector<256x128xf32>
    %c0_50 = arith.constant 0 : index
    %c0_51 = arith.constant 0 : index
    %35 = vector.load %arg11[%c0_50, %c0_51] : memref<256x128xf32, #tpu.memory_space<vmem>>, vector<256x128xf32>
    tpu.vector_store %arg11[%c0_50, %c0_51], %34 {strides = array<i32>} : memref<256x128xf32, #tpu.memory_space<vmem>>, vector<256x128xf32>,
    %c0_52 = arith.constant 0 : index
    %c1_53 = arith.constant 1 : index
    %c0_54 = arith.constant 0 : index
    %36 = vector.load %arg9[%c0_52, %c1_53, %c0_54] : memref<18x18x128xf32, #tpu.memory_space<vmem>>, vector<18x16x128xf32>
    %37 = vector.extract_strided_slice %36 {offsets = [0, 0, 0], sizes = [16, 16, 128], strides = [1, 1, 1]} : vector<18x16x128xf32> to vector<16x16x128xf32>
    %38 = vector.shape_cast %37 : vector<16x16x128xf32> to vector<256x128xf32>
    %c1_55 = arith.constant 1 : index
    %c0_56 = arith.constant 0 : index
    %c0_57 = arith.constant 0 : index
    %39 = vector.load %arg2[%c1_55, %c0_56, %c0_57] : memref<9x128x128xf32, #tpu.memory_space<vmem>>, vector<1x128x128xf32>
    %40 = vector.shape_cast %39 : vector<1x128x128xf32> to vector<128x128xf32>
    %cst_58 = arith.constant dense<0.000000e+00> : vector<256x128xf32>
    %41 = tpu.matmul %38, %40, %cst_58 {dimension_numbers = #tpu.dot_dimension_numbers<[1], [0], [0], [1], [0, 0, 1, 1], [], []>} : vector<256x128xf32>, vector<128x128xf32>, vector<256x128xf32> -> vector<256x128xf32>
    %c0_59 = arith.constant 0 : index
    %c0_60 = arith.constant 0 : index
    %42 = vector.load %arg11[%c0_59, %c0_60] : memref<256x128xf32, #tpu.memory_space<vmem>>, vector<256x128xf32>
    %43 = arith.addf %42, %41 : vector<256x128xf32>
    %c0_61 = arith.constant 0 : index
    %c0_62 = arith.constant 0 : index
    %44 = vector.load %arg11[%c0_61, %c0_62] : memref<256x128xf32, #tpu.memory_space<vmem>>, vector<256x128xf32>
    tpu.vector_store %arg11[%c0_61, %c0_62], %43 {strides = array<i32>} : memref<256x128xf32, #tpu.memory_space<vmem>>, vector<256x128xf32>,
    %45 = vector.extract_strided_slice %36 {offsets = [1, 0, 0], sizes = [16, 16, 128], strides = [1, 1, 1]} : vector<18x16x128xf32> to vector<16x16x128xf32>
    %46 = vector.shape_cast %45 : vector<16x16x128xf32> to vector<256x128xf32>
    %c4 = arith.constant 4 : index
    %c0_63 = arith.constant 0 : index
    %c0_64 = arith.constant 0 : index
    %47 = vector.load %arg2[%c4, %c0_63, %c0_64] : memref<9x128x128xf32, #tpu.memory_space<vmem>>, vector<1x128x128xf32>
    %48 = vector.shape_cast %47 : vector<1x128x128xf32> to vector<128x128xf32>
    %cst_65 = arith.constant dense<0.000000e+00> : vector<256x128xf32>
    %49 = tpu.matmul %46, %48, %cst_65 {dimension_numbers = #tpu.dot_dimension_numbers<[1], [0], [0], [1], [0, 0, 1, 1], [], []>} : vector<256x128xf32>, vector<128x128xf32>, vector<256x128xf32> -> vector<256x128xf32>
    %c0_66 = arith.constant 0 : index
    %c0_67 = arith.constant 0 : index
    %50 = vector.load %arg11[%c0_66, %c0_67] : memref<256x128xf32, #tpu.memory_space<vmem>>, vector<256x128xf32>
    %51 = arith.addf %50, %49 : vector<256x128xf32>
    %c0_68 = arith.constant 0 : index
    %c0_69 = arith.constant 0 : index
    %52 = vector.load %arg11[%c0_68, %c0_69] : memref<256x128xf32, #tpu.memory_space<vmem>>, vector<256x128xf32>
    tpu.vector_store %arg11[%c0_68, %c0_69], %51 {strides = array<i32>} : memref<256x128xf32, #tpu.memory_space<vmem>>, vector<256x128xf32>,
    %53 = vector.extract_strided_slice %36 {offsets = [2, 0, 0], sizes = [16, 16, 128], strides = [1, 1, 1]} : vector<18x16x128xf32> to vector<16x16x128xf32>
    %54 = vector.shape_cast %53 : vector<16x16x128xf32> to vector<256x128xf32>
    %c7 = arith.constant 7 : index
    %c0_70 = arith.constant 0 : index
    %c0_71 = arith.constant 0 : index
    %55 = vector.load %arg2[%c7, %c0_70, %c0_71] : memref<9x128x128xf32, #tpu.memory_space<vmem>>, vector<1x128x128xf32>
    %56 = vector.shape_cast %55 : vector<1x128x128xf32> to vector<128x128xf32>
    %cst_72 = arith.constant dense<0.000000e+00> : vector<256x128xf32>
    %57 = tpu.matmul %54, %56, %cst_72 {dimension_numbers = #tpu.dot_dimension_numbers<[1], [0], [0], [1], [0, 0, 1, 1], [], []>} : vector<256x128xf32>, vector<128x128xf32>, vector<256x128xf32> -> vector<256x128xf32>
    %c0_73 = arith.constant 0 : index
    %c0_74 = arith.constant 0 : index
    %58 = vector.load %arg11[%c0_73, %c0_74] : memref<256x128xf32, #tpu.memory_space<vmem>>, vector<256x128xf32>
    %59 = arith.addf %58, %57 : vector<256x128xf32>
    %c0_75 = arith.constant 0 : index
    %c0_76 = arith.constant 0 : index
    %60 = vector.load %arg11[%c0_75, %c0_76] : memref<256x128xf32, #tpu.memory_space<vmem>>, vector<256x128xf32>
    tpu.vector_store %arg11[%c0_75, %c0_76], %59 {strides = array<i32>} : memref<256x128xf32, #tpu.memory_space<vmem>>, vector<256x128xf32>,
    %c0_77 = arith.constant 0 : index
    %c2 = arith.constant 2 : index
    %c0_78 = arith.constant 0 : index
    %61 = vector.load %arg9[%c0_77, %c2, %c0_78] : memref<18x18x128xf32, #tpu.memory_space<vmem>>, vector<18x16x128xf32>
    %62 = vector.extract_strided_slice %61 {offsets = [0, 0, 0], sizes = [16, 16, 128], strides = [1, 1, 1]} : vector<18x16x128xf32> to vector<16x16x128xf32>
    %63 = vector.shape_cast %62 : vector<16x16x128xf32> to vector<256x128xf32>
    %c2_79 = arith.constant 2 : index
    %c0_80 = arith.constant 0 : index
    %c0_81 = arith.constant 0 : index
    %64 = vector.load %arg2[%c2_79, %c0_80, %c0_81] : memref<9x128x128xf32, #tpu.memory_space<vmem>>, vector<1x128x128xf32>
    %65 = vector.shape_cast %64 : vector<1x128x128xf32> to vector<128x128xf32>
    %cst_82 = arith.constant dense<0.000000e+00> : vector<256x128xf32>
    %66 = tpu.matmul %63, %65, %cst_82 {dimension_numbers = #tpu.dot_dimension_numbers<[1], [0], [0], [1], [0, 0, 1, 1], [], []>} : vector<256x128xf32>, vector<128x128xf32>, vector<256x128xf32> -> vector<256x128xf32>
    %c0_83 = arith.constant 0 : index
    %c0_84 = arith.constant 0 : index
    %67 = vector.load %arg11[%c0_83, %c0_84] : memref<256x128xf32, #tpu.memory_space<vmem>>, vector<256x128xf32>
    %68 = arith.addf %67, %66 : vector<256x128xf32>
    %c0_85 = arith.constant 0 : index
    %c0_86 = arith.constant 0 : index
    %69 = vector.load %arg11[%c0_85, %c0_86] : memref<256x128xf32, #tpu.memory_space<vmem>>, vector<256x128xf32>
    tpu.vector_store %arg11[%c0_85, %c0_86], %68 {strides = array<i32>} : memref<256x128xf32, #tpu.memory_space<vmem>>, vector<256x128xf32>,
    %70 = vector.extract_strided_slice %61 {offsets = [1, 0, 0], sizes = [16, 16, 128], strides = [1, 1, 1]} : vector<18x16x128xf32> to vector<16x16x128xf32>
    %71 = vector.shape_cast %70 : vector<16x16x128xf32> to vector<256x128xf32>
    %c5 = arith.constant 5 : index
    %c0_87 = arith.constant 0 : index
    %c0_88 = arith.constant 0 : index
    %72 = vector.load %arg2[%c5, %c0_87, %c0_88] : memref<9x128x128xf32, #tpu.memory_space<vmem>>, vector<1x128x128xf32>
    %73 = vector.shape_cast %72 : vector<1x128x128xf32> to vector<128x128xf32>
    %cst_89 = arith.constant dense<0.000000e+00> : vector<256x128xf32>
    %74 = tpu.matmul %71, %73, %cst_89 {dimension_numbers = #tpu.dot_dimension_numbers<[1], [0], [0], [1], [0, 0, 1, 1], [], []>} : vector<256x128xf32>, vector<128x128xf32>, vector<256x128xf32> -> vector<256x128xf32>
    %c0_90 = arith.constant 0 : index
    %c0_91 = arith.constant 0 : index
    %75 = vector.load %arg11[%c0_90, %c0_91] : memref<256x128xf32, #tpu.memory_space<vmem>>, vector<256x128xf32>
    %76 = arith.addf %75, %74 : vector<256x128xf32>
    %c0_92 = arith.constant 0 : index
    %c0_93 = arith.constant 0 : index
    %77 = vector.load %arg11[%c0_92, %c0_93] : memref<256x128xf32, #tpu.memory_space<vmem>>, vector<256x128xf32>
    tpu.vector_store %arg11[%c0_92, %c0_93], %76 {strides = array<i32>} : memref<256x128xf32, #tpu.memory_space<vmem>>, vector<256x128xf32>,
    %78 = vector.extract_strided_slice %61 {offsets = [2, 0, 0], sizes = [16, 16, 128], strides = [1, 1, 1]} : vector<18x16x128xf32> to vector<16x16x128xf32>
    %79 = vector.shape_cast %78 : vector<16x16x128xf32> to vector<256x128xf32>
    %c8 = arith.constant 8 : index
    %c0_94 = arith.constant 0 : index
    %c0_95 = arith.constant 0 : index
    %80 = vector.load %arg2[%c8, %c0_94, %c0_95] : memref<9x128x128xf32, #tpu.memory_space<vmem>>, vector<1x128x128xf32>
    %81 = vector.shape_cast %80 : vector<1x128x128xf32> to vector<128x128xf32>
    %cst_96 = arith.constant dense<0.000000e+00> : vector<256x128xf32>
    %82 = tpu.matmul %79, %81, %cst_96 {dimension_numbers = #tpu.dot_dimension_numbers<[1], [0], [0], [1], [0, 0, 1, 1], [], []>} : vector<256x128xf32>, vector<128x128xf32>, vector<256x128xf32> -> vector<256x128xf32>
    %c0_97 = arith.constant 0 : index
    %c0_98 = arith.constant 0 : index
    %83 = vector.load %arg11[%c0_97, %c0_98] : memref<256x128xf32, #tpu.memory_space<vmem>>, vector<256x128xf32>
    %84 = arith.addf %83, %82 : vector<256x128xf32>
    %c0_99 = arith.constant 0 : index
    %c0_100 = arith.constant 0 : index
    %85 = vector.load %arg11[%c0_99, %c0_100] : memref<256x128xf32, #tpu.memory_space<vmem>>, vector<256x128xf32>
    tpu.vector_store %arg11[%c0_99, %c0_100], %84 {strides = array<i32>} : memref<256x128xf32, #tpu.memory_space<vmem>>, vector<256x128xf32>,
    %c0_101 = arith.constant 0 : index
    %c0_102 = arith.constant 0 : index
    %86 = vector.load %arg11[%c0_101, %c0_102] : memref<256x128xf32, #tpu.memory_space<vmem>>, vector<256x128xf32>
    %c0_103 = arith.constant 0 : index
    %c0_104 = arith.constant 0 : index
    %87 = vector.load %arg4[%c0_103, %c0_104] : memref<1x128xf32, #tpu.memory_space<vmem>>, vector<1x128xf32>
    %88 = vector.broadcast %87 : vector<1x128xf32> to vector<256x128xf32>
    %89 = arith.mulf %86, %88 : vector<256x128xf32>
    %c0_105 = arith.constant 0 : index
    %c0_106 = arith.constant 0 : index
    %90 = vector.load %arg5[%c0_105, %c0_106] : memref<1x128xf32, #tpu.memory_space<vmem>>, vector<1x128xf32>
    %91 = vector.broadcast %90 : vector<1x128xf32> to vector<256x128xf32>
    %92 = arith.addf %89, %91 : vector<256x128xf32>
    %cst_107 = arith.constant 0.000000e+00 : f32
    %93 = vector.broadcast %cst_107 : f32 to vector<256x128xf32>
    %94 = arith.maximumf %92, %93 : vector<256x128xf32>
    %95 = vector.shape_cast %94 : vector<256x128xf32> to vector<16x16x128xf32>
    %c1_108 = arith.constant 1 : index
    %c1_109 = arith.constant 1 : index
    %c0_110 = arith.constant 0 : index
    %96 = vector.load %arg10[%c1_108, %c1_109, %c0_110] : memref<18x18x128xf32, #tpu.memory_space<vmem>>, vector<16x16x128xf32>
    tpu.vector_store %arg10[%c1_108, %c1_109, %c0_110], %95 {strides = array<i32>} : memref<18x18x128xf32, #tpu.memory_space<vmem>>, vector<16x16x128xf32>,
    %c0_111 = arith.constant 0 : index
    %c0_112 = arith.constant 0 : index
    %c0_113 = arith.constant 0 : index
    %97 = vector.load %arg10[%c0_111, %c0_112, %c0_113] : memref<18x18x128xf32, #tpu.memory_space<vmem>>, vector<18x16x128xf32>
    %98 = vector.extract_strided_slice %97 {offsets = [0, 0, 0], sizes = [16, 16, 128], strides = [1, 1, 1]} : vector<18x16x128xf32> to vector<16x16x128xf32>
    %99 = vector.shape_cast %98 : vector<16x16x128xf32> to vector<256x128xf32>
    %c0_114 = arith.constant 0 : index
    %c0_115 = arith.constant 0 : index
    %c0_116 = arith.constant 0 : index
    %100 = vector.load %arg3[%c0_114, %c0_115, %c0_116] : memref<9x128x128xf32, #tpu.memory_space<vmem>>, vector<1x128x128xf32>
    %101 = vector.shape_cast %100 : vector<1x128x128xf32> to vector<128x128xf32>
    %cst_117 = arith.constant dense<0.000000e+00> : vector<256x128xf32>
    %102 = tpu.matmul %99, %101, %cst_117 {dimension_numbers = #tpu.dot_dimension_numbers<[1], [0], [0], [1], [0, 0, 1, 1], [], []>} : vector<256x128xf32>, vector<128x128xf32>, vector<256x128xf32> -> vector<256x128xf32>
    %c0_118 = arith.constant 0 : index
    %c0_119 = arith.constant 0 : index
    %103 = vector.load %arg11[%c0_118, %c0_119] : memref<256x128xf32, #tpu.memory_space<vmem>>, vector<256x128xf32>
    tpu.vector_store %arg11[%c0_118, %c0_119], %102 {strides = array<i32>} : memref<256x128xf32, #tpu.memory_space<vmem>>, vector<256x128xf32>,
    %104 = vector.extract_strided_slice %97 {offsets = [1, 0, 0], sizes = [16, 16, 128], strides = [1, 1, 1]} : vector<18x16x128xf32> to vector<16x16x128xf32>
    %105 = vector.shape_cast %104 : vector<16x16x128xf32> to vector<256x128xf32>
    %c3_120 = arith.constant 3 : index
    %c0_121 = arith.constant 0 : index
    %c0_122 = arith.constant 0 : index
    %106 = vector.load %arg3[%c3_120, %c0_121, %c0_122] : memref<9x128x128xf32, #tpu.memory_space<vmem>>, vector<1x128x128xf32>
    %107 = vector.shape_cast %106 : vector<1x128x128xf32> to vector<128x128xf32>
    %cst_123 = arith.constant dense<0.000000e+00> : vector<256x128xf32>
    %108 = tpu.matmul %105, %107, %cst_123 {dimension_numbers = #tpu.dot_dimension_numbers<[1], [0], [0], [1], [0, 0, 1, 1], [], []>} : vector<256x128xf32>, vector<128x128xf32>, vector<256x128xf32> -> vector<256x128xf32>
    %c0_124 = arith.constant 0 : index
    %c0_125 = arith.constant 0 : index
    %109 = vector.load %arg11[%c0_124, %c0_125] : memref<256x128xf32, #tpu.memory_space<vmem>>, vector<256x128xf32>
    %110 = arith.addf %109, %108 : vector<256x128xf32>
    %c0_126 = arith.constant 0 : index
    %c0_127 = arith.constant 0 : index
    %111 = vector.load %arg11[%c0_126, %c0_127] : memref<256x128xf32, #tpu.memory_space<vmem>>, vector<256x128xf32>
    tpu.vector_store %arg11[%c0_126, %c0_127], %110 {strides = array<i32>} : memref<256x128xf32, #tpu.memory_space<vmem>>, vector<256x128xf32>,
    %112 = vector.extract_strided_slice %97 {offsets = [2, 0, 0], sizes = [16, 16, 128], strides = [1, 1, 1]} : vector<18x16x128xf32> to vector<16x16x128xf32>
    %113 = vector.shape_cast %112 : vector<16x16x128xf32> to vector<256x128xf32>
    %c6_128 = arith.constant 6 : index
    %c0_129 = arith.constant 0 : index
    %c0_130 = arith.constant 0 : index
    %114 = vector.load %arg3[%c6_128, %c0_129, %c0_130] : memref<9x128x128xf32, #tpu.memory_space<vmem>>, vector<1x128x128xf32>
    %115 = vector.shape_cast %114 : vector<1x128x128xf32> to vector<128x128xf32>
    %cst_131 = arith.constant dense<0.000000e+00> : vector<256x128xf32>
    %116 = tpu.matmul %113, %115, %cst_131 {dimension_numbers = #tpu.dot_dimension_numbers<[1], [0], [0], [1], [0, 0, 1, 1], [], []>} : vector<256x128xf32>, vector<128x128xf32>, vector<256x128xf32> -> vector<256x128xf32>
    %c0_132 = arith.constant 0 : index
    %c0_133 = arith.constant 0 : index
    %117 = vector.load %arg11[%c0_132, %c0_133] : memref<256x128xf32, #tpu.memory_space<vmem>>, vector<256x128xf32>
    %118 = arith.addf %117, %116 : vector<256x128xf32>
    %c0_134 = arith.constant 0 : index
    %c0_135 = arith.constant 0 : index
    %119 = vector.load %arg11[%c0_134, %c0_135] : memref<256x128xf32, #tpu.memory_space<vmem>>, vector<256x128xf32>
    tpu.vector_store %arg11[%c0_134, %c0_135], %118 {strides = array<i32>} : memref<256x128xf32, #tpu.memory_space<vmem>>, vector<256x128xf32>,
    %c0_136 = arith.constant 0 : index
    %c1_137 = arith.constant 1 : index
    %c0_138 = arith.constant 0 : index
    %120 = vector.load %arg10[%c0_136, %c1_137, %c0_138] : memref<18x18x128xf32, #tpu.memory_space<vmem>>, vector<18x16x128xf32>
    %121 = vector.extract_strided_slice %120 {offsets = [0, 0, 0], sizes = [16, 16, 128], strides = [1, 1, 1]} : vector<18x16x128xf32> to vector<16x16x128xf32>
    %122 = vector.shape_cast %121 : vector<16x16x128xf32> to vector<256x128xf32>
    %c1_139 = arith.constant 1 : index
    %c0_140 = arith.constant 0 : index
    %c0_141 = arith.constant 0 : index
    %123 = vector.load %arg3[%c1_139, %c0_140, %c0_141] : memref<9x128x128xf32, #tpu.memory_space<vmem>>, vector<1x128x128xf32>
    %124 = vector.shape_cast %123 : vector<1x128x128xf32> to vector<128x128xf32>
    %cst_142 = arith.constant dense<0.000000e+00> : vector<256x128xf32>
    %125 = tpu.matmul %122, %124, %cst_142 {dimension_numbers = #tpu.dot_dimension_numbers<[1], [0], [0], [1], [0, 0, 1, 1], [], []>} : vector<256x128xf32>, vector<128x128xf32>, vector<256x128xf32> -> vector<256x128xf32>
    %c0_143 = arith.constant 0 : index
    %c0_144 = arith.constant 0 : index
    %126 = vector.load %arg11[%c0_143, %c0_144] : memref<256x128xf32, #tpu.memory_space<vmem>>, vector<256x128xf32>
    %127 = arith.addf %126, %125 : vector<256x128xf32>
    %c0_145 = arith.constant 0 : index
    %c0_146 = arith.constant 0 : index
    %128 = vector.load %arg11[%c0_145, %c0_146] : memref<256x128xf32, #tpu.memory_space<vmem>>, vector<256x128xf32>
    tpu.vector_store %arg11[%c0_145, %c0_146], %127 {strides = array<i32>} : memref<256x128xf32, #tpu.memory_space<vmem>>, vector<256x128xf32>,
    %129 = vector.extract_strided_slice %120 {offsets = [1, 0, 0], sizes = [16, 16, 128], strides = [1, 1, 1]} : vector<18x16x128xf32> to vector<16x16x128xf32>
    %130 = vector.shape_cast %129 : vector<16x16x128xf32> to vector<256x128xf32>
    %c4_147 = arith.constant 4 : index
    %c0_148 = arith.constant 0 : index
    %c0_149 = arith.constant 0 : index
    %131 = vector.load %arg3[%c4_147, %c0_148, %c0_149] : memref<9x128x128xf32, #tpu.memory_space<vmem>>, vector<1x128x128xf32>
    %132 = vector.shape_cast %131 : vector<1x128x128xf32> to vector<128x128xf32>
    %cst_150 = arith.constant dense<0.000000e+00> : vector<256x128xf32>
    %133 = tpu.matmul %130, %132, %cst_150 {dimension_numbers = #tpu.dot_dimension_numbers<[1], [0], [0], [1], [0, 0, 1, 1], [], []>} : vector<256x128xf32>, vector<128x128xf32>, vector<256x128xf32> -> vector<256x128xf32>
    %c0_151 = arith.constant 0 : index
    %c0_152 = arith.constant 0 : index
    %134 = vector.load %arg11[%c0_151, %c0_152] : memref<256x128xf32, #tpu.memory_space<vmem>>, vector<256x128xf32>
    %135 = arith.addf %134, %133 : vector<256x128xf32>
    %c0_153 = arith.constant 0 : index
    %c0_154 = arith.constant 0 : index
    %136 = vector.load %arg11[%c0_153, %c0_154] : memref<256x128xf32, #tpu.memory_space<vmem>>, vector<256x128xf32>
    tpu.vector_store %arg11[%c0_153, %c0_154], %135 {strides = array<i32>} : memref<256x128xf32, #tpu.memory_space<vmem>>, vector<256x128xf32>,
    %137 = vector.extract_strided_slice %120 {offsets = [2, 0, 0], sizes = [16, 16, 128], strides = [1, 1, 1]} : vector<18x16x128xf32> to vector<16x16x128xf32>
    %138 = vector.shape_cast %137 : vector<16x16x128xf32> to vector<256x128xf32>
    %c7_155 = arith.constant 7 : index
    %c0_156 = arith.constant 0 : index
    %c0_157 = arith.constant 0 : index
    %139 = vector.load %arg3[%c7_155, %c0_156, %c0_157] : memref<9x128x128xf32, #tpu.memory_space<vmem>>, vector<1x128x128xf32>
    %140 = vector.shape_cast %139 : vector<1x128x128xf32> to vector<128x128xf32>
    %cst_158 = arith.constant dense<0.000000e+00> : vector<256x128xf32>
    %141 = tpu.matmul %138, %140, %cst_158 {dimension_numbers = #tpu.dot_dimension_numbers<[1], [0], [0], [1], [0, 0, 1, 1], [], []>} : vector<256x128xf32>, vector<128x128xf32>, vector<256x128xf32> -> vector<256x128xf32>
    %c0_159 = arith.constant 0 : index
    %c0_160 = arith.constant 0 : index
    %142 = vector.load %arg11[%c0_159, %c0_160] : memref<256x128xf32, #tpu.memory_space<vmem>>, vector<256x128xf32>
    %143 = arith.addf %142, %141 : vector<256x128xf32>
    %c0_161 = arith.constant 0 : index
    %c0_162 = arith.constant 0 : index
    %144 = vector.load %arg11[%c0_161, %c0_162] : memref<256x128xf32, #tpu.memory_space<vmem>>, vector<256x128xf32>
    tpu.vector_store %arg11[%c0_161, %c0_162], %143 {strides = array<i32>} : memref<256x128xf32, #tpu.memory_space<vmem>>, vector<256x128xf32>,
    %c0_163 = arith.constant 0 : index
    %c2_164 = arith.constant 2 : index
    %c0_165 = arith.constant 0 : index
    %145 = vector.load %arg10[%c0_163, %c2_164, %c0_165] : memref<18x18x128xf32, #tpu.memory_space<vmem>>, vector<18x16x128xf32>
    %146 = vector.extract_strided_slice %145 {offsets = [0, 0, 0], sizes = [16, 16, 128], strides = [1, 1, 1]} : vector<18x16x128xf32> to vector<16x16x128xf32>
    %147 = vector.shape_cast %146 : vector<16x16x128xf32> to vector<256x128xf32>
    %c2_166 = arith.constant 2 : index
    %c0_167 = arith.constant 0 : index
    %c0_168 = arith.constant 0 : index
    %148 = vector.load %arg3[%c2_166, %c0_167, %c0_168] : memref<9x128x128xf32, #tpu.memory_space<vmem>>, vector<1x128x128xf32>
    %149 = vector.shape_cast %148 : vector<1x128x128xf32> to vector<128x128xf32>
    %cst_169 = arith.constant dense<0.000000e+00> : vector<256x128xf32>
    %150 = tpu.matmul %147, %149, %cst_169 {dimension_numbers = #tpu.dot_dimension_numbers<[1], [0], [0], [1], [0, 0, 1, 1], [], []>} : vector<256x128xf32>, vector<128x128xf32>, vector<256x128xf32> -> vector<256x128xf32>
    %c0_170 = arith.constant 0 : index
    %c0_171 = arith.constant 0 : index
    %151 = vector.load %arg11[%c0_170, %c0_171] : memref<256x128xf32, #tpu.memory_space<vmem>>, vector<256x128xf32>
    %152 = arith.addf %151, %150 : vector<256x128xf32>
    %c0_172 = arith.constant 0 : index
    %c0_173 = arith.constant 0 : index
    %153 = vector.load %arg11[%c0_172, %c0_173] : memref<256x128xf32, #tpu.memory_space<vmem>>, vector<256x128xf32>
    tpu.vector_store %arg11[%c0_172, %c0_173], %152 {strides = array<i32>} : memref<256x128xf32, #tpu.memory_space<vmem>>, vector<256x128xf32>,
    %154 = vector.extract_strided_slice %145 {offsets = [1, 0, 0], sizes = [16, 16, 128], strides = [1, 1, 1]} : vector<18x16x128xf32> to vector<16x16x128xf32>
    %155 = vector.shape_cast %154 : vector<16x16x128xf32> to vector<256x128xf32>
    %c5_174 = arith.constant 5 : index
    %c0_175 = arith.constant 0 : index
    %c0_176 = arith.constant 0 : index
    %156 = vector.load %arg3[%c5_174, %c0_175, %c0_176] : memref<9x128x128xf32, #tpu.memory_space<vmem>>, vector<1x128x128xf32>
    %157 = vector.shape_cast %156 : vector<1x128x128xf32> to vector<128x128xf32>
    %cst_177 = arith.constant dense<0.000000e+00> : vector<256x128xf32>
    %158 = tpu.matmul %155, %157, %cst_177 {dimension_numbers = #tpu.dot_dimension_numbers<[1], [0], [0], [1], [0, 0, 1, 1], [], []>} : vector<256x128xf32>, vector<128x128xf32>, vector<256x128xf32> -> vector<256x128xf32>
    %c0_178 = arith.constant 0 : index
    %c0_179 = arith.constant 0 : index
    %159 = vector.load %arg11[%c0_178, %c0_179] : memref<256x128xf32, #tpu.memory_space<vmem>>, vector<256x128xf32>
    %160 = arith.addf %159, %158 : vector<256x128xf32>
    %c0_180 = arith.constant 0 : index
    %c0_181 = arith.constant 0 : index
    %161 = vector.load %arg11[%c0_180, %c0_181] : memref<256x128xf32, #tpu.memory_space<vmem>>, vector<256x128xf32>
    tpu.vector_store %arg11[%c0_180, %c0_181], %160 {strides = array<i32>} : memref<256x128xf32, #tpu.memory_space<vmem>>, vector<256x128xf32>,
    %162 = vector.extract_strided_slice %145 {offsets = [2, 0, 0], sizes = [16, 16, 128], strides = [1, 1, 1]} : vector<18x16x128xf32> to vector<16x16x128xf32>
    %163 = vector.shape_cast %162 : vector<16x16x128xf32> to vector<256x128xf32>
    %c8_182 = arith.constant 8 : index
    %c0_183 = arith.constant 0 : index
    %c0_184 = arith.constant 0 : index
    %164 = vector.load %arg3[%c8_182, %c0_183, %c0_184] : memref<9x128x128xf32, #tpu.memory_space<vmem>>, vector<1x128x128xf32>
    %165 = vector.shape_cast %164 : vector<1x128x128xf32> to vector<128x128xf32>
    %cst_185 = arith.constant dense<0.000000e+00> : vector<256x128xf32>
    %166 = tpu.matmul %163, %165, %cst_185 {dimension_numbers = #tpu.dot_dimension_numbers<[1], [0], [0], [1], [0, 0, 1, 1], [], []>} : vector<256x128xf32>, vector<128x128xf32>, vector<256x128xf32> -> vector<256x128xf32>
    %c0_186 = arith.constant 0 : index
    %c0_187 = arith.constant 0 : index
    %167 = vector.load %arg11[%c0_186, %c0_187] : memref<256x128xf32, #tpu.memory_space<vmem>>, vector<256x128xf32>
    %168 = arith.addf %167, %166 : vector<256x128xf32>
    %c0_188 = arith.constant 0 : index
    %c0_189 = arith.constant 0 : index
    %169 = vector.load %arg11[%c0_188, %c0_189] : memref<256x128xf32, #tpu.memory_space<vmem>>, vector<256x128xf32>
    tpu.vector_store %arg11[%c0_188, %c0_189], %168 {strides = array<i32>} : memref<256x128xf32, #tpu.memory_space<vmem>>, vector<256x128xf32>,
    %c0_190 = arith.constant 0 : index
    %c0_191 = arith.constant 0 : index
    %c0_192 = arith.constant 0 : index
    %c0_193 = arith.constant 0 : index
    %170 = vector.load %arg1[%c0_190, %c0_191, %c0_192, %c0_193] : memref<1x16x16x128xf32, #tpu.memory_space<vmem>>, vector<1x16x16x128xf32>
    %171 = vector.shape_cast %170 : vector<1x16x16x128xf32> to vector<16x16x128xf32>
    %172 = vector.shape_cast %171 : vector<16x16x128xf32> to vector<256x128xf32>
    %c0_194 = arith.constant 0 : index
    %c0_195 = arith.constant 0 : index
    %173 = vector.load %arg11[%c0_194, %c0_195] : memref<256x128xf32, #tpu.memory_space<vmem>>, vector<256x128xf32>
    %c0_196 = arith.constant 0 : index
    %c0_197 = arith.constant 0 : index
    %174 = vector.load %arg6[%c0_196, %c0_197] : memref<1x128xf32, #tpu.memory_space<vmem>>, vector<1x128xf32>
    %175 = vector.broadcast %174 : vector<1x128xf32> to vector<256x128xf32>
    %176 = arith.mulf %173, %175 : vector<256x128xf32>
    %c0_198 = arith.constant 0 : index
    %c0_199 = arith.constant 0 : index
    %177 = vector.load %arg7[%c0_198, %c0_199] : memref<1x128xf32, #tpu.memory_space<vmem>>, vector<1x128xf32>
    %178 = vector.broadcast %177 : vector<1x128xf32> to vector<256x128xf32>
    %179 = arith.addf %176, %178 : vector<256x128xf32>
    %180 = arith.addf %179, %172 : vector<256x128xf32>
    %cst_200 = arith.constant 0.000000e+00 : f32
    %181 = vector.broadcast %cst_200 : f32 to vector<256x128xf32>
    %182 = arith.maximumf %180, %181 : vector<256x128xf32>
    %183 = vector.shape_cast %182 : vector<256x128xf32> to vector<1x16x16x128xf32>
    %c0_201 = arith.constant 0 : index
    %c0_202 = arith.constant 0 : index
    %c0_203 = arith.constant 0 : index
    %c0_204 = arith.constant 0 : index
    %184 = vector.load %arg8[%c0_201, %c0_202, %c0_203, %c0_204] : memref<1x16x16x128xf32, #tpu.memory_space<vmem>>, vector<1x16x16x128xf32>
    tpu.vector_store %arg8[%c0_201, %c0_202, %c0_203, %c0_204], %183 {strides = array<i32>} : memref<1x16x16x128xf32, #tpu.memory_space<vmem>>, vector<1x16x16x128xf32>,
    return
  }
  func.func @transform_0(%arg0: i32) -> (i32, i32, i32, i32) {
    %c0_i32 = arith.constant 0 : i32
    %c0_i32_0 = arith.constant 0 : i32
    %c0_i32_1 = arith.constant 0 : i32
    %c0_i32_2 = arith.constant 0 : i32
    return %arg0, %c0_i32, %c0_i32_0, %c0_i32_1 : i32, i32, i32, i32
  }
  func.func @transform_1(%arg0: i32) -> (i32, i32, i32) {
    %c0_i32 = arith.constant 0 : i32
    %c0_i32_0 = arith.constant 0 : i32
    %c0_i32_1 = arith.constant 0 : i32
    %c0_i32_2 = arith.constant 0 : i32
    return %c0_i32, %c0_i32_0, %c0_i32_1 : i32, i32, i32
  }
  func.func @transform_2(%arg0: i32) -> (i32, i32, i32) {
    %c0_i32 = arith.constant 0 : i32
    %c0_i32_0 = arith.constant 0 : i32
    %c0_i32_1 = arith.constant 0 : i32
    %c0_i32_2 = arith.constant 0 : i32
    return %c0_i32, %c0_i32_0, %c0_i32_1 : i32, i32, i32
  }
  func.func @transform_3(%arg0: i32) -> (i32, i32) {
    %c0_i32 = arith.constant 0 : i32
    %c0_i32_0 = arith.constant 0 : i32
    %c0_i32_1 = arith.constant 0 : i32
    return %c0_i32, %c0_i32_0 : i32, i32
  }
  func.func @transform_4(%arg0: i32) -> (i32, i32) {
    %c0_i32 = arith.constant 0 : i32
    %c0_i32_0 = arith.constant 0 : i32
    %c0_i32_1 = arith.constant 0 : i32
    return %c0_i32, %c0_i32_0 : i32, i32
  }
  func.func @transform_5(%arg0: i32) -> (i32, i32) {
    %c0_i32 = arith.constant 0 : i32
    %c0_i32_0 = arith.constant 0 : i32
    %c0_i32_1 = arith.constant 0 : i32
    return %c0_i32, %c0_i32_0 : i32, i32
  }
  func.func @transform_6(%arg0: i32) -> (i32, i32) {
    %c0_i32 = arith.constant 0 : i32
    %c0_i32_0 = arith.constant 0 : i32
    %c0_i32_1 = arith.constant 0 : i32
    return %c0_i32, %c0_i32_0 : i32, i32
  }
  func.func @transform_7(%arg0: i32) -> (i32, i32, i32, i32) {
    %c0_i32 = arith.constant 0 : i32
    %c0_i32_0 = arith.constant 0 : i32
    %c0_i32_1 = arith.constant 0 : i32
    %c0_i32_2 = arith.constant 0 : i32
    return %arg0, %c0_i32, %c0_i32_0, %c0_i32_1 : i32, i32, i32, i32
  }
}

</mosaic_0001>

<bundles_post_ra>
// kernel: tpu_custom_call.1
= control target key start
LH: loop header
LB: loop body
LE: loop exit
PB: predicated region body
PF: predicated region fallthrough
CT: control target
= control target key end

     0   :  { %s12517_s0 = inlined_call_operand.hbm [shape: f32[2,16,16,128], index: 0, kind: input, shape index: {}]   ;;  %s12518_s1 = inlined_call_operand.hbm [shape: f32[9,128,128], index: 1, kind: input, shape index: {}]   ;;  %s12519_s2 = inlined_call_operand.hbm [shape: f32[9,128,128], index: 2, kind: input, shape index: {}]   ;;  %s12520_s3 = inlined_call_operand.vmem [shape: f32[1,128], index: 3, kind: input, shape index: {}]   ;;  %s12521_s4 = inlined_call_operand.vmem [shape: f32[1,128], index: 4, kind: input, shape index: {}]   ;;  %s12522_s5 = inlined_call_operand.vmem [shape: f32[1,128], index: 5, kind: input, shape index: {}]   ;;  %s12523_s6 = inlined_call_operand.vmem [shape: f32[1,128], index: 6, kind: input, shape index: {}]   ;;  %s12524_s7 = inlined_call_operand.hbm [shape: f32[2,16,16,128], index: 7, kind: output, shape index: {}]  }
   0x1   :  { %12567 = sst [smem:[#allocation124_spill]] %s12518_s1 }
   0x2   :  { %12 = vsyncpa [#allocation6], 0 }
   0x3   :  { %14 = vsyncpa [#allocation6 + $0x1], 0 }
   0x4   :  { %15 = vsyncpa [#allocation9], 0 }
   0x5   :  { %16 = vsyncpa [#allocation7], 0 }
   0x6   :  { %18 = vsyncpa [#allocation7 + $0x1], 0  ;;  %s9778_s24 = smov 0   ;;  %s9780_s25 = smov 0  }
   0x7   :  { %s9782_s26 = smov 0   ;;  %s9784_s27 = smov 0  }
   0x8 LB: > { %s9799_s28 = sadd.s32 4294967295, %s9727_s27   ;;  %s7166_s29 = sadd.s32 4294967294, %s9727_s27   ;;  %s9727_s27 = sphi %s9784_s27, %s12970_s27   ;;  %s9723_s26 = sphi %s9782_s26, %s12969_s26   ;;  %s9719_s25 = sphi %s9780_s25, %s12968_s25   ;;  %s9715_s24 = sphi %s9778_s24, %s12967_s24  }
   0x9   : > { %p44_p0 = scmp.ne.s32.totalorder %s9719_s25, %s9715_s24  ;;  %p12526_p1 = scmp.eq.s32.totalorder %s9799_s28, 0 }
   0xa   : > { %p194_p2 = scmp.eq.s32.totalorder %s9799_s28, 1  ;;  %p200_p3 = scmp.eq.s32.totalorder %s7166_s29, 1 }
   0xb   : > { %p9808_p4 = por %p12526_p1, %p44_p0  ;;  %p7167_p5 = scmp.ge.s32.totalorder %s9727_s27, 1 }
   0xc   : > { %p9813_p6 = por %p200_p3, %p44_p0  ;;  %p207_p7 = scmp.lt.s32.totalorder %s9727_s27, 3 }
   0xd   : > { %s12568_s30 = scalar_select %p9808_p4, 1, 0 }
   0xe   : > { %s12569_s8 = scalar_select %p9813_p6, 1, 0 }
   0xf   : > { %p9818_p8 = pnand %p7167_p5, %p207_p7  ;;  %s9729_s10 = smov [#allocation8]  }
  0x10   : > { %s219_s11 = sshll.u32 %s9729_s10, 4  ;;  %s9730_s13 = smov [#allocation10]   ;;  %s220_s11 = int_to_ptr.vmem [resolvable:$true] %s219_s11 }
  0x11   : > { %s12570_s9 = scalar_select %p9818_p8, 1, 0 }
  0x12   : > { %p9506_p9 = pneg %p9818_p8  ;;  %s232_s14 = sshll.u32 %s9730_s13, 4  ;;  %s233_s14 = int_to_ptr.vmem [resolvable:$true] %s232_s14 }
  0x13   : > { %s9590_s15 = scalar_lea.vmem %s220_s11, 18432  ;;  %p9598_p5 = scmp.lt.s32.totalorder %s220_s11, %s220_s11 }
  0x14   : > { %p9827_p11 = pnand %p9506_p9, %p12526_p1  ;;  %p9591_p13 = scmp.ne.s32.totalorder %s220_s11, %s9590_s15 }
  0x15   : > { %p9599_p7 = scmp.lt.s32.totalorder %s9590_s15, %s9590_s15 }
  0x16   : > { %p9581_p12 = pneg %p9827_p11 }
  0x17   : > { %p9600_p10 = por %p9599_p7, %p9598_p5 }
  0x18   : > { %p9593_p0 = pnand %p9591_p13, %p9581_p12 }
  0x1a   : > { %p9594_p3 = pneg %p9593_p0 }
  0x1c   : > { %p9601_p9 = pnand %p9600_p10, %p9594_p3 }
  0x1e   : > { %9604 = shalt.err (!%p9601_p9)
}
  0x1f   : > { %s12525_s16 = smov 128   ;;  %s12527_s17 = smov 8  }
  0x20   : > { %s12572_s1 = sld [smem:[#allocation124_spill]]  ;;  %s9616_s20 = scalar_lea.vmem %s233_s14, 18432 }
  0x21   : > { %p9617_p13 = scmp.ne.s32.totalorder %s233_s14, %s9616_s20  ;;  %p9624_p10 = scmp.lt.s32.totalorder %s233_s14, %s233_s14 }
  0x22   : > { %p9625_p3 = scmp.lt.s32.totalorder %s9616_s20, %s9616_s20 }
  0x23   : > { %p9619_p0 = pnand %p9617_p13, %p9581_p12 }
  0x24   : > { %p9626_p7 = por %p9625_p3, %p9624_p10 }
  0x25   : > { %p9620_p5 = pneg %p9619_p0 }
  0x26   : > { %9509 = dma.hbm_to_vmem [thread:$0]  (!%p9827_p11), %s12572_s1, 18432, %s220_s11, [#allocation9], %s12525_s16, %s12525_s16, %s12527_s17  }
  0x27   : > { %p9627_p9 = pnand %p9626_p7, %p9620_p5 }
  0x29   : > { %9630 = shalt.err (!%p9627_p9)
}
  0x2a   : > { %9512 = dma.hbm_to_vmem [thread:$0]  (!%p9827_p11), %s12519_s2, 18432, %s233_s14, [#allocation9], %s12525_s16, %s12525_s16, %s12527_s17  }
  0x2b   : > { %s9856_s23 = sadd.s32 1, %s9727_s27   ;;  %s31_s29 = sadd.s32 1, %s9723_s26 }
  0x2c   : > { %s28_s10 = ssub.s32 %s9727_s27, %s9856_s23  ;;  %p38_p12 = scmp.ne.s32.totalorder %s9723_s26, %s9719_s25 }
  0x2d   : > { %p29_p13 = scmp.eq.s32.totalorder %s28_s10, 0  ;;  %p39_p0 = scmp.eq.s32.totalorder %s9727_s27, 0 }
  0x2e   : > { %p9866_p5 = por %p194_p2, %p38_p12  ;;  %p9523_p10 = scmp.lt.s32.totalorder %s9727_s27, 2 }
  0x2f   : > { %s9872_s12 = scalar_select %p29_p13, %s9723_s26, %s31_s29  }
  0x30   : > { %s12573_s11 = scalar_select %p9866_p5, 1, 0 }
  0x31   : > { %p40_p3 = por %p39_p0, %p38_p12  ;;  %s258_s13 = sand.u32 1, %s9723_s26  }
  0x32   : > { %s7171_s15 = sshll.u32 %s258_s13, 8  ;;  %s7188_s14 = sshll.u32 %s9727_s27, 12 }
  0x33   : > { %s9879_s20 = scalar_lea.hbm %s12517_s0, %s7188_s14  ;;  %s262_s21 = scalar_lea.vmem [#allocation5], %s7171_s15 }
  0x34   : > { %s269_s22 = sshll.u32 %s262_s21, 4  ;;  %p9883_p2 = pnand %p9523_p10, %p40_p3  ;;  %s9881_s22 = int_to_ptr.vmem [resolvable:$true] %s269_s22 }
  0x35   : > { %s9887_s29 = scalar_lea.sflag [#allocation6], %s258_s13  ;;  %s9631_s16 = scalar_lea.hbm %s9879_s20, 4096 }
  0x36   : > { %p9632_p11 = scmp.ne.s32.totalorder %s9879_s20, %s9631_s16  ;;  %p9633_p7 = pneg %p9883_p2 }
  0x37   : > { %s9636_s15 = scalar_lea.hbm %s12517_s0, 8192  ;;  %p9637_p13 = scmp.lt.s32.totalorder %s9879_s20, %s12517_s0 }
  0x38   : > { %p9634_p9 = pnand %p9633_p7, %p9632_p11  ;;  %p9638_p0 = scmp.lt.s32.totalorder %s9636_s15, %s9631_s16 }
  0x3a   : > { %p9635_p12 = pneg %p9634_p9  ;;  %p9639_p10 = por %p9638_p0, %p9637_p13 }
  0x3c   : > { %p9640_p3 = pnand %p9639_p10, %p9635_p12 }
  0x3e   : > { %9643 = shalt.err (!%p9640_p3)
}
  0x3f   : > { %s9644_s13 = scalar_lea.vmem %s9881_s22, 4096  ;;  %s9733_s17 = smov [#allocation5]  }
  0x40   : > { %p9645_p1 = scmp.ne.s32.totalorder %s9881_s22, %s9644_s13  ;;  %s9649_s1 = sshll.u32 %s9733_s17, 4  ;;  %s9650_s1 = int_to_ptr.vmem [resolvable:$false] %s9649_s1 }
  0x41   : > { %s9651_s14 = scalar_lea.vmem %s9650_s1, 8192  ;;  %p9652_p9 = scmp.lt.s32.totalorder %s9881_s22, %s9650_s1 }
  0x42   : > { %p9647_p6 = pnand %p9645_p1, %p9633_p7  ;;  %p9653_p5 = scmp.lt.s32.totalorder %s9651_s14, %s9644_s13 }
  0x44   : > { %p9648_p11 = pneg %p9647_p6  ;;  %p9654_p4 = por %p9653_p5, %p9652_p9 }
  0x46   : > { %p9655_p8 = pnand %p9654_p4, %p9648_p11 }
  0x48   : > { %9658 = shalt.err (!%p9655_p8)
}
  0x49   : > { %s12575_s16 = smov 8   ;;  %s12576_s18 = smov 128  }
  0x4a   : > { %9516 = dma.hbm_to_vmem [thread:$0]  (!%p9883_p2), %s9879_s20, 4096, %s9881_s22, %s9887_s29, %s12576_s18, %s12576_s18, %s12575_s16  }
  0x4b   : > { %p12577_p1 = scmp.ne.s32.totalorder %s12570_s9, 0 }
  0x4d   : > { %281 = sbr.rel (%p12577_p1) target bundleno = 1140 (0x474), region = 48 }
  0x52   : > { %s9914_s17 = sand.u32 1, %s9719_s25   ;;  %p12578_p4 = scmp.ne.s32.totalorder %s12568_s30, 0 }
  0x53   : > { %s7175_s1 = sshll.u32 %s9914_s17, 8  ;;  %s284_s15 = scalar_lea.sflag [#allocation6], %s9914_s17 }
  0x54   : > { %s9920_s10 = scalar_lea.vmem [#allocation5], %s7175_s1 }
  0x55   : > { %9702 = dma.done.wait (%p12578_p4), %s284_s15, 4096  }
  0x56   : > { %9704 = vsyncadd (%p12578_p4), %s284_s15, 4294963200  ;;  %p12579_p6 = scmp.eq.s32.totalorder %s9799_s28, 0 }
  0x58   : > { %9706 = dma.done.wait (%p12579_p6), [#allocation9], 36864   ;;  %p12580_p8 = pmov %p12579_p6 }
  0x59   : > { %v9734_v0 = vmov 0.0   ;;  %v528_v1 = vld [vmem:[#allocation8 + $0x78] sm:$0xff]  ;;  %v527_v3 = vld [vmem:[#allocation8 + $0x70] sm:$0xff]  ;;  %v526_v5 = vld [vmem:[#allocation8 + $0x68] sm:$0xff]  ;;  %s12241_s14 = scalar_lea.vmem [#allocation11], %s7175_s1  ;;  %s7189_s16 = sshll.u32 %s9799_s28, 12 }
  0x5a   : > { %9708 = vsyncadd (%p12580_p8), [#allocation9], 4294930432  ;;  %326 = vst [vmem:[#allocation2] sm:$0xff] %v9734_v0  ;;  %v802_v2 = vld [vmem:[#allocation8 + $0x1f8] sm:$0xff]  ;;  %8054 = vmatprep.subr.mxu0 %v528_v1  ;;  %v801_v4 = vld [vmem:[#allocation8 + $0x1f0] sm:$0xff]  ;;  %s7074_s18 = sshll.u32 %s12241_s14, 4  ;;  %s12470_s30 = scalar_lea.hbm %s12524_s7, %s7189_s16  ;;  %s12472_s18 = int_to_ptr.vmem [resolvable:$true] %s7074_s18 }
  0x5b   : > { %327 = vst [vmem:[#allocation2 + $0x8] sm:$0xff] %v9734_v0  ;;  %328 = vst [vmem:[#allocation2 + $0x10] sm:$0x3] %v9734_v0  ;;  %8134 = vmatprep.subr.mxu1 %v802_v2  ;;  %8055 = vmatpush3.msra.mxu0 %v528_v1  ;;  %v800_v6 = vld [vmem:[#allocation8 + $0x1e8] sm:$0xff]  ;;  %v525_v7 = vld [vmem:[#allocation8 + $0x60] sm:$0xff]  ;;  %s9659_s28 = scalar_lea.vmem %s12472_s18, 4096 }
  0x5c   : > { %330 = vst [vmem:[#allocation2 + $0x198] sm:$0xff] %v9734_v0  ;;  %331 = vst [vmem:[#allocation2 + $0x1a0] sm:$0xff] %v9734_v0  ;;  %8135 = vmatpush3.msra.mxu1 %v802_v2  ;;  %8056 = vmatprep.subr.mxu0 %v527_v3  ;;  %v799_v8 = vld [vmem:[#allocation8 + $0x1e0] sm:$0xff]  ;;  %v524_v9 = vld [vmem:[#allocation8 + $0x58] sm:$0xff]  ;;  %p9660_p5 = scmp.ne.s32.totalorder %s12472_s18, %s9659_s28  ;;  %p12964_p2 = scmp.ne.s32.totalorder %s12573_s11, 0 }
  0x5d   : > { %332 = vst [vmem:[#allocation2 + $0x1a8] sm:$0x3] %v9734_v0  ;;  %334 = vst [vmem:[#allocation2 + $0x18] sm:$0x1] %v9734_v0  ;;  %8136 = vmatprep.subr.mxu1 %v801_v4  ;;  %8057 = vmatpush3.msra.mxu0 %v527_v3  ;;  %v798_v10 = vld [vmem:[#allocation8 + $0x1d8] sm:$0xff]  ;;  %v523_v11 = vld [vmem:[#allocation8 + $0x50] sm:$0xff] }
  0x5e   : > { %335 = vst [vmem:[#allocation2 + $0x30] sm:$0x1] %v9734_v0  ;;  %336 = vst [vmem:[#allocation2 + $0x48] sm:$0x1] %v9734_v0  ;;  %8137 = vmatpush3.msra.mxu1 %v801_v4  ;;  %8058 = vmatprep.subr.mxu0 %v526_v5  ;;  %v797_v12 = vld [vmem:[#allocation8 + $0x1d0] sm:$0xff]  ;;  %v522_v13 = vld [vmem:[#allocation8 + $0x48] sm:$0xff]  ;;  %p9661_p7 = pnand %p9660_p5, %p12964_p2 }
  0x5f   : > { %337 = vst [vmem:[#allocation2 + $0x60] sm:$0x1] %v9734_v0  ;;  %338 = vst [vmem:[#allocation2 + $0x78] sm:$0x1] %v9734_v0  ;;  %8138 = vmatprep.subr.mxu1 %v800_v6  ;;  %8059 = vmatpush3.msra.mxu0 %v526_v5  ;;  %v796_v14 = vld [vmem:[#allocation8 + $0x1c8] sm:$0xff]  ;;  %v521_v15 = vld [vmem:[#allocation8 + $0x40] sm:$0xff] }
  0x60   : > { %339 = vst [vmem:[#allocation2 + $0x90] sm:$0x1] %v9734_v0  ;;  %340 = vst [vmem:[#allocation2 + $0xa8] sm:$0x1] %v9734_v0  ;;  %8139 = vmatpush3.msra.mxu1 %v800_v6  ;;  %8060 = vmatprep.subr.mxu0 %v525_v7  ;;  %v10015_v16 = vld [vmem:[%s9920_s10] sm:$0xff]  ;;  %v10018_v17 = vld [vmem:[%s9920_s10 + $0x8] sm:$0xff]  ;;  %p9662_p12 = pneg %p9661_p7 }
  0x61   : > { %341 = vst [vmem:[#allocation2 + $0xc0] sm:$0x1] %v9734_v0  ;;  %342 = vst [vmem:[#allocation2 + $0xd8] sm:$0x1] %v9734_v0  ;;  %8140 = vmatprep.subr.mxu1 %v799_v8  ;;  %8061 = vmatpush3.msra.mxu0 %v525_v7  ;;  %v795_v18 = vld [vmem:[#allocation8 + $0x1c0] sm:$0xff]  ;;  %v10023_v19 = vld [vmem:[%s9920_s10 + $0x10] sm:$0xff] }
  0x62   : > { %343 = vst [vmem:[#allocation2 + $0xf0] sm:$0x1] %v9734_v0  ;;  %344 = vst [vmem:[#allocation2 + $0x108] sm:$0x1] %v9734_v0  ;;  %8141 = vmatpush3.msra.mxu1 %v799_v8  ;;  %8062 = vmatprep.subr.mxu0 %v524_v9  ;;  %v10026_v20 = vld [vmem:[%s9920_s10 + $0x18] sm:$0xff]  ;;  %v10031_v22 = vld [vmem:[%s9920_s10 + $0x20] sm:$0xff] }
  0x63   : > { %345 = vst [vmem:[#allocation2 + $0x120] sm:$0x1] %v9734_v0  ;;  %346 = vst [vmem:[#allocation2 + $0x138] sm:$0x1] %v9734_v0  ;;  %8142 = vmatprep.subr.mxu1 %v798_v10  ;;  %8063 = vmatpush3.msra.mxu0 %v524_v9  ;;  %v520_v21 = vld [vmem:[#allocation8 + $0x38] sm:$0xff]  ;;  %v10034_v23 = vld [vmem:[%s9920_s10 + $0x28] sm:$0xff] }
  0x64   : > { %347 = vst [vmem:[#allocation2 + $0x150] sm:$0x1] %v9734_v0  ;;  %348 = vst [vmem:[#allocation2 + $0x168] sm:$0x1] %v9734_v0  ;;  %8143 = vmatpush3.msra.mxu1 %v798_v10  ;;  %8064 = vmatprep.subr.mxu0 %v523_v11  ;;  %v794_v24 = vld [vmem:[#allocation8 + $0x1b8] sm:$0xff]  ;;  %v10039_v25 = vld [vmem:[%s9920_s10 + $0x30] sm:$0xff] }
  0x65   : > { %349 = vst [vmem:[#allocation2 + $0x180] sm:$0x1] %v9734_v0  ;;  %352 = vst [vmem:[#allocation2 + $0x29] sm:$0x1] %v9734_v0  ;;  %8144 = vmatprep.subr.mxu1 %v797_v12  ;;  %8065 = vmatpush3.msra.mxu0 %v523_v11  ;;  %v10042_v26 = vld [vmem:[%s9920_s10 + $0x38] sm:$0xff]  ;;  %v519_v27 = vld [vmem:[#allocation8 + $0x30] sm:$0xff] }
  0x66   : > { %353 = vst [vmem:[#allocation2 + $0x41] sm:$0x1] %v9734_v0  ;;  %354 = vst [vmem:[#allocation2 + $0x59] sm:$0x1] %v9734_v0  ;;  %8145 = vmatpush3.msra.mxu1 %v797_v12  ;;  %8066 = vmatprep.subr.mxu0 %v522_v13  ;;  %v10047_v28 = vld [vmem:[%s9920_s10 + $0x40] sm:$0xff]  ;;  %v10050_v29 = vld [vmem:[%s9920_s10 + $0x48] sm:$0xff] }
  0x67   : > { %355 = vst [vmem:[#allocation2 + $0x71] sm:$0x1] %v9734_v0  ;;  %356 = vst [vmem:[#allocation2 + $0x89] sm:$0x1] %v9734_v0  ;;  %8146 = vmatprep.subr.mxu1 %v796_v14  ;;  %8067 = vmatpush3.msra.mxu0 %v522_v13  ;;  %v793_v30 = vld [vmem:[#allocation8 + $0x1b0] sm:$0xff]  ;;  %v10058_v32 = vld [vmem:[%s9920_s10 + $0x58] sm:$0xff] }
  0x68   : > { %357 = vst [vmem:[#allocation2 + $0xa1] sm:$0x1] %v9734_v0  ;;  %358 = vst [vmem:[#allocation2 + $0xb9] sm:$0x1] %v9734_v0  ;;  %8147 = vmatpush3.msra.mxu1 %v796_v14  ;;  %8068 = vmatprep.subr.mxu0 %v521_v15  ;;  %v10055_v31 = vld [vmem:[%s9920_s10 + $0x50] sm:$0xff]  ;;  %v518_v33 = vld [vmem:[#allocation8 + $0x28] sm:$0xff] }
  0x69   : > { %359 = vst [vmem:[#allocation2 + $0xd1] sm:$0x1] %v9734_v0  ;;  %360 = vst [vmem:[#allocation2 + $0xe9] sm:$0x1] %v9734_v0  ;;  %8148 = vmatprep.subr.mxu1 %v795_v18  ;;  %8069 = vmatpush3.msra.mxu0 %v521_v15  ;;  %v10063_v34 = vld [vmem:[%s9920_s10 + $0x60] sm:$0xff]  ;;  %v10066_v35 = vld [vmem:[%s9920_s10 + $0x68] sm:$0xff] }
  0x6a   : > { %361 = vst [vmem:[#allocation2 + $0x101] sm:$0x1] %v9734_v0  ;;  %362 = vst [vmem:[#allocation2 + $0x119] sm:$0x1] %v9734_v0  ;;  %8149 = vmatpush3.msra.mxu1 %v795_v18  ;;  %8070 = vmatprep.subr.mxu0 %v520_v21  ;;  %v792_v36 = vld [vmem:[#allocation8 + $0x1a8] sm:$0xff]  ;;  %v10071_v37 = vld [vmem:[%s9920_s10 + $0x70] sm:$0xff] }
  0x6b   : > { %363 = vst [vmem:[#allocation2 + $0x131] sm:$0x1] %v9734_v0  ;;  %364 = vst [vmem:[#allocation2 + $0x149] sm:$0x1] %v9734_v0  ;;  %8150 = vmatprep.subr.mxu1 %v794_v24  ;;  %8071 = vmatpush3.msra.mxu0 %v520_v21  ;;  %v10074_v38 = vld [vmem:[%s9920_s10 + $0x78] sm:$0xff]  ;;  %v10079_v39 = vld [vmem:[%s9920_s10 + $0x80] sm:$0xff] }
  0x6c   : > { %365 = vst [vmem:[#allocation2 + $0x161] sm:$0x1] %v9734_v0  ;;  %366 = vst [vmem:[#allocation2 + $0x179] sm:$0x1] %v9734_v0  ;;  %8151 = vmatpush3.msra.mxu1 %v794_v24  ;;  %8072 = vmatprep.subr.mxu0 %v519_v27  ;;  %v517_v40 = vld [vmem:[#allocation8 + $0x20] sm:$0xff]  ;;  %v10083_v42 = vld [vmem:[%s9920_s10 + $0x88] sm:$0xff] }
  0x6d   : > { %367 = vst [vmem:[#allocation2 + $0x191] sm:$0x1] %v9734_v0  ;;  %369 = vst [vmem:[#allocation3] sm:$0xff] %v9734_v0  ;;  %8152 = vmatprep.subr.mxu1 %v793_v30  ;;  %8073 = vmatpush3.msra.mxu0 %v519_v27  ;;  %v791_v41 = vld [vmem:[#allocation8 + $0x1a0] sm:$0xff]  ;;  %v516_v43 = vld [vmem:[#allocation8 + $0x18] sm:$0xff]  ;;  %s9735_s9 = smov [#allocation11]  }
  0x6e   : > { %370 = vst [vmem:[#allocation3 + $0x8] sm:$0xff] %v9734_v0  ;;  %371 = vst [vmem:[#allocation3 + $0x10] sm:$0x3] %v9734_v0  ;;  %8153 = vmatpush3.msra.mxu1 %v793_v30  ;;  %8074 = vmatprep.subr.mxu0 %v518_v33  ;;  %v790_v44 = vld [vmem:[#allocation8 + $0x198] sm:$0xff]  ;;  %v10087_v45 = vld [vmem:[%s9920_s10 + $0x90] sm:$0xff]  ;;  %s9663_s20 = sshll.u32 %s9735_s9, 4  ;;  %s9664_s20 = int_to_ptr.vmem [resolvable:$false] %s9663_s20 }
  0x6f   : > { %373 = vst [vmem:[#allocation3 + $0x198] sm:$0xff] %v9734_v0  ;;  %374 = vst [vmem:[#allocation3 + $0x1a0] sm:$0xff] %v9734_v0  ;;  %8154 = vmatprep.subr.mxu1 %v792_v36  ;;  %8075 = vmatpush3.msra.mxu0 %v518_v33  ;;  %v515_v46 = vld [vmem:[#allocation8 + $0x10] sm:$0xff]  ;;  %v10091_v48 = vld [vmem:[%s9920_s10 + $0x98] sm:$0xff]  ;;  %s9665_s22 = scalar_lea.vmem %s9664_s20, 8192  ;;  %p9666_p13 = scmp.lt.s32.totalorder %s12472_s18, %s9664_s20 }
  0x70   : > { %375 = vst [vmem:[#allocation3 + $0x1a8] sm:$0x3] %v9734_v0  ;;  %377 = vst [vmem:[#allocation3 + $0x18] sm:$0x1] %v9734_v0  ;;  %8155 = vmatpush3.msra.mxu1 %v792_v36  ;;  %8076 = vmatprep.subr.mxu0 %v517_v40  ;;  %v789_v47 = vld [vmem:[#allocation8 + $0x190] sm:$0xff]  ;;  %v514_v49 = vld [vmem:[#allocation8 + $0x8] sm:$0xff]  ;;  %p9667_p0 = scmp.lt.s32.totalorder %s9665_s22, %s9659_s28 }
  0x71   : > { %378 = vst [vmem:[#allocation3 + $0x30] sm:$0x1] %v9734_v0  ;;  %379 = vst [vmem:[#allocation3 + $0x48] sm:$0x1] %v9734_v0  ;;  %8156 = vmatprep.subr.mxu1 %v791_v41  ;;  %8077 = vmatpush3.msra.mxu0 %v517_v40  ;;  %v788_v50 = vld [vmem:[#allocation8 + $0x188] sm:$0xff]  ;;  %v10095_v51 = vld [vmem:[%s9920_s10 + $0xa0] sm:$0xff] }
  0x72   : > { %380 = vst [vmem:[#allocation3 + $0x60] sm:$0x1] %v9734_v0  ;;  %381 = vst [vmem:[#allocation3 + $0x78] sm:$0x1] %v9734_v0  ;;  %8157 = vmatpush3.msra.mxu1 %v791_v41  ;;  %8078 = vmatprep.subr.mxu0 %v516_v43  ;;  %v513_v52 = vld [vmem:[#allocation8] sm:$0xff]  ;;  %v10099_v54 = vld [vmem:[%s9920_s10 + $0xa8] sm:$0xff]  ;;  %p9668_p10 = por %p9667_p0, %p9666_p13 }
  0x73   : > { %382 = vst [vmem:[#allocation3 + $0x90] sm:$0x1] %v9734_v0  ;;  %383 = vst [vmem:[#allocation3 + $0xa8] sm:$0x1] %v9734_v0  ;;  %8158 = vmatprep.subr.mxu1 %v790_v44  ;;  %8079 = vmatpush3.msra.mxu0 %v516_v43  ;;  %v787_v53 = vld [vmem:[#allocation8 + $0x180] sm:$0xff]  ;;  %v10103_v56 = vld [vmem:[%s9920_s10 + $0xb0] sm:$0xff] }
  0x74   : > { %384 = vst [vmem:[#allocation3 + $0xc0] sm:$0x1] %v9734_v0  ;;  %385 = vst [vmem:[#allocation3 + $0xd8] sm:$0x1] %v9734_v0  ;;  %8159 = vmatpush3.msra.mxu1 %v790_v44  ;;  %8080 = vmatprep.subr.mxu0 %v515_v46  ;;  %v10107_v58 = vld [vmem:[%s9920_s10 + $0xb8] sm:$0xff]  ;;  %v10111_v60 = vld [vmem:[%s9920_s10 + $0xc0] sm:$0xff]  ;;  %p9669_p3 = pnand %p9668_p10, %p9662_p12 }
  0x75   : > { %386 = vst [vmem:[#allocation3 + $0xf0] sm:$0x1] %v9734_v0  ;;  %387 = vst [vmem:[#allocation3 + $0x108] sm:$0x1] %v9734_v0  ;;  %8160 = vmatprep.subr.mxu1 %v789_v47  ;;  %8081 = vmatpush3.msra.mxu0 %v515_v46  ;;  %v1140_v61 = vld [vmem:[#allocation8 + $0x378] sm:$0xff]  ;;  %v10115_v62 = vld [vmem:[%s9920_s10 + $0xc8] sm:$0xff] }
  0x76   : > { %388 = vst [vmem:[#allocation3 + $0x120] sm:$0x1] %v9734_v0  ;;  %389 = vst [vmem:[#allocation3 + $0x138] sm:$0x1] %v9734_v0  ;;  %8161 = vmatpush3.msra.mxu1 %v789_v47  ;;  %8082 = vmatprep.subr.mxu0 %v514_v49  ;;  %v10121_v1 = vld [vmem:[%s9920_s10 + $0xd0] sm:$0xff]  ;;  %v1514_v3 = vld [vmem:[#allocation8 + $0xf8] sm:$0xff] }
  0x77   : > { %390 = vst [vmem:[#allocation3 + $0x150] sm:$0x1] %v9734_v0  ;;  %391 = vst [vmem:[#allocation3 + $0x168] sm:$0x1] %v9734_v0  ;;  %8162 = vmatprep.subr.mxu1 %v788_v50  ;;  %8083 = vmatpush3.msra.mxu0 %v514_v49  ;;  %v1139_v2 = vld [vmem:[#allocation8 + $0x370] sm:$0xff]  ;;  %v10126_v4 = vld [vmem:[%s9920_s10 + $0xd8] sm:$0xff] }
  0x78   : > { %392 = vst [vmem:[#allocation3 + $0x180] sm:$0x1] %v9734_v0  ;;  %395 = vst [vmem:[#allocation3 + $0x29] sm:$0x1] %v9734_v0  ;;  %8163 = vmatpush3.msra.mxu1 %v788_v50  ;;  %8084 = vmatprep.subr.mxu0 %v513_v52  ;;  %v10132_v6 = vld [vmem:[%s9920_s10 + $0xe0] sm:$0xff]  ;;  %v1138_v8 = vld [vmem:[#allocation8 + $0x368] sm:$0xff] }
  0x79   : > { %396 = vst [vmem:[#allocation3 + $0x41] sm:$0x1] %v9734_v0  ;;  %397 = vst [vmem:[#allocation3 + $0x59] sm:$0x1] %v9734_v0  ;;  %8164 = vmatprep.subr.mxu1 %v787_v53  ;;  %8085 = vmatpush3.msra.mxu0 %v513_v52  ;;  %v10144_v9 = vld [vmem:[%s9920_s10 + $0xf0] sm:$0xff]  ;;  %v10147_v10 = vld [vmem:[%s9920_s10 + $0xf8] sm:$0xff] }
  0x7a   : > { %398 = vst [vmem:[#allocation3 + $0x71] sm:$0x1] %v9734_v0  ;;  %399 = vst [vmem:[#allocation3 + $0x89] sm:$0x1] %v9734_v0  ;;  %8165 = vmatpush3.msra.mxu1 %v787_v53  ;;  %8214 = vmatprep.subr.mxu0 %v1140_v61  ;;  %v1137_v13 = vld [vmem:[#allocation8 + $0x360] sm:$0xff]  ;;  %v1513_v14 = vld [vmem:[#allocation8 + $0xf0] sm:$0xff] }
  0x7b   : > { %400 = vst [vmem:[#allocation3 + $0xa1] sm:$0x1] %v9734_v0  ;;  %401 = vst [vmem:[#allocation3 + $0xb9] sm:$0x1] %v9734_v0  ;;  %8294 = vmatprep.subr.mxu1 %v1514_v3  ;;  %v1136_v21 = vld [vmem:[#allocation8 + $0x358] sm:$0xff]  ;;  %v1512_v24 = vld [vmem:[#allocation8 + $0xe8] sm:$0xff] }
  0x7c   : > { %402 = vst [vmem:[#allocation3 + $0xd1] sm:$0x1] %v9734_v0  ;;  %403 = vst [vmem:[#allocation3 + $0xe9] sm:$0x1] %v9734_v0  ;;  %v1135_v33 = vld [vmem:[#allocation8 + $0x350] sm:$0xff]  ;;  %v1511_v36 = vld [vmem:[#allocation8 + $0xe0] sm:$0xff] }
  0x7d   : > { %404 = vst [vmem:[#allocation3 + $0x101] sm:$0x1] %v9734_v0  ;;  %405 = vst [vmem:[#allocation3 + $0x119] sm:$0x1] %v9734_v0  ;;  %v1134_v43 = vld [vmem:[#allocation8 + $0x348] sm:$0xff]  ;;  %v1510_v44 = vld [vmem:[#allocation8 + $0xd8] sm:$0xff] }
  0x7e   : > { %406 = vst [vmem:[#allocation3 + $0x131] sm:$0x1] %v9734_v0  ;;  %407 = vst [vmem:[#allocation3 + $0x149] sm:$0x1] %v9734_v0  ;;  %v1133_v49 = vld [vmem:[#allocation8 + $0x340] sm:$0xff]  ;;  %v1509_v50 = vld [vmem:[#allocation8 + $0xd0] sm:$0xff] }
  0x7f   : > { %408 = vst [vmem:[#allocation3 + $0x161] sm:$0x1] %v9734_v0  ;;  %409 = vst [vmem:[#allocation3 + $0x179] sm:$0x1] %v9734_v0 }
  0x80   : > { %410 = vst [vmem:[#allocation3 + $0x191] sm:$0x1] %v9734_v0  ;;  %333 = vst [vmem:[#allocation2] sm:$0x1] %v9734_v0 }
  0x81   : > { %350 = vst [vmem:[#allocation2 + $0x198] sm:$0x1] %v9734_v0  ;;  %351 = vst [vmem:[#allocation2 + $0x11] sm:$0x1] %v9734_v0 }
  0x82   : > { %368 = vst [vmem:[#allocation2 + $0x1a9] sm:$0x1] %v9734_v0  ;;  %376 = vst [vmem:[#allocation3] sm:$0x1] %v9734_v0 }
  0x83   : > { %393 = vst [vmem:[#allocation3 + $0x198] sm:$0x1] %v9734_v0  ;;  %394 = vst [vmem:[#allocation3 + $0x11] sm:$0x1] %v9734_v0 }
  0x84   : > { %411 = vst [vmem:[#allocation3 + $0x1a9] sm:$0x1] %v9734_v0  ;;  %445 = vst [vmem:[#allocation2 + $0x19] sm:$0xff] %v10015_v16 }
  0x85   : > { %446 = vst [vmem:[#allocation2 + $0x21] sm:$0xff] %v10018_v17  ;;  %447 = vst [vmem:[#allocation2 + $0x31] sm:$0xff] %v10023_v19 }
  0x86   : > { %448 = vst [vmem:[#allocation2 + $0x39] sm:$0xff] %v10026_v20  ;;  %449 = vst [vmem:[#allocation2 + $0x49] sm:$0xff] %v10031_v22 }
  0x87   : > { %450 = vst [vmem:[#allocation2 + $0x51] sm:$0xff] %v10034_v23  ;;  %451 = vst [vmem:[#allocation2 + $0x61] sm:$0xff] %v10039_v25  ;;  %v477_v55 = vld [vmem:[#allocation2] sm:$0xff] }
  0x88   : > { %452 = vst [vmem:[#allocation2 + $0x69] sm:$0xff] %v10042_v26  ;;  %453 = vst [vmem:[#allocation2 + $0x79] sm:$0xff] %v10047_v28  ;;  %8086 = vmatprep.mubr.f32.mxu0 %v477_v55  ;;  %v1132_v55 = vld [vmem:[#allocation8 + $0x338] sm:$0xff] }
  0x89   : > { %454 = vst [vmem:[#allocation2 + $0x81] sm:$0xff] %v10050_v29  ;;  %455 = vst [vmem:[#allocation2 + $0x91] sm:$0xff] %v10055_v31  ;;  %8087 = vmatmul.mubr.f32.vlgmr.msra.gmra.mxu0 %v9734_v0  ;;  %v10137_v0 = vld [vmem:[%s9920_s10 + $0xe8] sm:$0xff] }
  0x8a   : > { %456 = vst [vmem:[#allocation2 + $0x99] sm:$0xff] %v10058_v32  ;;  %457 = vst [vmem:[#allocation2 + $0xa9] sm:$0xff] %v10063_v34  ;;  %8215 = vmatpush3.msra.mxu0 %v1140_v61 }
  0x8b   : > { %458 = vst [vmem:[#allocation2 + $0xb1] sm:$0xff] %v10066_v35  ;;  %459 = vst [vmem:[#allocation2 + $0xc1] sm:$0xff] %v10071_v37  ;;  %v479_v57 = vld [vmem:[#allocation2 + $0x18] sm:$0xff]  ;;  %8216 = vmatprep.subr.mxu0 %v1139_v2 }
  0x8c   : > { %460 = vst [vmem:[#allocation2 + $0xc9] sm:$0xff] %v10074_v38  ;;  %461 = vst [vmem:[#allocation2 + $0xd9] sm:$0xff] %v10079_v39  ;;  %v480_v59 = vld [vmem:[#allocation2 + $0x20] sm:$0xff]  ;;  %8166 = vmatprep.mubr.f32.mxu1 %v479_v57  ;;  %v10117_v63 = vld [vmem:[#allocation2 + $0x30] sm:$0xff]  ;;  %8089 = vmatprep.mubr.f32.mxu0 %v479_v57 }
  0x8d   : > { %462 = vst [vmem:[#allocation2 + $0xe1] sm:$0xff] %v10083_v42  ;;  %463 = vst [vmem:[#allocation2 + $0xf1] sm:$0xff] %v10087_v45  ;;  %8167 = vmatmul.mubr.f32.vlgmr.msra.gmra.mxu1 %v480_v59  ;;  %v10128_v5 = vld [vmem:[#allocation2 + $0x38] sm:$0xff]  ;;  %v10139_v7 = vld [vmem:[#allocation2 + $0x48] sm:$0xff]  ;;  %8090 = vmatmul.mubr.f32.gmra.mxu0 %v480_v59 }
  0x8e   : > { %464 = vst [vmem:[#allocation2 + $0xf9] sm:$0xff] %v10091_v48  ;;  %465 = vst [vmem:[#allocation2 + $0x109] sm:$0xff] %v10095_v51  ;;  %8169 = vmatprep.mubr.f32.mxu1 %v10117_v63  ;;  %8217 = vmatpush3.msra.mxu0 %v1139_v2  ;;  %v10150_v11 = vld [vmem:[#allocation2 + $0x50] sm:$0xff]  ;;  %v10155_v12 = vld [vmem:[#allocation2 + $0x60] sm:$0xff] }
  0x8f   : > { %466 = vst [vmem:[#allocation2 + $0x111] sm:$0xff] %v10099_v54  ;;  %467 = vst [vmem:[#allocation2 + $0x121] sm:$0xff] %v10103_v56  ;;  %8092 = vmatprep.mubr.f32.mxu0 %v10117_v63  ;;  %8218 = vmatprep.subr.mxu0 %v1138_v8  ;;  %v10161_v15 = vld [vmem:[#allocation2 + $0x68] sm:$0xff]  ;;  %v10163_v18 = vld [vmem:[#allocation2 + $0x78] sm:$0xff] }
  0x90   : > { %468 = vst [vmem:[#allocation2 + $0x129] sm:$0xff] %v10107_v58  ;;  %469 = vst [vmem:[#allocation2 + $0x139] sm:$0xff] %v10111_v60  ;;  %8219 = vmatpush3.msra.mxu0 %v1138_v8  ;;  %8295 = vmatpush3.msra.mxu1 %v1514_v3  ;;  %v10169_v27 = vld [vmem:[#allocation2 + $0x80] sm:$0xff]  ;;  %v10171_v30 = vld [vmem:[#allocation2 + $0x90] sm:$0xff] }
  0x91   : > { %470 = vst [vmem:[#allocation2 + $0x141] sm:$0xff] %v10115_v62  ;;  %12581 = vst [vmem:[#allocation15_spill] sm:$0xff] %v10121_v1  ;;  %8170 = vmatmul.mubr.f32.gmra.mxu1 %v10128_v5  ;;  %8093 = vmatmul.mubr.f32.gmra.mxu0 %v10128_v5  ;;  %v10177_v40 = vld [vmem:[#allocation2 + $0x98] sm:$0xff]  ;;  %v10179_v41 = vld [vmem:[#allocation2 + $0xa8] sm:$0xff] }
  0x92   : > { %471 = vst [vmem:[#allocation2 + $0x151] sm:$0xff] %v10121_v1  ;;  %12582 = vst [vmem:[#allocation16_spill] sm:$0xff] %v10126_v4  ;;  %8172 = vmatprep.mubr.f32.mxu1 %v10139_v7  ;;  %8095 = vmatprep.mubr.f32.mxu0 %v10139_v7  ;;  %v10185_v46 = vld [vmem:[#allocation2 + $0xb0] sm:$0xff]  ;;  %v10187_v47 = vld [vmem:[#allocation2 + $0xc0] sm:$0xff] }
  0x93   : > { %472 = vst [vmem:[#allocation2 + $0x159] sm:$0xff] %v10126_v4  ;;  %12583 = vst [vmem:[#allocation17_spill] sm:$0xff] %v10132_v6  ;;  %8220 = vmatprep.subr.mxu0 %v1137_v13  ;;  %8296 = vmatprep.subr.mxu1 %v1513_v14  ;;  %v10193_v52 = vld [vmem:[#allocation2 + $0xc8] sm:$0xff]  ;;  %v10195_v53 = vld [vmem:[#allocation2 + $0xd8] sm:$0xff] }
  0x94   : > { %473 = vst [vmem:[#allocation2 + $0x169] sm:$0xff] %v10132_v6  ;;  %12584 = vst [vmem:[#allocation18_spill] sm:$0xff] %v10137_v0  ;;  %8221 = vmatpush3.msra.mxu0 %v1137_v13  ;;  %8297 = vmatpush3.msra.mxu1 %v1513_v14  ;;  %v1508_v57 = vld [vmem:[#allocation8 + $0xc8] sm:$0xff]  ;;  %v10201_v59 = vld [vmem:[#allocation2 + $0xe0] sm:$0xff] }
  0x95   : > { %474 = vst [vmem:[#allocation2 + $0x171] sm:$0xff] %v10137_v0  ;;  %12585 = vst [vmem:[#allocation19_spill] sm:$0xff] %v10144_v9  ;;  %8173 = vmatmul.mubr.f32.gmra.mxu1 %v10150_v11  ;;  %8096 = vmatmul.mubr.f32.gmra.mxu0 %v10150_v11  ;;  %v10203_v61 = vld [vmem:[#allocation2 + $0xf0] sm:$0xff]  ;;  %v1507_v3 = vld [vmem:[#allocation8 + $0xc0] sm:$0xff] }
  0x96   : > { %12586 = vst [vmem:[#allocation20_spill] sm:$0xff] %v10147_v10  ;;  %475 = vst [vmem:[#allocation2 + $0x181] sm:$0xff] %v10144_v9  ;;  %8175 = vmatprep.mubr.f32.mxu1 %v10155_v12  ;;  %8098 = vmatprep.mubr.f32.mxu0 %v10155_v12  ;;  %v1131_v2 = vld [vmem:[#allocation8 + $0x330] sm:$0xff]  ;;  %v10209_v8 = vld [vmem:[#allocation2 + $0xf8] sm:$0xff] }
  0x97   : > { %476 = vst [vmem:[#allocation2 + $0x189] sm:$0xff] %v10147_v10  ;;  %8222 = vmatprep.subr.mxu0 %v1136_v21  ;;  %8298 = vmatprep.subr.mxu1 %v1512_v24  ;;  %v10211_v13 = vld [vmem:[#allocation2 + $0x108] sm:$0xff]  ;;  %v1501_v9 = vld [vmem:[#allocation8 + $0x90] sm:$0xff]  ;;  %v1852_v6 = vld [vmem:[#allocation8 + $0x278] sm:$0xff] }
  0x98   : > { %8223 = vmatpush3.msra.mxu0 %v1136_v21  ;;  %8299 = vmatpush3.msra.mxu1 %v1512_v24  ;;  %v1130_v14 = vld [vmem:[#allocation8 + $0x328] sm:$0xff]  ;;  %v1506_v21 = vld [vmem:[#allocation8 + $0xb8] sm:$0xff]  ;;  %v10217_v24 = vld [vmem:[#allocation2 + $0x110] sm:$0xff] }
  0x99   : > { %8176 = vmatmul.mubr.f32.gmra.mxu1 %v10161_v15  ;;  %8099 = vmatmul.mubr.f32.gmra.mxu0 %v10161_v15  ;;  %v1500_v0 = vld [vmem:[#allocation8 + $0x88] sm:$0xff]  ;;  %v1851_v1 = vld [vmem:[#allocation8 + $0x270] sm:$0xff] }
  0x9a   : > { %8178 = vmatprep.mubr.f32.mxu1 %v10163_v18  ;;  %8101 = vmatprep.mubr.f32.mxu0 %v10163_v18  ;;  %v1463_v4 = vld [vmem:[#allocation2 + $0x9] sm:$0xff] }
  0x9b   : > { %8224 = vmatprep.subr.mxu0 %v1135_v33  ;;  %8300 = vmatprep.subr.mxu1 %v1511_v36 }
  0x9c   : > { %8225 = vmatpush3.msra.mxu0 %v1135_v33  ;;  %8301 = vmatpush3.msra.mxu1 %v1511_v36  ;;  %v10219_v33 = vld [vmem:[#allocation2 + $0x120] sm:$0xff] }
  0x9d   : > { %8179 = vmatmul.mubr.f32.gmra.mxu1 %v10169_v27  ;;  %8102 = vmatmul.mubr.f32.gmra.mxu0 %v10169_v27  ;;  %v1129_v36 = vld [vmem:[#allocation8 + $0x320] sm:$0xff] }
  0x9e   : > { %8181 = vmatprep.mubr.f32.mxu1 %v10171_v30  ;;  %8104 = vmatprep.mubr.f32.mxu0 %v10171_v30  ;;  %v10251_v10 = vld [vmem:[#allocation2 + $0x180] sm:$0xff] }
  0x9f   : > { %8226 = vmatprep.subr.mxu0 %v1134_v43  ;;  %8302 = vmatprep.subr.mxu1 %v1510_v44 }
  0xa0   : > { %8227 = vmatpush3.msra.mxu0 %v1134_v43  ;;  %8303 = vmatpush3.msra.mxu1 %v1510_v44  ;;  %v1505_v43 = vld [vmem:[#allocation8 + $0xb0] sm:$0xff]  ;;  %v10225_v44 = vld [vmem:[#allocation2 + $0x128] sm:$0xff] }
  0xa1   : > { %8182 = vmatmul.mubr.f32.gmra.mxu1 %v10177_v40  ;;  %8105 = vmatmul.mubr.f32.gmra.mxu0 %v10177_v40 }
  0xa2   : > { %8184 = vmatprep.mubr.f32.mxu1 %v10179_v41  ;;  %8107 = vmatprep.mubr.f32.mxu0 %v10179_v41 }
  0xa3   : > { %8228 = vmatprep.subr.mxu0 %v1133_v49  ;;  %8304 = vmatprep.subr.mxu1 %v1509_v50 }
  0xa4   : > { %8229 = vmatpush3.msra.mxu0 %v1133_v49  ;;  %8305 = vmatpush3.msra.mxu1 %v1509_v50  ;;  %v10227_v49 = vld [vmem:[#allocation2 + $0x138] sm:$0xff] }
  0xa5   : > { %8185 = vmatmul.mubr.f32.gmra.mxu1 %v10185_v46  ;;  %8108 = vmatmul.mubr.f32.gmra.mxu0 %v10185_v46  ;;  %v1128_v50 = vld [vmem:[#allocation8 + $0x318] sm:$0xff] }
  0xa6   : > { %8187 = vmatprep.mubr.f32.mxu1 %v10187_v47  ;;  %8110 = vmatprep.mubr.f32.mxu0 %v10187_v47 }
  0xa7   : > { %8230 = vmatprep.subr.mxu0 %v1132_v55  ;;  %8306 = vmatprep.subr.mxu1 %v1508_v57 }
  0xa8   : > { %8231 = vmatpush3.msra.mxu0 %v1132_v55  ;;  %8307 = vmatpush3.msra.mxu1 %v1508_v57  ;;  %v1504_v55 = vld [vmem:[#allocation8 + $0xa8] sm:$0xff]  ;;  %v10233_v57 = vld [vmem:[#allocation2 + $0x140] sm:$0xff] }
  0xa9   : > { %8188 = vmatmul.mubr.f32.gmra.mxu1 %v10193_v52  ;;  %8111 = vmatmul.mubr.f32.gmra.mxu0 %v10193_v52 }
  0xaa   : > { %8190 = vmatprep.mubr.f32.mxu1 %v10195_v53  ;;  %8113 = vmatprep.mubr.f32.mxu0 %v10195_v53 }
  0xab   : > { %8232 = vmatprep.subr.mxu0 %v1131_v2  ;;  %8308 = vmatprep.subr.mxu1 %v1507_v3 }
  0xac   : > { %8233 = vmatpush3.msra.mxu0 %v1131_v2  ;;  %8309 = vmatpush3.msra.mxu1 %v1507_v3  ;;  %v10235_v2 = vld [vmem:[#allocation2 + $0x150] sm:$0xff] }
  0xad   : > { %8191 = vmatmul.mubr.f32.gmra.mxu1 %v10201_v59  ;;  %8114 = vmatmul.mubr.f32.gmra.mxu0 %v10201_v59  ;;  %v1127_v3 = vld [vmem:[#allocation8 + $0x310] sm:$0xff] }
  0xae   : > { %8193 = vmatprep.mubr.f32.mxu1 %v10203_v61  ;;  %8116 = vmatprep.mubr.f32.mxu0 %v10203_v61 }
  0xaf   : > { %8234 = vmatprep.subr.mxu0 %v1130_v14  ;;  %8310 = vmatprep.subr.mxu1 %v1506_v21 }
  0xb0   : > { %8235 = vmatpush3.msra.mxu0 %v1130_v14  ;;  %8311 = vmatpush3.msra.mxu1 %v1506_v21  ;;  %v1503_v14 = vld [vmem:[#allocation8 + $0xa0] sm:$0xff]  ;;  %v10241_v21 = vld [vmem:[#allocation2 + $0x158] sm:$0xff] }
  0xb1   : > { %8194 = vmatmul.mubr.f32.gmra.mxu1 %v10209_v8  ;;  %8117 = vmatmul.mubr.f32.gmra.mxu0 %v10209_v8 }
  0xb2   : > { %8196 = vmatprep.mubr.f32.mxu1 %v10211_v13  ;;  %8119 = vmatprep.mubr.f32.mxu0 %v10211_v13 }
  0xb3   : > { %8236 = vmatprep.subr.mxu0 %v1129_v36  ;;  %8312 = vmatprep.subr.mxu1 %v1505_v43 }
  0xb4   : > { %8237 = vmatpush3.msra.mxu0 %v1129_v36  ;;  %8313 = vmatpush3.msra.mxu1 %v1505_v43  ;;  %v10243_v36 = vld [vmem:[#allocation2 + $0x168] sm:$0xff] }
  0xb5   : > { %8197 = vmatmul.mubr.f32.gmra.mxu1 %v10217_v24  ;;  %8120 = vmatmul.mubr.f32.gmra.mxu0 %v10217_v24  ;;  %v1126_v43 = vld [vmem:[#allocation8 + $0x308] sm:$0xff] }
  0xb6   : > { %8199 = vmatprep.mubr.f32.mxu1 %v10219_v33  ;;  %8122 = vmatprep.mubr.f32.mxu0 %v10219_v33 }
  0xb7   : > { %8238 = vmatprep.subr.mxu0 %v1128_v50  ;;  %8314 = vmatprep.subr.mxu1 %v1504_v55 }
  0xb8   : > { %8239 = vmatpush3.msra.mxu0 %v1128_v50  ;;  %8315 = vmatpush3.msra.mxu1 %v1504_v55  ;;  %v1502_v50 = vld [vmem:[#allocation8 + $0x98] sm:$0xff]  ;;  %v10249_v55 = vld [vmem:[#allocation2 + $0x170] sm:$0xff] }
  0xb9   : > { %8200 = vmatmul.mubr.f32.gmra.mxu1 %v10225_v44  ;;  %8123 = vmatmul.mubr.f32.gmra.mxu0 %v10225_v44 }
  0xba   : > { %8202 = vmatprep.mubr.f32.mxu1 %v10227_v49  ;;  %8125 = vmatprep.mubr.f32.mxu0 %v10227_v49 }
  0xbb   : > { %8240 = vmatprep.subr.mxu0 %v1127_v3  ;;  %8316 = vmatprep.subr.mxu1 %v1503_v14 }
  0xbc   : > { %8241 = vmatpush3.msra.mxu0 %v1127_v3  ;;  %8317 = vmatpush3.msra.mxu1 %v1503_v14  ;;  %v1125_v3 = vld [vmem:[#allocation8 + $0x300] sm:$0xff]  ;;  %v10257_v14 = vld [vmem:[#allocation2 + $0x188] sm:$0xff] }
  0xbd   : > { %8203 = vmatmul.mubr.f32.gmra.mxu1 %v10233_v57  ;;  %8126 = vmatmul.mubr.f32.gmra.mxu0 %v10233_v57 }
  0xbe   : > { %8205 = vmatprep.mubr.f32.mxu1 %v10235_v2  ;;  %8128 = vmatprep.mubr.f32.mxu0 %v10235_v2 }
  0xbf   : > { %8242 = vmatprep.subr.mxu0 %v1126_v43  ;;  %8318 = vmatprep.subr.mxu1 %v1502_v50 }
  0xc0   : > { %8243 = vmatpush3.msra.mxu0 %v1126_v43  ;;  %8319 = vmatpush3.msra.mxu1 %v1502_v50  ;;  %v1499_v43 = vld [vmem:[#allocation8 + $0x80] sm:$0xff] }
  0xc1   : > { %8206 = vmatmul.mubr.f32.gmra.mxu1 %v10241_v21  ;;  %8129 = vmatmul.mubr.f32.gmra.mxu0 %v10241_v21  ;;  %v1462_v50 = vld [vmem:[#allocation2 + $0x1] sm:$0xff] }
  0xc2   : > { %8208 = vmatprep.mubr.f32.mxu1 %v10243_v36  ;;  %8131 = vmatprep.mubr.f32.mxu0 %v10243_v36 }
  0xc3   : > { %8244 = vmatprep.subr.mxu0 %v1125_v3  ;;  %8320 = vmatprep.subr.mxu1 %v1501_v9 }
  0xc4   : > { %8245 = vmatpush3.msra.mxu0 %v1125_v3  ;;  %8321 = vmatpush3.msra.mxu1 %v1501_v9  ;;  %v1850_v9 = vld [vmem:[#allocation8 + $0x268] sm:$0xff] }
  0xc5   : > { %8209 = vmatmul.mubr.f32.gmra.mxu1 %v10249_v55  ;;  %8132 = vmatmul.mubr.f32.gmra.mxu0 %v10249_v55  ;;  %v9566_v3 = vld [vmem:[#allocation2 + $0x8] sm:$0xff] }
  0xc6   : > { %8211 = vmatprep.mubr.f32.mxu1 %v10251_v10  ;;  %8322 = vmatprep.subr.mxu1 %v1500_v0 }
  0xc7   : > { %8246 = vmatprep.mubr.f32.mxu0 %v10117_v63  ;;  %8323 = vmatpush3.msra.mxu1 %v1500_v0  ;;  %v1849_v63 = vld [vmem:[#allocation8 + $0x260] sm:$0xff]  ;;  %v2190_v0 = vld [vmem:[#allocation8 + $0x3f8] sm:$0xff] }
  0xc8   : > { %8374 = vmatprep.subr.mxu0 %v1852_v6  ;;  %8324 = vmatprep.subr.mxu1 %v1499_v43 }
  0xc9   : > { %8212 = vmatmul.mubr.f32.gmra.mxu1 %v10257_v14  ;;  %8247 = vmatmul.mubr.f32.vlgmr.msra.gmra.mxu0 %v10128_v5  ;;  %v2189_v5 = vld [vmem:[#allocation8 + $0x3f0] sm:$0xff] }
  0xca   : > { %8326 = vmatprep.mubr.f32.mxu1 %v1462_v50  ;;  %8325 = vmatpush3.msra.mxu1 %v1499_v43  ;;  %v2175_v43 = vld [vmem:[#allocation8 + $0x380] sm:$0xff]  ;;  %v12590_v50 = vld [vmem:[#allocation18_spill] sm:$0xff] }
  0xcb   : > { %8375 = vmatpush3.msra.mxu0 %v1852_v6  ;;  %8249 = vmatprep.mubr.f32.mxu0 %v10139_v7  ;;  %v2188_v6 = vld [vmem:[#allocation8 + $0x3e8] sm:$0xff] }
  0xcc   : > { %8376 = vmatprep.subr.mxu0 %v1851_v1  ;;  %8454 = vmatprep.subr.mxu1 %v2190_v0  ;;  %v1846_v7 = vld [vmem:[#allocation8 + $0x248] sm:$0xff] }
  0xcd   : > { %8327 = vmatmul.mubr.f32.vlgmr.msra.gmra.mxu1 %v1463_v4  ;;  %8377 = vmatpush3.msra.mxu0 %v1851_v1  ;;  %v1848_v4 = vld [vmem:[#allocation8 + $0x258] sm:$0xff]  ;;  %v1847_v1 = vld [vmem:[#allocation8 + $0x250] sm:$0xff] }
  0xce   : > { %8329 = vmatprep.mubr.f32.mxu1 %v10015_v16  ;;  %8250 = vmatmul.mubr.f32.gmra.mxu0 %v10150_v11  ;;  %v2187_v11 = vld [vmem:[#allocation8 + $0x3e0] sm:$0xff] }
  0xcf   : > { %8378 = vmatprep.subr.mxu0 %v1850_v9  ;;  %8252 = vmatprep.mubr.f32.mxu0 %v10155_v12  ;;  %v1845_v12 = vld [vmem:[#allocation8 + $0x240] sm:$0xff] }
  0xd0   : > { %8379 = vmatpush3.msra.mxu0 %v1850_v9  ;;  %8455 = vmatpush3.msra.mxu1 %v2190_v0  ;;  %v2562_v9 = vld [vmem:[#allocation8 + $0x168] sm:$0xff]  ;;  %v2889_v0 = vld [vmem:[#allocation8 + $0x290] sm:$0xff] }
  0xd1   : > { %8330 = vmatmul.mubr.f32.gmra.mxu1 %v10018_v17  ;;  %8380 = vmatprep.subr.mxu0 %v1849_v63 }
  0xd2   : > { %8332 = vmatprep.mubr.f32.mxu1 %v10023_v19  ;;  %8253 = vmatmul.mubr.f32.gmra.mxu0 %v10161_v15  ;;  %v2186_v15 = vld [vmem:[#allocation8 + $0x3d8] sm:$0xff] }
  0xd3   : > { %8255 = vmatprep.mubr.f32.mxu0 %v10163_v18  ;;  %8381 = vmatpush3.msra.mxu0 %v1849_v63  ;;  %v1844_v18 = vld [vmem:[#allocation8 + $0x238] sm:$0xff] }
  0xd4   : > { %8382 = vmatprep.subr.mxu0 %v1848_v4  ;;  %8456 = vmatprep.subr.mxu1 %v2189_v5  ;;  %v2902_v63 = vld [vmem:[#allocation8 + $0x2f8] sm:$0xff] }
  0xd5   : > { %8333 = vmatmul.mubr.f32.gmra.mxu1 %v10026_v20  ;;  %8383 = vmatpush3.msra.mxu0 %v1848_v4  ;;  %v1496_v4 = vld [vmem:[#allocation2 + $0x199] sm:$0xff] }
  0xd6   : > { %8335 = vmatprep.mubr.f32.mxu1 %v10031_v22  ;;  %8256 = vmatmul.mubr.f32.gmra.mxu0 %v10169_v27  ;;  %v2185_v27 = vld [vmem:[#allocation8 + $0x3d0] sm:$0xff] }
  0xd7   : > { %8457 = vmatpush3.msra.mxu1 %v2189_v5  ;;  %8258 = vmatprep.mubr.f32.mxu0 %v10171_v30  ;;  %v1843_v30 = vld [vmem:[#allocation8 + $0x230] sm:$0xff]  ;;  %v12592_v5 = vld [vmem:[#allocation20_spill] sm:$0xff] }
  0xd8   : > { %8384 = vmatprep.subr.mxu0 %v1847_v1  ;;  %8458 = vmatprep.subr.mxu1 %v2188_v6 }
  0xd9   : > { %8336 = vmatmul.mubr.f32.gmra.mxu1 %v10034_v23  ;;  %8385 = vmatpush3.msra.mxu0 %v1847_v1  ;;  %v2888_v1 = vld [vmem:[#allocation8 + $0x288] sm:$0xff] }
  0xda   : > { %8338 = vmatprep.mubr.f32.mxu1 %v10039_v25  ;;  %8259 = vmatmul.mubr.f32.gmra.mxu0 %v10177_v40  ;;  %v2184_v40 = vld [vmem:[#allocation8 + $0x3c8] sm:$0xff] }
  0xdb   : > { %8459 = vmatpush3.msra.mxu1 %v2188_v6  ;;  %8261 = vmatprep.mubr.f32.mxu0 %v10179_v41  ;;  %v1842_v41 = vld [vmem:[#allocation8 + $0x228] sm:$0xff] }
  0xdc   : > { %8386 = vmatprep.subr.mxu0 %v1846_v7  ;;  %8460 = vmatprep.subr.mxu1 %v2187_v11  ;;  %v1497_v6 = vld [vmem:[#allocation2 + $0x1a1] sm:$0xff] }
  0xdd   : > { %8339 = vmatmul.mubr.f32.gmra.mxu1 %v10042_v26  ;;  %8387 = vmatpush3.msra.mxu0 %v1846_v7  ;;  %v2512_v7 = vld [vmem:[#allocation2 + $0x2] sm:$0xff] }
  0xde   : > { %8341 = vmatprep.mubr.f32.mxu1 %v10047_v28  ;;  %8262 = vmatmul.mubr.f32.gmra.mxu0 %v10185_v46  ;;  %v2183_v46 = vld [vmem:[#allocation8 + $0x3c0] sm:$0xff] }
  0xdf   : > { %8461 = vmatpush3.msra.mxu1 %v2187_v11  ;;  %8264 = vmatprep.mubr.f32.mxu0 %v10187_v47  ;;  %v1841_v47 = vld [vmem:[#allocation8 + $0x220] sm:$0xff]  ;;  %v3240_v11 = vld [vmem:[#allocation8 + $0x478] sm:$0xff] }
  0xe0   : > { %8388 = vmatprep.subr.mxu0 %v1845_v12  ;;  %8462 = vmatprep.subr.mxu1 %v2186_v15 }
  0xe1   : > { %8342 = vmatmul.mubr.f32.gmra.mxu1 %v10050_v29  ;;  %8389 = vmatpush3.msra.mxu0 %v1845_v12  ;;  %v2887_v12 = vld [vmem:[#allocation8 + $0x280] sm:$0xff] }
  0xe2   : > { %8344 = vmatprep.mubr.f32.mxu1 %v10055_v31  ;;  %8265 = vmatmul.mubr.f32.gmra.mxu0 %v10193_v52  ;;  %v2182_v52 = vld [vmem:[#allocation8 + $0x3b8] sm:$0xff] }
  0xe3   : > { %8463 = vmatpush3.msra.mxu1 %v2186_v15  ;;  %8267 = vmatprep.mubr.f32.mxu0 %v10195_v53  ;;  %v1840_v53 = vld [vmem:[#allocation8 + $0x218] sm:$0xff] }
  0xe4   : > { %8390 = vmatprep.subr.mxu0 %v1844_v18  ;;  %8464 = vmatprep.subr.mxu1 %v2185_v27  ;;  %v2514_v15 = vld [vmem:[#allocation2 + $0x1a] sm:$0xff] }
  0xe5   : > { %8345 = vmatmul.mubr.f32.gmra.mxu1 %v10058_v32  ;;  %8391 = vmatpush3.msra.mxu0 %v1844_v18  ;;  %v2513_v18 = vld [vmem:[#allocation2 + $0xa] sm:$0xff] }
  0xe6   : > { %8347 = vmatprep.mubr.f32.mxu1 %v10063_v34  ;;  %8268 = vmatmul.mubr.f32.gmra.mxu0 %v10201_v59  ;;  %v2181_v59 = vld [vmem:[#allocation8 + $0x3b0] sm:$0xff] }
  0xe7   : > { %8465 = vmatpush3.msra.mxu1 %v2185_v27  ;;  %8270 = vmatprep.mubr.f32.mxu0 %v10203_v61  ;;  %v1839_v61 = vld [vmem:[#allocation8 + $0x210] sm:$0xff]  ;;  %v2515_v27 = vld [vmem:[#allocation2 + $0x22] sm:$0xff] }
  0xe8   : > { %8392 = vmatprep.subr.mxu0 %v1843_v30  ;;  %8466 = vmatprep.subr.mxu1 %v2184_v40 }
  0xe9   : > { %8348 = vmatmul.mubr.f32.gmra.mxu1 %v10066_v35  ;;  %8393 = vmatpush3.msra.mxu0 %v1843_v30  ;;  %v3239_v30 = vld [vmem:[#allocation8 + $0x470] sm:$0xff] }
  0xea   : > { %8350 = vmatprep.mubr.f32.mxu1 %v10071_v37  ;;  %8271 = vmatmul.mubr.f32.gmra.mxu0 %v10209_v8  ;;  %v2180_v8 = vld [vmem:[#allocation8 + $0x3a8] sm:$0xff] }
  0xeb   : > { %8467 = vmatpush3.msra.mxu1 %v2184_v40  ;;  %8273 = vmatprep.mubr.f32.mxu0 %v10211_v13  ;;  %v1838_v13 = vld [vmem:[#allocation8 + $0x208] sm:$0xff] }
  0xec   : > { %8394 = vmatprep.subr.mxu0 %v1842_v41  ;;  %8468 = vmatprep.subr.mxu1 %v2183_v46 }
  0xed   : > { %8351 = vmatmul.mubr.f32.gmra.mxu1 %v10074_v38  ;;  %8395 = vmatpush3.msra.mxu0 %v1842_v41 }
  0xee   : > { %8353 = vmatprep.mubr.f32.mxu1 %v10079_v39  ;;  %8274 = vmatmul.mubr.f32.gmra.mxu0 %v10217_v24  ;;  %v2179_v24 = vld [vmem:[#allocation8 + $0x3a0] sm:$0xff] }
  0xef   : > { %8469 = vmatpush3.msra.mxu1 %v2183_v46  ;;  %8276 = vmatprep.mubr.f32.mxu0 %v10219_v33  ;;  %v2178_v33 = vld [vmem:[#allocation8 + $0x398] sm:$0xff] }
  0xf0   : > { %8396 = vmatprep.subr.mxu0 %v1841_v47  ;;  %8470 = vmatprep.subr.mxu1 %v2182_v52  ;;  %v10383_v46 = vld [vmem:[#allocation2 + $0x32] sm:$0xff] }
  0xf1   : > { %8354 = vmatmul.mubr.f32.gmra.mxu1 %v10083_v42  ;;  %8397 = vmatpush3.msra.mxu0 %v1841_v47 }
  0xf2   : > { %8356 = vmatprep.mubr.f32.mxu1 %v10087_v45  ;;  %8277 = vmatmul.mubr.f32.gmra.mxu0 %v10225_v44  ;;  %v1837_v44 = vld [vmem:[#allocation8 + $0x200] sm:$0xff] }
  0xf3   : > { %8471 = vmatpush3.msra.mxu1 %v2182_v52  ;;  %8279 = vmatprep.mubr.f32.mxu0 %v10227_v49  ;;  %v12587_v49 = vld [vmem:[#allocation15_spill] sm:$0xff]  ;;  %v3238_v52 = vld [vmem:[#allocation8 + $0x468] sm:$0xff] }
  0xf4   : > { %8398 = vmatprep.subr.mxu0 %v1840_v53  ;;  %8472 = vmatprep.subr.mxu1 %v2181_v59 }
  0xf5   : > { %8357 = vmatmul.mubr.f32.gmra.mxu1 %v10091_v48  ;;  %8399 = vmatpush3.msra.mxu0 %v1840_v53 }
  0xf6   : > { %8359 = vmatprep.mubr.f32.mxu1 %v10095_v51  ;;  %8280 = vmatmul.mubr.f32.gmra.mxu0 %v10233_v57  ;;  %v511_v57 = vld [vmem:[#allocation2 + $0x198] sm:$0xff] }
  0xf7   : > { %8473 = vmatpush3.msra.mxu1 %v2181_v59  ;;  %8282 = vmatprep.mubr.f32.mxu0 %v10235_v2  ;;  %v2177_v2 = vld [vmem:[#allocation8 + $0x390] sm:$0xff] }
  0xf8   : > { %8400 = vmatprep.subr.mxu0 %v1839_v61  ;;  %8474 = vmatprep.subr.mxu1 %v2180_v8 }
  0xf9   : > { %8360 = vmatmul.mubr.f32.gmra.mxu1 %v10099_v54  ;;  %8401 = vmatpush3.msra.mxu0 %v1839_v61  ;;  %v10387_v61 = vld [vmem:[#allocation2 + $0x3a] sm:$0xff] }
  0xfa   : > { %8362 = vmatprep.mubr.f32.mxu1 %v10103_v56  ;;  %8283 = vmatmul.mubr.f32.gmra.mxu0 %v10241_v21  ;;  %v12588_v21 = vld [vmem:[#allocation16_spill] sm:$0xff] }
  0xfb   : > { %8475 = vmatpush3.msra.mxu1 %v2180_v8  ;;  %8285 = vmatprep.mubr.f32.mxu0 %v10243_v36  ;;  %v2176_v36 = vld [vmem:[#allocation8 + $0x388] sm:$0xff] }
  0xfc   : > { %8402 = vmatprep.subr.mxu0 %v1838_v13  ;;  %8476 = vmatprep.subr.mxu1 %v2179_v24 }
  0xfd   : > { %8363 = vmatmul.mubr.f32.gmra.mxu1 %v10107_v58  ;;  %8403 = vmatpush3.msra.mxu0 %v1838_v13  ;;  %v10392_v13 = vld [vmem:[#allocation2 + $0x4a] sm:$0xff] }
  0xfe   : > { %8365 = vmatprep.mubr.f32.mxu1 %v10111_v60  ;;  %8286 = vmatmul.mubr.f32.gmra.mxu0 %v10249_v55  ;;  %v12589_v55 = vld [vmem:[#allocation17_spill] sm:$0xff] }
  0xff   : > { %8477 = vmatpush3.msra.mxu1 %v2179_v24  ;;  %8288 = vmatprep.mubr.f32.mxu0 %v10251_v10  ;;  %v2564_v10 = vld [vmem:[#allocation8 + $0x178] sm:$0xff] }
 0x100   : > { %8478 = vmatprep.subr.mxu1 %v2178_v33  ;;  %8404 = vmatprep.subr.mxu0 %v1837_v44 }
 0x101   : > { %8366 = vmatmul.mubr.f32.gmra.mxu1 %v10115_v62  ;;  %8405 = vmatpush3.msra.mxu0 %v1837_v44  ;;  %v3237_v44 = vld [vmem:[#allocation8 + $0x460] sm:$0xff] }
 0x102   : > { %8368 = vmatprep.mubr.f32.mxu1 %v12587_v49  ;;  %8289 = vmatmul.mubr.f32.gmra.mxu0 %v10257_v14  ;;  %v2563_v14 = vld [vmem:[#allocation8 + $0x170] sm:$0xff] }
 0x103   : > { %8479 = vmatpush3.msra.mxu1 %v2178_v33  ;;  %8291 = vmatprep.mubr.f32.mxu0 %v511_v57 }
 0x104   : > { %8480 = vmatprep.subr.mxu1 %v2177_v2  ;;  %8534 = vmatprep.subr.mxu0 %v2564_v10 }
 0x105   : > { %8369 = vmatmul.mubr.f32.gmra.mxu1 %v12588_v21 }
 0x106   : > { %8371 = vmatprep.mubr.f32.mxu1 %v12589_v55  ;;  %8481 = vmatpush3.msra.mxu1 %v2177_v2 }
 0x107   : > { %8292 = vmatmul.mubr.f32.gmra.mxu0 %v9566_v3  ;;  %8482 = vmatprep.subr.mxu1 %v2176_v36 }
 0x108   : > { %8406 = vmatprep.mubr.f32.mxu0 %v10015_v16  ;;  %8483 = vmatpush3.msra.mxu1 %v2176_v36  ;;  %v2561_v16 = vld [vmem:[#allocation8 + $0x160] sm:$0xff] }
 0x109   : > { %8372 = vmatmul.mubr.f32.gmra.mxu1 %v12590_v50  ;;  %8484 = vmatprep.subr.mxu1 %v2175_v43 }
 0x10a   : > { %8486 = vmatprep.mubr.f32.mxu1 %v10023_v19  ;;  %8485 = vmatpush3.msra.mxu1 %v2175_v43  ;;  %v3236_v43 = vld [vmem:[#allocation8 + $0x458] sm:$0xff] }
 0x10b   : > { %8407 = vmatmul.mubr.f32.vlgmr.msra.gmra.mxu0 %v10018_v17  ;;  %8614 = vmatprep.subr.mxu1 %v2902_v63  ;;  %v2560_v17 = vld [vmem:[#allocation8 + $0x158] sm:$0xff] }
 0x10c   : > { %8535 = vmatpush3.msra.mxu0 %v2564_v10  ;;  %8409 = vmatprep.mubr.f32.mxu0 %v10023_v19  ;;  %v2901_v19 = vld [vmem:[#allocation8 + $0x2f0] sm:$0xff] }
 0x10d   : > { %8487 = vmatmul.mubr.f32.vlgmr.msra.gmra.mxu1 %v10026_v20  ;;  %8536 = vmatprep.subr.mxu0 %v2563_v14 }
 0x10e   : > { %8489 = vmatprep.mubr.f32.mxu1 %v10031_v22  ;;  %8537 = vmatpush3.msra.mxu0 %v2563_v14 }
 0x10f   : > { %8410 = vmatmul.mubr.f32.gmra.mxu0 %v10026_v20  ;;  %8538 = vmatprep.subr.mxu0 %v2562_v9  ;;  %v2559_v20 = vld [vmem:[#allocation8 + $0x150] sm:$0xff] }
 0x110   : > { %8412 = vmatprep.mubr.f32.mxu0 %v10031_v22  ;;  %8539 = vmatpush3.msra.mxu0 %v2562_v9  ;;  %v2900_v22 = vld [vmem:[#allocation8 + $0x2e8] sm:$0xff] }
 0x111   : > { %8490 = vmatmul.mubr.f32.gmra.mxu1 %v10034_v23  ;;  %8540 = vmatprep.subr.mxu0 %v2561_v16 }
 0x112   : > { %8492 = vmatprep.mubr.f32.mxu1 %v10039_v25  ;;  %8615 = vmatpush3.msra.mxu1 %v2902_v63 }
 0x113   : > { %8413 = vmatmul.mubr.f32.gmra.mxu0 %v10034_v23  ;;  %8616 = vmatprep.subr.mxu1 %v2901_v19  ;;  %v2558_v23 = vld [vmem:[#allocation8 + $0x148] sm:$0xff] }
 0x114   : > { %8415 = vmatprep.mubr.f32.mxu0 %v10039_v25  ;;  %8541 = vmatpush3.msra.mxu0 %v2561_v16  ;;  %v2899_v25 = vld [vmem:[#allocation8 + $0x2e0] sm:$0xff]  ;;  %v10411_v16 = vld [vmem:[#allocation2 + $0x6a] sm:$0xff] }
 0x115   : > { %8493 = vmatmul.mubr.f32.gmra.mxu1 %v10042_v26  ;;  %8542 = vmatprep.subr.mxu0 %v2560_v17 }
 0x116   : > { %8495 = vmatprep.mubr.f32.mxu1 %v10047_v28  ;;  %8617 = vmatpush3.msra.mxu1 %v2901_v19 }
 0x117   : > { %8416 = vmatmul.mubr.f32.gmra.mxu0 %v10042_v26  ;;  %8618 = vmatprep.subr.mxu1 %v2900_v22  ;;  %v2557_v26 = vld [vmem:[#allocation8 + $0x140] sm:$0xff] }
 0x118   : > { %8418 = vmatprep.mubr.f32.mxu0 %v10047_v28  ;;  %8543 = vmatpush3.msra.mxu0 %v2560_v17  ;;  %v2898_v28 = vld [vmem:[#allocation8 + $0x2d8] sm:$0xff] }
 0x119   : > { %8496 = vmatmul.mubr.f32.gmra.mxu1 %v10050_v29  ;;  %8544 = vmatprep.subr.mxu0 %v2559_v20  ;;  %v10415_v17 = vld [vmem:[#allocation2 + $0x7a] sm:$0xff] }
 0x11a   : > { %8498 = vmatprep.mubr.f32.mxu1 %v10055_v31  ;;  %8619 = vmatpush3.msra.mxu1 %v2900_v22  ;;  %v3235_v22 = vld [vmem:[#allocation8 + $0x450] sm:$0xff] }
 0x11b   : > { %8419 = vmatmul.mubr.f32.gmra.mxu0 %v10050_v29  ;;  %8620 = vmatprep.subr.mxu1 %v2899_v25  ;;  %v2556_v29 = vld [vmem:[#allocation8 + $0x138] sm:$0xff] }
 0x11c   : > { %8421 = vmatprep.mubr.f32.mxu0 %v10055_v31  ;;  %8545 = vmatpush3.msra.mxu0 %v2559_v20  ;;  %v2897_v31 = vld [vmem:[#allocation8 + $0x2d0] sm:$0xff] }
 0x11d   : > { %8499 = vmatmul.mubr.f32.gmra.mxu1 %v10058_v32  ;;  %8546 = vmatprep.subr.mxu0 %v2558_v23 }
 0x11e   : > { %8501 = vmatprep.mubr.f32.mxu1 %v10063_v34  ;;  %8621 = vmatpush3.msra.mxu1 %v2899_v25 }
 0x11f   : > { %8422 = vmatmul.mubr.f32.gmra.mxu0 %v10058_v32  ;;  %8622 = vmatprep.subr.mxu1 %v2898_v28  ;;  %v2555_v32 = vld [vmem:[#allocation8 + $0x130] sm:$0xff] }
 0x120   : > { %8424 = vmatprep.mubr.f32.mxu0 %v10063_v34  ;;  %8547 = vmatpush3.msra.mxu0 %v2558_v23  ;;  %v2896_v34 = vld [vmem:[#allocation8 + $0x2c8] sm:$0xff] }
 0x121   : > { %8502 = vmatmul.mubr.f32.gmra.mxu1 %v10066_v35  ;;  %8548 = vmatprep.subr.mxu0 %v2557_v26 }
 0x122   : > { %8504 = vmatprep.mubr.f32.mxu1 %v10071_v37  ;;  %8623 = vmatpush3.msra.mxu1 %v2898_v28  ;;  %v10423_v28 = vld [vmem:[#allocation2 + $0x82] sm:$0xff] }
 0x123   : > { %8425 = vmatmul.mubr.f32.gmra.mxu0 %v10066_v35  ;;  %8624 = vmatprep.subr.mxu1 %v2897_v31  ;;  %v2554_v35 = vld [vmem:[#allocation8 + $0x128] sm:$0xff] }
 0x124   : > { %8427 = vmatprep.mubr.f32.mxu0 %v10071_v37  ;;  %8549 = vmatpush3.msra.mxu0 %v2557_v26  ;;  %v2895_v37 = vld [vmem:[#allocation8 + $0x2c0] sm:$0xff] }
 0x125   : > { %8505 = vmatmul.mubr.f32.gmra.mxu1 %v10074_v38  ;;  %8550 = vmatprep.subr.mxu0 %v2556_v29 }
 0x126   : > { %8507 = vmatprep.mubr.f32.mxu1 %v10079_v39  ;;  %8625 = vmatpush3.msra.mxu1 %v2897_v31  ;;  %v10427_v31 = vld [vmem:[#allocation2 + $0x92] sm:$0xff] }
 0x127   : > { %8428 = vmatmul.mubr.f32.gmra.mxu0 %v10074_v38  ;;  %8626 = vmatprep.subr.mxu1 %v2896_v34  ;;  %v2553_v38 = vld [vmem:[#allocation8 + $0x120] sm:$0xff] }
 0x128   : > { %8430 = vmatprep.mubr.f32.mxu0 %v10079_v39  ;;  %8551 = vmatpush3.msra.mxu0 %v2556_v29  ;;  %v2894_v39 = vld [vmem:[#allocation8 + $0x2b8] sm:$0xff] }
 0x129   : > { %8508 = vmatmul.mubr.f32.gmra.mxu1 %v10083_v42  ;;  %8552 = vmatprep.subr.mxu0 %v2555_v32 }
 0x12a   : > { %8510 = vmatprep.mubr.f32.mxu1 %v10087_v45  ;;  %8627 = vmatpush3.msra.mxu1 %v2896_v34 }
 0x12b   : > { %8431 = vmatmul.mubr.f32.gmra.mxu0 %v10083_v42  ;;  %8628 = vmatprep.subr.mxu1 %v2895_v37  ;;  %v2552_v42 = vld [vmem:[#allocation8 + $0x118] sm:$0xff] }
 0x12c   : > { %8433 = vmatprep.mubr.f32.mxu0 %v10087_v45  ;;  %8553 = vmatpush3.msra.mxu0 %v2555_v32  ;;  %v2893_v45 = vld [vmem:[#allocation8 + $0x2b0] sm:$0xff] }
 0x12d   : > { %8511 = vmatmul.mubr.f32.gmra.mxu1 %v10091_v48  ;;  %8554 = vmatprep.subr.mxu0 %v2554_v35 }
 0x12e   : > { %8513 = vmatprep.mubr.f32.mxu1 %v10095_v51  ;;  %8629 = vmatpush3.msra.mxu1 %v2895_v37 }
 0x12f   : > { %8434 = vmatmul.mubr.f32.gmra.mxu0 %v10091_v48  ;;  %8630 = vmatprep.subr.mxu1 %v2894_v39  ;;  %v2551_v48 = vld [vmem:[#allocation8 + $0x110] sm:$0xff] }
 0x130   : > { %8436 = vmatprep.mubr.f32.mxu0 %v10095_v51  ;;  %8555 = vmatpush3.msra.mxu0 %v2554_v35  ;;  %v2892_v51 = vld [vmem:[#allocation8 + $0x2a8] sm:$0xff] }
 0x131   : > { %8514 = vmatmul.mubr.f32.gmra.mxu1 %v10099_v54  ;;  %8556 = vmatprep.subr.mxu0 %v2553_v38  ;;  %v3234_v35 = vld [vmem:[#allocation8 + $0x448] sm:$0xff] }
 0x132   : > { %8516 = vmatprep.mubr.f32.mxu1 %v10103_v56  ;;  %8631 = vmatpush3.msra.mxu1 %v2894_v39 }
 0x133   : > { %8437 = vmatmul.mubr.f32.gmra.mxu0 %v10099_v54  ;;  %8632 = vmatprep.subr.mxu1 %v2893_v45  ;;  %v2550_v54 = vld [vmem:[#allocation8 + $0x108] sm:$0xff] }
 0x134   : > { %8439 = vmatprep.mubr.f32.mxu0 %v10103_v56  ;;  %8557 = vmatpush3.msra.mxu0 %v2553_v38  ;;  %v2891_v56 = vld [vmem:[#allocation8 + $0x2a0] sm:$0xff] }
 0x135   : > { %8517 = vmatmul.mubr.f32.gmra.mxu1 %v10107_v58  ;;  %8558 = vmatprep.subr.mxu0 %v2552_v42 }
 0x136   : > { %8519 = vmatprep.mubr.f32.mxu1 %v10111_v60  ;;  %8633 = vmatpush3.msra.mxu1 %v2893_v45 }
 0x137   : > { %8440 = vmatmul.mubr.f32.gmra.mxu0 %v10107_v58  ;;  %8634 = vmatprep.subr.mxu1 %v2892_v51  ;;  %v2890_v58 = vld [vmem:[#allocation8 + $0x298] sm:$0xff] }
 0x138   : > { %8442 = vmatprep.mubr.f32.mxu0 %v10111_v60  ;;  %8559 = vmatpush3.msra.mxu0 %v2552_v42  ;;  %v2549_v60 = vld [vmem:[#allocation8 + $0x100] sm:$0xff] }
 0x139   : > { %8520 = vmatmul.mubr.f32.gmra.mxu1 %v10115_v62  ;;  %8560 = vmatprep.subr.mxu0 %v2551_v48  ;;  %v10435_v42 = vld [vmem:[#allocation2 + $0x9a] sm:$0xff] }
 0x13a   : > { %8522 = vmatprep.mubr.f32.mxu1 %v12587_v49  ;;  %8635 = vmatpush3.msra.mxu1 %v2892_v51 }
 0x13b   : > { %8443 = vmatmul.mubr.f32.gmra.mxu0 %v10115_v62  ;;  %8636 = vmatprep.subr.mxu1 %v2891_v56  ;;  %v12591_v62 = vld [vmem:[#allocation19_spill] sm:$0xff] }
 0x13c   : > { %8445 = vmatprep.mubr.f32.mxu0 %v12587_v49  ;;  %8561 = vmatpush3.msra.mxu0 %v2551_v48  ;;  %v10439_v48 = vld [vmem:[#allocation2 + $0xaa] sm:$0xff] }
 0x13d   : > { %8523 = vmatmul.mubr.f32.gmra.mxu1 %v12588_v21  ;;  %8562 = vmatprep.subr.mxu0 %v2550_v54 }
 0x13e   : > { %8525 = vmatprep.mubr.f32.mxu1 %v12589_v55  ;;  %8637 = vmatpush3.msra.mxu1 %v2891_v56  ;;  %v3233_v56 = vld [vmem:[#allocation8 + $0x440] sm:$0xff] }
 0x13f   : > { %8446 = vmatmul.mubr.f32.gmra.mxu0 %v12588_v21  ;;  %8638 = vmatprep.subr.mxu1 %v2890_v58  ;;  %v10399_v21 = vld [vmem:[#allocation2 + $0x52] sm:$0xff] }
 0x140   : > { %8448 = vmatprep.mubr.f32.mxu0 %v12589_v55  ;;  %8563 = vmatpush3.msra.mxu0 %v2550_v54  ;;  %v10403_v55 = vld [vmem:[#allocation2 + $0x62] sm:$0xff] }
 0x141   : > { %8526 = vmatmul.mubr.f32.gmra.mxu1 %v12590_v50  ;;  %8564 = vmatprep.subr.mxu0 %v2549_v60 }
 0x142   : > { %8528 = vmatprep.mubr.f32.mxu1 %v12591_v62  ;;  %8639 = vmatpush3.msra.mxu1 %v2890_v58 }
 0x143   : > { %8449 = vmatmul.mubr.f32.gmra.mxu0 %v12590_v50  ;;  %8640 = vmatprep.subr.mxu1 %v2889_v0 }
 0x144   : > { %8451 = vmatprep.mubr.f32.mxu0 %v12591_v62  ;;  %8565 = vmatpush3.msra.mxu0 %v2549_v60 }
 0x145   : > { %8529 = vmatmul.mubr.f32.gmra.mxu1 %v12592_v5  ;;  %8694 = vmatprep.subr.mxu0 %v3240_v11 }
 0x146   : > { %8531 = vmatprep.mubr.f32.mxu1 %v1496_v4  ;;  %8641 = vmatpush3.msra.mxu1 %v2889_v0  ;;  %v10447_v0 = vld [vmem:[#allocation2 + $0xb2] sm:$0xff] }
 0x147   : > { %8452 = vmatmul.mubr.f32.gmra.mxu0 %v12592_v5  ;;  %8642 = vmatprep.subr.mxu1 %v2888_v1  ;;  %v10451_v5 = vld [vmem:[#allocation2 + $0xc2] sm:$0xff] }
 0x148   : > { %8566 = vmatprep.mubr.f32.mxu0 %v2512_v7  ;;  %8643 = vmatpush3.msra.mxu1 %v2888_v1  ;;  %v3232_v7 = vld [vmem:[#allocation8 + $0x438] sm:$0xff] }
 0x149   : > { %8532 = vmatmul.mubr.f32.gmra.mxu1 %v1497_v6  ;;  %8644 = vmatprep.subr.mxu1 %v2887_v12  ;;  %v8088_v40 = vpop.f32.mrf.mxu0 }
 0x14a   : > { %8646 = vmatprep.mubr.f32.mxu1 %v2514_v15  ;;  %8645 = vmatpush3.msra.mxu1 %v2887_v12 }
 0x14b   : > { %8567 = vmatmul.mubr.f32.vlgmr.msra.gmra.mxu0 %v2513_v18  ;;  %v595_v53 = vpop.f32.mrf.mxu0  ;;  %v10459_v18 = vld [vmem:[#allocation2 + $0xca] sm:$0xff] }
 0x14c   : > { %8695 = vmatpush3.msra.mxu0 %v3240_v11  ;;  %8569 = vmatprep.mubr.f32.mxu0 %v2514_v15 }
 0x14d   : > { %v8168_v41 = vpop.f32.mrf.mxu1  ;;  %8647 = vmatmul.mubr.f32.vlgmr.msra.gmra.mxu1 %v2515_v27  ;;  %8696 = vmatprep.subr.mxu0 %v3239_v30  ;;  %v8091_v24 = vpop.f32.mrf.mxu0 }
 0x14e   : > { %v10385_v47 = vadd.f32 %v8168_v41, %v8088_v40  ;;  %8649 = vmatprep.mubr.f32.mxu1 %v10383_v46  ;;  %8697 = vmatpush3.msra.mxu0 %v3239_v30  ;;  %v10463_v30 = vld [vmem:[#allocation2 + $0xda] sm:$0xff] }
 0x14f   : > { %v869_v59 = vpop.f32.mrf.mxu1  ;;  %8570 = vmatmul.mubr.f32.gmra.mxu0 %v2515_v27  ;;  %8698 = vmatprep.subr.mxu0 %v3238_v52  ;;  %v605_v57 = vpop.f32.mrf.mxu0 }
 0x150   : > { %v10389_v8 = vadd.f32 %v869_v59, %v595_v53  ;;  %8572 = vmatprep.mubr.f32.mxu0 %v10383_v46  ;;  %8699 = vmatpush3.msra.mxu0 %v3238_v52  ;;  %v3231_v52 = vld [vmem:[#allocation8 + $0x430] sm:$0xff] }
 0x151   : > { %v8171_v33 = vpop.f32.mrf.mxu1  ;;  %8650 = vmatmul.mubr.f32.gmra.mxu1 %v10387_v61  ;;  %8700 = vmatprep.subr.mxu0 %v3237_v44  ;;  %v8094_v10 = vpop.f32.mrf.mxu0 }
 0x152   : > { %v10394_v49 = vadd.f32 %v8171_v33, %v8091_v24  ;;  %8652 = vmatprep.mubr.f32.mxu1 %v10392_v13  ;;  %8701 = vmatpush3.msra.mxu0 %v3237_v44  ;;  %v10471_v33 = vld [vmem:[#allocation2 + $0xe2] sm:$0xff] }
 0x153   : > { %v879_v2 = vpop.f32.mrf.mxu1  ;;  %8573 = vmatmul.mubr.f32.gmra.mxu0 %v10387_v61  ;;  %v615_v14 = vpop.f32.mrf.mxu0  ;;  %8702 = vmatprep.subr.mxu0 %v3236_v43 }
 0x154   : > { %v10401_v36 = vadd.f32 %v879_v2, %v605_v57  ;;  %8575 = vmatprep.mubr.f32.mxu0 %v10392_v13  ;;  %8703 = vmatpush3.msra.mxu0 %v3236_v43  ;;  %v10475_v57 = vld [vmem:[#allocation2 + $0xf2] sm:$0xff] }
 0x155   : > { %v8174_v3 = vpop.f32.mrf.mxu1  ;;  %8653 = vmatmul.mubr.f32.gmra.mxu1 %v10399_v21  ;;  %v8097_v19 = vpop.f32.mrf.mxu0  ;;  %8704 = vmatprep.subr.mxu0 %v3235_v22 }
 0x156   : > { %v10406_v50 = vadd.f32 %v8174_v3, %v8094_v10  ;;  %8655 = vmatprep.mubr.f32.mxu1 %v10403_v55  ;;  %8705 = vmatpush3.msra.mxu0 %v3235_v22  ;;  %v3230_v3 = vld [vmem:[#allocation8 + $0x428] sm:$0xff] }
 0x157   : > { %v889_v9 = vpop.f32.mrf.mxu1  ;;  %8576 = vmatmul.mubr.f32.gmra.mxu0 %v10399_v21  ;;  %v625_v25 = vpop.f32.mrf.mxu0  ;;  %8706 = vmatprep.subr.mxu0 %v3234_v35 }
 0x158   : > { %v10413_v63 = vadd.f32 %v889_v9, %v615_v14  ;;  %8578 = vmatprep.mubr.f32.mxu0 %v10403_v55  ;;  %8707 = vmatpush3.msra.mxu0 %v3234_v35 }
 0x159   : > { %v8177_v20 = vpop.f32.mrf.mxu1  ;;  %8656 = vmatmul.mubr.f32.gmra.mxu1 %v10411_v16  ;;  %v8100_v32 = vpop.f32.mrf.mxu0  ;;  %8708 = vmatprep.subr.mxu0 %v3233_v56 }
 0x15a   : > { %v10418_v23 = vadd.f32 %v8177_v20, %v8097_v19  ;;  %8658 = vmatprep.mubr.f32.mxu1 %v10415_v17  ;;  %8709 = vmatpush3.msra.mxu0 %v3233_v56  ;;  %v10487_v19 = vld [vmem:[#allocation2 + $0xfa] sm:$0xff]  ;;  %v10489_v20 = vld [vmem:[#allocation2 + $0x10a] sm:$0xff] }
 0x15b   : > { %v899_v26 = vpop.f32.mrf.mxu1  ;;  %8579 = vmatmul.mubr.f32.gmra.mxu0 %v10411_v16  ;;  %v635_v38 = vpop.f32.mrf.mxu0  ;;  %8710 = vmatprep.subr.mxu0 %v3232_v7  ;;  %v3228_v56 = vld [vmem:[#allocation8 + $0x418] sm:$0xff] }
 0x15c   : > { %v10425_v29 = vadd.f32 %v899_v26, %v625_v25  ;;  %8581 = vmatprep.mubr.f32.mxu0 %v10415_v17  ;;  %8711 = vmatpush3.msra.mxu0 %v3232_v7  ;;  %v3229_v26 = vld [vmem:[#allocation8 + $0x420] sm:$0xff] }
 0x15d   : > { %v8180_v34 = vpop.f32.mrf.mxu1  ;;  %8659 = vmatmul.mubr.f32.gmra.mxu1 %v10423_v28  ;;  %v8103_v51 = vpop.f32.mrf.mxu0  ;;  %8712 = vmatprep.subr.mxu0 %v3231_v52  ;;  %v10517_v7 = vld [vmem:[#allocation2 + $0x13a] sm:$0xff] }
 0x15e   : > { %v10430_v37 = vadd.f32 %v8180_v34, %v8100_v32  ;;  %8661 = vmatprep.mubr.f32.mxu1 %v10427_v31  ;;  %8713 = vmatpush3.msra.mxu0 %v3231_v52 }
 0x15f   : > { %v909_v39 = vpop.f32.mrf.mxu1  ;;  %8582 = vmatmul.mubr.f32.gmra.mxu0 %v10423_v28  ;;  %v645_v60 = vpop.f32.mrf.mxu0  ;;  %8714 = vmatprep.subr.mxu0 %v3230_v3 }
 0x160   : > { %v10437_v45 = vadd.f32 %v909_v39, %v635_v38  ;;  %8584 = vmatprep.mubr.f32.mxu0 %v10427_v31  ;;  %8715 = vmatpush3.msra.mxu0 %v3230_v3  ;;  %v10501_v38 = vld [vmem:[#allocation2 + $0x112] sm:$0xff]  ;;  %v10503_v39 = vld [vmem:[#allocation2 + $0x122] sm:$0xff] }
 0x161   : > { %v8183_v54 = vpop.f32.mrf.mxu1  ;;  %8662 = vmatmul.mubr.f32.gmra.mxu1 %v10435_v42  ;;  %v8106_v1 = vpop.f32.mrf.mxu0  ;;  %8716 = vmatprep.subr.mxu0 %v3229_v26 }
 0x162   : > { %v10442_v58 = vadd.f32 %v8183_v54, %v8103_v51  ;;  %8664 = vmatprep.mubr.f32.mxu1 %v10439_v48  ;;  %8717 = vmatpush3.msra.mxu0 %v3229_v26 }
 0x163   : > { %v919_v62 = vpop.f32.mrf.mxu1  ;;  %8585 = vmatmul.mubr.f32.gmra.mxu0 %v10435_v42  ;;  %v655_v12 = vpop.f32.mrf.mxu0  ;;  %8718 = vmatprep.subr.mxu0 %v3228_v56 }
 0x164   : > { %v10449_v4 = vadd.f32 %v919_v62, %v645_v60  ;;  %8587 = vmatprep.mubr.f32.mxu0 %v10439_v48  ;;  %8719 = vmatpush3.msra.mxu0 %v3228_v56  ;;  %v10545_v56 = vld [vmem:[#allocation2 + $0x16a] sm:$0xff] }
 0x165   : > { %v8186_v6 = vpop.f32.mrf.mxu1  ;;  %8665 = vmatmul.mubr.f32.gmra.mxu1 %v10447_v0  ;;  %v8109_v40 = vpop.f32.mrf.mxu0 }
 0x166   : > { %v10454_v11 = vadd.f32 %v8186_v6, %v8106_v1  ;;  %8667 = vmatprep.mubr.f32.mxu1 %v10451_v5  ;;  %v10515_v6 = vld [vmem:[#allocation2 + $0x12a] sm:$0xff] }
 0x167   : > { %v929_v15 = vpop.f32.mrf.mxu1  ;;  %8588 = vmatmul.mubr.f32.gmra.mxu0 %v10447_v0  ;;  %v665_v59 = vpop.f32.mrf.mxu0 }
 0x168   : > { %v10461_v27 = vadd.f32 %v929_v15, %v655_v12  ;;  %8590 = vmatprep.mubr.f32.mxu0 %v10451_v5 }
 0x169   : > { %v8189_v41 = vpop.f32.mrf.mxu1  ;;  %8668 = vmatmul.mubr.f32.gmra.mxu1 %v10459_v18  ;;  %v8112_v2 = vpop.f32.mrf.mxu0 }
 0x16a   : > { %v10466_v53 = vadd.f32 %v8189_v41, %v8109_v40  ;;  %8670 = vmatprep.mubr.f32.mxu1 %v10463_v30  ;;  %v3227_v40 = vld [vmem:[#allocation8 + $0x410] sm:$0xff] }
 0x16b   : > { %v939_v24 = vpop.f32.mrf.mxu1  ;;  %8591 = vmatmul.mubr.f32.gmra.mxu0 %v10459_v18  ;;  %v10482_v14 = vpop.f32.mrf.mxu0  ;;  %8720 = vmatprep.subr.mxu0 %v3227_v40 }
 0x16c   : > { %v10473_v44 = vadd.f32 %v939_v24, %v665_v59  ;;  %8593 = vmatprep.mubr.f32.mxu0 %v10463_v30  ;;  %v10529_v24 = vld [vmem:[#allocation2 + $0x142] sm:$0xff]  ;;  %8721 = vmatpush3.msra.mxu0 %v3227_v40  ;;  %v10557_v40 = vld [vmem:[#allocation2 + $0x172] sm:$0xff] }
 0x16d   : > { %v8192_v10 = vpop.f32.mrf.mxu1  ;;  %8671 = vmatmul.mubr.f32.gmra.mxu1 %v10471_v33  ;;  %v8115_v22 = vpop.f32.mrf.mxu0 }
 0x16e   : > { %v10478_v43 = vadd.f32 %v8192_v10, %v8112_v2  ;;  %8673 = vmatprep.mubr.f32.mxu1 %v10475_v57  ;;  %v10531_v2 = vld [vmem:[#allocation2 + $0x152] sm:$0xff] }
 0x16f   : > { %v10484_v9 = vpop.f32.mrf.mxu1  ;;  %8594 = vmatmul.mubr.f32.gmra.mxu0 %v10471_v33  ;;  %v10496_v34 = vpop.f32.mrf.mxu0 }
 0x170   : > { %12593 = vst [vmem:[#allocation15_spill] sm:$0xff] %v10484_v9  ;;  %8596 = vmatprep.mubr.f32.mxu0 %v10475_v57  ;;  %12594 = vst [vmem:[#allocation16_spill] sm:$0xff] %v10496_v34 }
 0x171   : > { %v8195_v25 = vpop.f32.mrf.mxu1  ;;  %8674 = vmatmul.mubr.f32.gmra.mxu1 %v10487_v19  ;;  %v8118_v51 = vpop.f32.mrf.mxu0 }
 0x172   : > { %v10492_v32 = vadd.f32 %v8195_v25, %v8115_v22  ;;  %8676 = vmatprep.mubr.f32.mxu1 %v10489_v20  ;;  %v3226_v22 = vld [vmem:[#allocation8 + $0x408] sm:$0xff] }
 0x173   : > { %v10498_v35 = vpop.f32.mrf.mxu1  ;;  %8597 = vmatmul.mubr.f32.gmra.mxu0 %v10487_v19  ;;  %v10510_v62 = vpop.f32.mrf.mxu0  ;;  %8722 = vmatprep.subr.mxu0 %v3226_v22 }
 0x174   : > { %12595 = vst [vmem:[#allocation17_spill] sm:$0xff] %v10498_v35  ;;  %8599 = vmatprep.mubr.f32.mxu0 %v10489_v20  ;;  %12596 = vst [vmem:[#allocation18_spill] sm:$0xff] %v10510_v62  ;;  %8723 = vmatpush3.msra.mxu0 %v3226_v22  ;;  %v10571_v22 = vld [vmem:[#allocation2 + $0x18a] sm:$0xff] }
 0x175   : > { %v8198_v54 = vpop.f32.mrf.mxu1  ;;  %8677 = vmatmul.mubr.f32.gmra.mxu1 %v10501_v38  ;;  %v8121_v12 = vpop.f32.mrf.mxu0 }
 0x176   : > { %v10506_v60 = vadd.f32 %v8198_v54, %v8118_v51  ;;  %8679 = vmatprep.mubr.f32.mxu1 %v10503_v39  ;;  %v10543_v54 = vld [vmem:[#allocation2 + $0x15a] sm:$0xff] }
 0x177   : > { %v10512_v1 = vpop.f32.mrf.mxu1  ;;  %8600 = vmatmul.mubr.f32.gmra.mxu0 %v10501_v38  ;;  %v10524_v52 = vpop.f32.mrf.mxu0 }
 0x178   : > { %12597 = vst [vmem:[#allocation19_spill] sm:$0xff] %v10512_v1  ;;  %8602 = vmatprep.mubr.f32.mxu0 %v10503_v39  ;;  %12598 = vst [vmem:[#allocation20_spill] sm:$0xff] %v10524_v52 }
 0x179   : > { %v8201_v15 = vpop.f32.mrf.mxu1  ;;  %8680 = vmatmul.mubr.f32.gmra.mxu1 %v10515_v6  ;;  %v8124_v10 = vpop.f32.mrf.mxu0 }
 0x17a   : > { %v10520_v41 = vadd.f32 %v8201_v15, %v8121_v12  ;;  %8682 = vmatprep.mubr.f32.mxu1 %v10517_v7 }
 0x17b   : > { %v10526_v59 = vpop.f32.mrf.mxu1  ;;  %8603 = vmatmul.mubr.f32.gmra.mxu0 %v10515_v6  ;;  %v10538_v26 = vpop.f32.mrf.mxu0 }
 0x17c   : > { %12599 = vst [vmem:[#allocation21_spill] sm:$0xff] %v10526_v59  ;;  %8605 = vmatprep.mubr.f32.mxu0 %v10517_v7  ;;  %12600 = vst [vmem:[#allocation22_spill] sm:$0xff] %v10538_v26  ;;  %v10559_v59 = vld [vmem:[#allocation2 + $0x182] sm:$0xff] }
 0x17d   : > { %v8204_v3 = vpop.f32.mrf.mxu1  ;;  %8683 = vmatmul.mubr.f32.gmra.mxu1 %v10529_v24  ;;  %v8127_v12 = vpop.f32.mrf.mxu0 }
 0x17e   : > { %v10534_v25 = vadd.f32 %v8204_v3, %v8124_v10  ;;  %8685 = vmatprep.mubr.f32.mxu1 %v10531_v2  ;;  %v3225_v10 = vld [vmem:[#allocation8 + $0x400] sm:$0xff] }
 0x17f   : > { %v10540_v51 = vpop.f32.mrf.mxu1  ;;  %8606 = vmatmul.mubr.f32.gmra.mxu0 %v10529_v24  ;;  %8724 = vmatprep.subr.mxu0 %v3225_v10 }
 0x180   : > { %12601 = vst [vmem:[#allocation23_spill] sm:$0xff] %v10540_v51  ;;  %8608 = vmatprep.mubr.f32.mxu0 %v10531_v2  ;;  %v10552_v51 = vpop.f32.mrf.mxu0  ;;  %8725 = vmatpush3.msra.mxu0 %v3225_v10 }
 0x181   : > { %v8207_v15 = vpop.f32.mrf.mxu1  ;;  %8686 = vmatmul.mubr.f32.gmra.mxu1 %v10543_v54  ;;  %12602 = vst [vmem:[#allocation24_spill] sm:$0xff] %v10552_v51 }
 0x182   : > { %v10548_v3 = vadd.f32 %v8207_v15, %v8127_v12  ;;  %8688 = vmatprep.mubr.f32.mxu1 %v10545_v56  ;;  %v8130_v52 = vpop.f32.mrf.mxu0 }
 0x183   : > { %v10554_v26 = vpop.f32.mrf.mxu1  ;;  %8609 = vmatmul.mubr.f32.gmra.mxu0 %v10543_v54 }
 0x184   : > { %12603 = vst [vmem:[#allocation25_spill] sm:$0xff] %v10554_v26  ;;  %8611 = vmatprep.mubr.f32.mxu0 %v10545_v56  ;;  %v10566_v15 = vpop.f32.mrf.mxu0 }
 0x185   : > { %v8210_v1 = vpop.f32.mrf.mxu1  ;;  %8689 = vmatmul.mubr.f32.gmra.mxu1 %v10557_v40  ;;  %12604 = vst [vmem:[#allocation26_spill] sm:$0xff] %v10566_v15 }
 0x186   : > { %v10562_v12 = vadd.f32 %v8210_v1, %v8130_v52  ;;  %8691 = vmatprep.mubr.f32.mxu1 %v10559_v59  ;;  %v8133_v51 = vpop.f32.mrf.mxu0 }
 0x187   : > { %v10568_v26 = vpop.f32.mrf.mxu1  ;;  %8612 = vmatmul.mubr.f32.gmra.mxu0 %v10557_v40 }
 0x188   : > { %12605 = vst [vmem:[#allocation27_spill] sm:$0xff] %v10568_v26  ;;  %8726 = vmatprep.mubr.f32.mxu0 %v10383_v46  ;;  %v10578_v1 = vpop.f32.mrf.mxu0 }
 0x189   : > { %v8213_v62 = vpop.f32.mrf.mxu1  ;;  %8692 = vmatmul.mubr.f32.gmra.mxu1 %v10571_v22  ;;  %12606 = vst [vmem:[#allocation28_spill] sm:$0xff] %v10578_v1 }
 0x18a   : > { %v10574_v35 = vadd.f32 %v8213_v62, %v8133_v51  ;;  %v8248_v26 = vpop.f32.mrf.mxu0 }
 0x18b   : > { %v10580_v52 = vpop.f32.mrf.mxu1  ;;  %8727 = vmatmul.mubr.f32.vlgmr.msra.gmra.mxu0 %v10387_v61  ;;  %v1399_v10 = vadd.f32 %v8248_v26, %v10385_v47 }
 0x18c   : > { %12607 = vst [vmem:[#allocation29_spill] sm:$0xff] %v10580_v52  ;;  %8729 = vmatprep.mubr.f32.mxu0 %v10392_v13  ;;  %v1207_v34 = vpop.f32.mrf.mxu0 }
 0x18d   : > { %v8328_v15 = vpop.f32.mrf.mxu1  ;;  %v10586_v62 = vadd.f32 %v1207_v34, %v10389_v8 }
 0x18e   : > { %v10588_v51 = vadd.f32 %v8328_v15, %v1399_v10  ;;  %v8251_v46 = vpop.f32.mrf.mxu0 }
 0x18f   : > { %v10590_v9 = vpop.f32.mrf.mxu1  ;;  %8730 = vmatmul.mubr.f32.gmra.mxu0 %v10399_v21  ;;  %v1401_v52 = vadd.f32 %v8251_v46, %v10394_v49 }
 0x190   : > { %8732 = vmatprep.mubr.f32.mxu0 %v10403_v55  ;;  %v1217_v47 = vpop.f32.mrf.mxu0 }
 0x191   : > { %v8331_v1 = vpop.f32.mrf.mxu1  ;;  %v10596_v61 = vadd.f32 %v1217_v47, %v10401_v36 }
 0x192   : > { %v10598_v13 = vadd.f32 %v8331_v1, %v1401_v52  ;;  %v8254_v34 = vpop.f32.mrf.mxu0 }
 0x193   : > { %v10600_v8 = vpop.f32.mrf.mxu1  ;;  %8733 = vmatmul.mubr.f32.gmra.mxu0 %v10411_v16  ;;  %v1403_v26 = vadd.f32 %v8254_v34, %v10406_v50 }
 0x194   : > { %8735 = vmatprep.mubr.f32.mxu0 %v10415_v17  ;;  %v1227_v49 = vpop.f32.mrf.mxu0 }
 0x195   : > { %v8334_v15 = vpop.f32.mrf.mxu1  ;;  %v10606_v21 = vadd.f32 %v1227_v49, %v10413_v63 }
 0x196   : > { %v10608_v55 = vadd.f32 %v8334_v15, %v1403_v26  ;;  %v8257_v1 = vpop.f32.mrf.mxu0 }
 0x197   : > { %v10610_v36 = vpop.f32.mrf.mxu1  ;;  %8736 = vmatmul.mubr.f32.gmra.mxu0 %v10423_v28  ;;  %v1405_v52 = vadd.f32 %v8257_v1, %v10418_v23  ;;  %v3788_v23 = vld [vmem:[#allocation10 + $0x78] sm:$0xff] }
 0x198   : > { %8738 = vmatprep.mubr.f32.mxu0 %v10427_v31  ;;  %v1237_v50 = vpop.f32.mrf.mxu0  ;;  %8774 = vmatprep.subr.mxu1 %v3788_v23 }
 0x199   : > { %v8337_v10 = vpop.f32.mrf.mxu1  ;;  %v10616_v16 = vadd.f32 %v1237_v50, %v10425_v29  ;;  %8775 = vmatpush3.msra.mxu1 %v3788_v23 }
 0x19a   : > { %v10618_v17 = vadd.f32 %v8337_v10, %v1405_v52  ;;  %v8260_v46 = vpop.f32.mrf.mxu0 }
 0x19b   : > { %v10620_v63 = vpop.f32.mrf.mxu1  ;;  %8739 = vmatmul.mubr.f32.gmra.mxu0 %v10435_v42  ;;  %v1407_v47 = vadd.f32 %v8260_v46, %v10430_v37 }
 0x19c   : > { %8741 = vmatprep.mubr.f32.mxu0 %v10439_v48  ;;  %v1247_v28 = vpop.f32.mrf.mxu0  ;;  %v3787_v48 = vld [vmem:[#allocation10 + $0x70] sm:$0xff] }
 0x19d   : > { %v8340_v34 = vpop.f32.mrf.mxu1  ;;  %v10626_v31 = vadd.f32 %v1247_v28, %v10437_v45  ;;  %8776 = vmatprep.subr.mxu1 %v3787_v48 }
 0x19e   : > { %v10628_v29 = vadd.f32 %v8340_v34, %v1407_v47  ;;  %v8263_v15 = vpop.f32.mrf.mxu0  ;;  %8777 = vmatpush3.msra.mxu1 %v3787_v48 }
 0x19f   : > { %v10630_v26 = vpop.f32.mrf.mxu1  ;;  %8742 = vmatmul.mubr.f32.gmra.mxu0 %v10447_v0  ;;  %v1409_v42 = vadd.f32 %v8263_v15, %v10442_v58 }
 0x1a0   : > { %8744 = vmatprep.mubr.f32.mxu0 %v10451_v5  ;;  %v1257_v49 = vpop.f32.mrf.mxu0  ;;  %v3786_v5 = vld [vmem:[#allocation10 + $0x68] sm:$0xff] }
 0x1a1   : > { %v8343_v37 = vpop.f32.mrf.mxu1  ;;  %v10636_v1 = vadd.f32 %v1257_v49, %v10449_v4  ;;  %8778 = vmatprep.subr.mxu1 %v3786_v5 }
 0x1a2   : > { %v10638_v45 = vadd.f32 %v8343_v37, %v1409_v42  ;;  %v8266_v10 = vpop.f32.mrf.mxu0  ;;  %8779 = vmatpush3.msra.mxu1 %v3786_v5 }
 0x1a3   : > { %v10640_v52 = vpop.f32.mrf.mxu1  ;;  %8745 = vmatmul.mubr.f32.gmra.mxu0 %v10459_v18  ;;  %v1411_v0 = vadd.f32 %v8266_v10, %v10454_v11 }
 0x1a4   : > { %8747 = vmatprep.mubr.f32.mxu0 %v10463_v30  ;;  %v1267_v50 = vpop.f32.mrf.mxu0  ;;  %v3785_v30 = vld [vmem:[#allocation10 + $0x60] sm:$0xff] }
 0x1a5   : > { %v8346_v58 = vpop.f32.mrf.mxu1  ;;  %v10646_v46 = vadd.f32 %v1267_v50, %v10461_v27  ;;  %8780 = vmatprep.subr.mxu1 %v3785_v30 }
 0x1a6   : > { %v10648_v4 = vadd.f32 %v8346_v58, %v1411_v0  ;;  %v8269_v34 = vpop.f32.mrf.mxu0  ;;  %8781 = vmatpush3.msra.mxu1 %v3785_v30 }
 0x1a7   : > { %v10650_v47 = vpop.f32.mrf.mxu1  ;;  %8748 = vmatmul.mubr.f32.gmra.mxu0 %v10471_v33  ;;  %v1413_v18 = vadd.f32 %v8269_v34, %v10466_v53 }
 0x1a8   : > { %8750 = vmatprep.mubr.f32.mxu0 %v10475_v57  ;;  %v1277_v23 = vpop.f32.mrf.mxu0  ;;  %v3784_v57 = vld [vmem:[#allocation10 + $0x58] sm:$0xff] }
 0x1a9   : > { %v8349_v11 = vpop.f32.mrf.mxu1  ;;  %v10656_v28 = vadd.f32 %v1277_v23, %v10473_v44  ;;  %8782 = vmatprep.subr.mxu1 %v3784_v57 }
 0x1aa   : > { %v10658_v27 = vadd.f32 %v8349_v11, %v1413_v18  ;;  %v8272_v42 = vpop.f32.mrf.mxu0  ;;  %8783 = vmatpush3.msra.mxu1 %v3784_v57 }
 0x1ab   : > { %v10660_v15 = vpop.f32.mrf.mxu1  ;;  %8751 = vmatmul.mubr.f32.gmra.mxu0 %v10487_v19  ;;  %v1415_v33 = vadd.f32 %v8272_v42, %v10478_v43  ;;  %v3783_v43 = vld [vmem:[#allocation10 + $0x50] sm:$0xff] }
 0x1ac   : > { %8753 = vmatprep.mubr.f32.mxu0 %v10489_v20  ;;  %v10665_v37 = vpop.f32.mrf.mxu0  ;;  %8784 = vmatprep.subr.mxu1 %v3783_v43 }
 0x1ad   : > { %v8352_v53 = vpop.f32.mrf.mxu1  ;;  %8785 = vmatpush3.msra.mxu1 %v3783_v43  ;;  %v4061_v43 = vld [vmem:[#allocation10 + $0x1f0] sm:$0xff] }
 0x1ae   : > { %v10667_v48 = vadd.f32 %v8352_v53, %v1415_v33  ;;  %v8275_v49 = vpop.f32.mrf.mxu0 }
 0x1af   : > { %v10669_v44 = vpop.f32.mrf.mxu1  ;;  %8754 = vmatmul.mubr.f32.gmra.mxu0 %v10501_v38  ;;  %v1417_v10 = vadd.f32 %v8275_v49, %v10492_v32  ;;  %v3782_v32 = vld [vmem:[#allocation10 + $0x48] sm:$0xff] }
 0x1b0   : > { %8756 = vmatprep.mubr.f32.mxu0 %v10503_v39  ;;  %v10674_v0 = vpop.f32.mrf.mxu0  ;;  %8786 = vmatprep.subr.mxu1 %v3782_v32 }
 0x1b1   : > { %v8355_v19 = vpop.f32.mrf.mxu1  ;;  %8787 = vmatpush3.msra.mxu1 %v3782_v32 }
 0x1b2   : > { %v10676_v20 = vadd.f32 %v8355_v19, %v1417_v10  ;;  %v8278_v5 = vpop.f32.mrf.mxu0  ;;  %v4062_v10 = vld [vmem:[#allocation10 + $0x1f8] sm:$0xff] }
 0x1b3   : > { %v10678_v58 = vpop.f32.mrf.mxu1  ;;  %8757 = vmatmul.mubr.f32.gmra.mxu0 %v10515_v6  ;;  %v1419_v50 = vadd.f32 %v8278_v5, %v10506_v60  ;;  %v3781_v60 = vld [vmem:[#allocation10 + $0x40] sm:$0xff]  ;;  %8854 = vmatprep.subr.mxu0 %v4062_v10 }
 0x1b4   : > { %8759 = vmatprep.mubr.f32.mxu0 %v10517_v7  ;;  %v10683_v34 = vpop.f32.mrf.mxu0  ;;  %8788 = vmatprep.subr.mxu1 %v3781_v60 }
 0x1b5   : > { %v8358_v38 = vpop.f32.mrf.mxu1  ;;  %8789 = vmatpush3.msra.mxu1 %v3781_v60  ;;  %8855 = vmatpush3.msra.mxu0 %v4062_v10  ;;  %v4059_v60 = vld [vmem:[#allocation10 + $0x1e0] sm:$0xff] }
 0x1b6   : > { %v10685_v39 = vadd.f32 %v8358_v38, %v1419_v50  ;;  %v8281_v11 = vpop.f32.mrf.mxu0  ;;  %v2546_v50 = vld [vmem:[#allocation2 + $0x19a] sm:$0xff]  ;;  %8856 = vmatprep.subr.mxu0 %v4061_v43 }
 0x1b7   : > { %v10687_v18 = vpop.f32.mrf.mxu1  ;;  %8760 = vmatmul.mubr.f32.gmra.mxu0 %v10529_v24  ;;  %v1421_v30 = vadd.f32 %v8281_v11, %v10520_v41  ;;  %v3780_v41 = vld [vmem:[#allocation10 + $0x38] sm:$0xff] }
 0x1b8   : > { %8762 = vmatprep.mubr.f32.mxu0 %v10531_v2  ;;  %v10692_v23 = vpop.f32.mrf.mxu0  ;;  %8790 = vmatprep.subr.mxu1 %v3780_v41 }
 0x1b9   : > { %v8361_v6 = vpop.f32.mrf.mxu1  ;;  %8791 = vmatpush3.msra.mxu1 %v3780_v41  ;;  %8857 = vmatpush3.msra.mxu0 %v4061_v43 }
 0x1ba   : > { %v10694_v7 = vadd.f32 %v8361_v6, %v1421_v30  ;;  %v8284_v33 = vpop.f32.mrf.mxu0  ;;  %v2547_v30 = vld [vmem:[#allocation2 + $0x1a2] sm:$0xff] }
 0x1bb   : > { %v10696_v42 = vpop.f32.mrf.mxu1  ;;  %8763 = vmatmul.mubr.f32.gmra.mxu0 %v10543_v54  ;;  %v1423_v53 = vadd.f32 %v8284_v33, %v10534_v25  ;;  %v3778_v6 = vld [vmem:[#allocation10 + $0x28] sm:$0xff] }
 0x1bc   : > { %8765 = vmatprep.mubr.f32.mxu0 %v10545_v56  ;;  %v10701_v57 = vpop.f32.mrf.mxu0  ;;  %v3779_v56 = vld [vmem:[#allocation10 + $0x30] sm:$0xff] }
 0x1bd   : > { %v8364_v24 = vpop.f32.mrf.mxu1  ;;  %8792 = vmatprep.subr.mxu1 %v3779_v56 }
 0x1be   : > { %v10703_v2 = vadd.f32 %v8364_v24, %v1423_v53  ;;  %v8287_v19 = vpop.f32.mrf.mxu0  ;;  %8793 = vmatpush3.msra.mxu1 %v3779_v56 }
 0x1bf   : > { %v10705_v49 = vpop.f32.mrf.mxu1  ;;  %8766 = vmatmul.mubr.f32.gmra.mxu0 %v10557_v40  ;;  %v1425_v54 = vadd.f32 %v8287_v19, %v10548_v3  ;;  %v4060_v40 = vld [vmem:[#allocation10 + $0x1e8] sm:$0xff]  ;;  %8794 = vmatprep.subr.mxu1 %v3778_v6  ;;  %v3777_v19 = vld [vmem:[#allocation10 + $0x20] sm:$0xff] }
 0x1c0   : > { %12608 = vst [vmem:[#allocation30_spill] sm:$0xff] %v10705_v49  ;;  %8768 = vmatprep.mubr.f32.mxu0 %v10559_v59  ;;  %v10710_v5 = vpop.f32.mrf.mxu0  ;;  %8858 = vmatprep.subr.mxu0 %v4060_v40 }
 0x1c1   : > { %v8367_v25 = vpop.f32.mrf.mxu1  ;;  %8859 = vmatpush3.msra.mxu0 %v4060_v40  ;;  %8795 = vmatpush3.msra.mxu1 %v3778_v6  ;;  %v4054_v6 = vld [vmem:[#allocation10 + $0x1b8] sm:$0xff] }
 0x1c2   : > { %v10712_v38 = vadd.f32 %v8367_v25, %v1425_v54  ;;  %v8290_v11 = vpop.f32.mrf.mxu0  ;;  %8860 = vmatprep.subr.mxu0 %v4059_v60  ;;  %v4057_v54 = vld [vmem:[#allocation10 + $0x1d0] sm:$0xff]  ;;  %8796 = vmatprep.subr.mxu1 %v3777_v19 }
 0x1c3   : > { %v10714_v32 = vpop.f32.mrf.mxu1  ;;  %8769 = vmatmul.mubr.f32.gmra.mxu0 %v10571_v22  ;;  %v1427_v59 = vadd.f32 %v8290_v11, %v10562_v12  ;;  %v4058_v22 = vld [vmem:[#allocation10 + $0x1d8] sm:$0xff]  ;;  %8797 = vmatpush3.msra.mxu1 %v3777_v19 }
 0x1c4   : > { %12609 = vst [vmem:[#allocation31_spill] sm:$0xff] %v10714_v32  ;;  %8771 = vmatprep.mubr.f32.mxu0 %v2546_v50  ;;  %v10718_v33 = vpop.f32.mrf.mxu0  ;;  %8861 = vmatpush3.msra.mxu0 %v4059_v60  ;;  %v4056_v50 = vld [vmem:[#allocation10 + $0x1c8] sm:$0xff] }
 0x1c5   : > { %v8370_v3 = vpop.f32.mrf.mxu1  ;;  %12610 = vst [vmem:[#allocation32_spill] sm:$0xff] %v10718_v33  ;;  %8862 = vmatprep.subr.mxu0 %v4058_v22  ;;  %v4048_v32 = vld [vmem:[#allocation10 + $0x188] sm:$0xff] }
 0x1c6   : > { %v10720_v53 = vadd.f32 %v8370_v3, %v1427_v59  ;;  %8863 = vmatpush3.msra.mxu0 %v4058_v22  ;;  %v4055_v59 = vld [vmem:[#allocation10 + $0x1c0] sm:$0xff] }
 0x1c7   : > { %v10722_v24 = vpop.f32.mrf.mxu1  ;;  %v8293_v41 = vpop.f32.mrf.mxu0  ;;  %8772 = vmatmul.mubr.f32.gmra.mxu0 %v2547_v30  ;;  %8864 = vmatprep.subr.mxu0 %v4057_v54 }
 0x1c8   : > { %12611 = vst [vmem:[#allocation33_spill] sm:$0xff] %v10722_v24  ;;  %v1429_v12 = vadd.f32 %v8293_v41, %v10574_v35  ;;  %8865 = vmatpush3.msra.mxu0 %v4057_v54  ;;  %v3775_v54 = vld [vmem:[#allocation10 + $0x10] sm:$0xff] }
 0x1c9   : > { %v8373_v10 = vpop.f32.mrf.mxu1  ;;  %v10725_v25 = vpop.f32.mrf.mxu0  ;;  %8866 = vmatprep.subr.mxu0 %v4056_v50 }
 0x1ca   : > { %12612 = vst [vmem:[#allocation34_spill] sm:$0xff] %v10725_v25  ;;  %v10727_v56 = vadd.f32 %v8373_v10, %v1429_v12  ;;  %8867 = vmatpush3.msra.mxu0 %v4056_v50  ;;  %v4053_v12 = vld [vmem:[#allocation10 + $0x1b0] sm:$0xff]  ;;  %v4052_v50 = vld [vmem:[#allocation10 + $0x1a8] sm:$0xff]  ;;  %v4050_v25 = vld [vmem:[#allocation10 + $0x198] sm:$0xff] }
 0x1cb   : > { %v10729_v43 = vpop.f32.mrf.mxu1  ;;  %v8408_v40 = vpop.f32.mrf.mxu0  ;;  %8868 = vmatprep.subr.mxu0 %v4055_v59 }
 0x1cc   : > { %12613 = vst [vmem:[#allocation35_spill] sm:$0xff] %v10729_v43  ;;  %v10732_v11 = vadd.f32 %v8408_v40, %v10588_v51  ;;  %8869 = vmatpush3.msra.mxu0 %v4055_v59  ;;  %v3776_v51 = vld [vmem:[#allocation10 + $0x18] sm:$0xff] }
 0x1cd   : > { %v10734_v35 = vpop.f32.mrf.mxu1  ;;  %v10736_v3 = vpop.f32.mrf.mxu0  ;;  %8870 = vmatprep.subr.mxu0 %v4054_v6  ;;  %8798 = vmatprep.subr.mxu1 %v3776_v51 }
 0x1ce   : > { %8871 = vmatpush3.msra.mxu0 %v4054_v6  ;;  %8799 = vmatpush3.msra.mxu1 %v3776_v51  ;;  %v3774_v6 = vld [vmem:[#allocation10 + $0x8] sm:$0xff] }
 0x1cf   : > { %v10738_v30 = vpop.f32.mrf.mxu1  ;;  %v8411_v60 = vpop.f32.mrf.mxu0  ;;  %8872 = vmatprep.subr.mxu0 %v4053_v12  ;;  %8800 = vmatprep.subr.mxu1 %v3775_v54 }
 0x1d0   : > { %v10741_v22 = vadd.f32 %v8411_v60, %v10598_v13  ;;  %8873 = vmatpush3.msra.mxu0 %v4053_v12  ;;  %8801 = vmatpush3.msra.mxu1 %v3775_v54  ;;  %v4051_v60 = vld [vmem:[#allocation10 + $0x1a0] sm:$0xff] }
 0x1d1   : > { %v10743_v41 = vpop.f32.mrf.mxu1  ;;  %v10745_v10 = vpop.f32.mrf.mxu0  ;;  %8874 = vmatprep.subr.mxu0 %v4052_v50  ;;  %8802 = vmatprep.subr.mxu1 %v3774_v6  ;;  %v3773_v12 = vld [vmem:[#allocation10] sm:$0xff] }
 0x1d2   : > { %8875 = vmatpush3.msra.mxu0 %v4052_v50  ;;  %8803 = vmatpush3.msra.mxu1 %v3774_v6  ;;  %v4049_v50 = vld [vmem:[#allocation10 + $0x190] sm:$0xff] }
 0x1d3   : > { %v10747_v19 = vpop.f32.mrf.mxu1  ;;  %v8414_v40 = vpop.f32.mrf.mxu0  ;;  %8876 = vmatprep.subr.mxu0 %v4051_v60  ;;  %8804 = vmatprep.subr.mxu1 %v3773_v12 }
 0x1d4   : > { %v10750_v13 = vadd.f32 %v8414_v40, %v10608_v55  ;;  %8877 = vmatpush3.msra.mxu0 %v4051_v60  ;;  %v3737_v55 = vld [vmem:[#allocation3] sm:$0xff]  ;;  %8805 = vmatpush3.msra.mxu1 %v3773_v12  ;;  %v9567_v60 = vld [vmem:[#allocation2 + $0x8] sm:$0xff] }
 0x1d5   : > { %v10752_v59 = vpop.f32.mrf.mxu1  ;;  %v10754_v43 = vpop.f32.mrf.mxu0  ;;  %8878 = vmatprep.subr.mxu0 %v4050_v25  ;;  %8806 = vmatprep.mubr.f32.mxu1 %v3737_v55 }
 0x1d6   : > { %8879 = vmatpush3.msra.mxu0 %v4050_v25  ;;  %8807 = vmatmul.mubr.f32.vlgmr.msra.gmra.mxu1 %v9567_v60  ;;  %v4047_v25 = vld [vmem:[#allocation10 + $0x180] sm:$0xff] }
 0x1d7   : > { %v10756_v51 = vpop.f32.mrf.mxu1  ;;  %v8417_v24 = vpop.f32.mrf.mxu0  ;;  %8880 = vmatprep.subr.mxu0 %v4049_v50 }
 0x1d8   : > { %v10759_v40 = vadd.f32 %v8417_v24, %v10618_v17  ;;  %8881 = vmatpush3.msra.mxu0 %v4049_v50 }
 0x1d9   : > { %v10761_v54 = vpop.f32.mrf.mxu1  ;;  %v10763_v33 = vpop.f32.mrf.mxu0  ;;  %8882 = vmatprep.subr.mxu0 %v4048_v32 }
 0x1da   : > { %12614 = vst [vmem:[#allocation36_spill] sm:$0xff] %v10759_v40  ;;  %12615 = vst [vmem:[#allocation37_spill] sm:$0xff] %v10761_v54  ;;  %8883 = vmatpush3.msra.mxu0 %v4048_v32  ;;  %v12715_v40 = vld [vmem:[#allocation27_spill] sm:$0xff] }
 0x1db   : > { %v10765_v6 = vpop.f32.mrf.mxu1  ;;  %v8420_v49 = vpop.f32.mrf.mxu0  ;;  %8884 = vmatprep.subr.mxu0 %v4047_v25 }
 0x1dc   : > { %12616 = vst [vmem:[#allocation38_spill] sm:$0xff] %v10765_v6  ;;  %v10768_v17 = vadd.f32 %v8420_v49, %v10628_v29  ;;  %8885 = vmatpush3.msra.mxu0 %v4047_v25 }
 0x1dd   : > { %v10770_v24 = vpop.f32.mrf.mxu1  ;;  %v10772_v12 = vpop.f32.mrf.mxu0 }
 0x1de   : > { %12617 = vst [vmem:[#allocation39_spill] sm:$0xff] %v10768_v17  ;;  %12618 = vst [vmem:[#allocation40_spill] sm:$0xff] %v10770_v24  ;;  %v4400_v17 = vld [vmem:[#allocation10 + $0x378] sm:$0xff] }
 0x1df   : > { %12619 = vst [vmem:[#allocation41_spill] sm:$0xff] %v10772_v12  ;;  %v10774_v55 = vpop.f32.mrf.mxu1  ;;  %v8423_v6 = vpop.f32.mrf.mxu0  ;;  %8934 = vmatprep.subr.mxu1 %v4400_v17 }
 0x1e0   : > { %12620 = vst [vmem:[#allocation42_spill] sm:$0xff] %v10774_v55  ;;  %v10777_v60 = vadd.f32 %v8423_v6, %v10638_v45  ;;  %8935 = vmatpush3.msra.mxu1 %v4400_v17  ;;  %v4398_v17 = vld [vmem:[#allocation10 + $0x368] sm:$0xff] }
 0x1e1   : > { %v10779_v50 = vpop.f32.mrf.mxu1  ;;  %v10781_v54 = vpop.f32.mrf.mxu0 }
 0x1e2   : > { %12621 = vst [vmem:[#allocation43_spill] sm:$0xff] %v10777_v60  ;;  %12622 = vst [vmem:[#allocation44_spill] sm:$0xff] %v10779_v50 }
 0x1e3   : > { %12623 = vst [vmem:[#allocation45_spill] sm:$0xff] %v10781_v54  ;;  %v10783_v29 = vpop.f32.mrf.mxu1  ;;  %v8426_v49 = vpop.f32.mrf.mxu0 }
 0x1e4   : > { %12624 = vst [vmem:[#allocation46_spill] sm:$0xff] %v10783_v29  ;;  %v10786_v32 = vadd.f32 %v8426_v49, %v10648_v4  ;;  %v4399_v29 = vld [vmem:[#allocation10 + $0x370] sm:$0xff] }
 0x1e5   : > { %v10788_v24 = vpop.f32.mrf.mxu1  ;;  %v10790_v12 = vpop.f32.mrf.mxu0  ;;  %8936 = vmatprep.subr.mxu1 %v4399_v29 }
 0x1e6   : > { %12625 = vst [vmem:[#allocation47_spill] sm:$0xff] %v10786_v32  ;;  %12626 = vst [vmem:[#allocation48_spill] sm:$0xff] %v10788_v24  ;;  %8937 = vmatpush3.msra.mxu1 %v4399_v29  ;;  %v4397_v29 = vld [vmem:[#allocation10 + $0x360] sm:$0xff] }
 0x1e7   : > { %12627 = vst [vmem:[#allocation49_spill] sm:$0xff] %v10790_v12  ;;  %v10792_v25 = vpop.f32.mrf.mxu1  ;;  %v8429_v45 = vpop.f32.mrf.mxu0  ;;  %8938 = vmatprep.subr.mxu1 %v4398_v17 }
 0x1e8   : > { %12628 = vst [vmem:[#allocation50_spill] sm:$0xff] %v10792_v25  ;;  %v10795_v6 = vadd.f32 %v8429_v45, %v10658_v27  ;;  %8939 = vmatpush3.msra.mxu1 %v4398_v17  ;;  %v4396_v17 = vld [vmem:[#allocation10 + $0x358] sm:$0xff] }
 0x1e9   : > { %v10797_v50 = vpop.f32.mrf.mxu1  ;;  %v10799_v60 = vpop.f32.mrf.mxu0  ;;  %8940 = vmatprep.subr.mxu1 %v4397_v29 }
 0x1ea   : > { %12629 = vst [vmem:[#allocation51_spill] sm:$0xff] %v10795_v6  ;;  %12630 = vst [vmem:[#allocation52_spill] sm:$0xff] %v10797_v50  ;;  %8941 = vmatpush3.msra.mxu1 %v4397_v29  ;;  %v4395_v29 = vld [vmem:[#allocation10 + $0x350] sm:$0xff] }
 0x1eb   : > { %12631 = vst [vmem:[#allocation53_spill] sm:$0xff] %v10799_v60  ;;  %v10801_v4 = vpop.f32.mrf.mxu1  ;;  %v8432_v49 = vpop.f32.mrf.mxu0  ;;  %8942 = vmatprep.subr.mxu1 %v4396_v17 }
 0x1ec   : > { %12632 = vst [vmem:[#allocation54_spill] sm:$0xff] %v10801_v4  ;;  %v10804_v24 = vadd.f32 %v8432_v49, %v10667_v48  ;;  %8943 = vmatpush3.msra.mxu1 %v4396_v17  ;;  %v4394_v17 = vld [vmem:[#allocation10 + $0x348] sm:$0xff] }
 0x1ed   : > { %v10806_v32 = vpop.f32.mrf.mxu1  ;;  %v10808_v25 = vpop.f32.mrf.mxu0  ;;  %8944 = vmatprep.subr.mxu1 %v4395_v29 }
 0x1ee   : > { %12633 = vst [vmem:[#allocation55_spill] sm:$0xff] %v10804_v24  ;;  %12634 = vst [vmem:[#allocation56_spill] sm:$0xff] %v10806_v32  ;;  %8945 = vmatpush3.msra.mxu1 %v4395_v29 }
 0x1ef   : > { %12635 = vst [vmem:[#allocation57_spill] sm:$0xff] %v10808_v25  ;;  %v10810_v27 = vpop.f32.mrf.mxu1  ;;  %v8435_v45 = vpop.f32.mrf.mxu0  ;;  %8946 = vmatprep.subr.mxu1 %v4394_v17 }
 0x1f0   : > { %12636 = vst [vmem:[#allocation58_spill] sm:$0xff] %v10810_v27  ;;  %v10813_v50 = vadd.f32 %v8435_v45, %v10676_v20  ;;  %8947 = vmatpush3.msra.mxu1 %v4394_v17 }
 0x1f1   : > { %v10815_v6 = vpop.f32.mrf.mxu1  ;;  %v10817_v4 = vpop.f32.mrf.mxu0 }
 0x1f2   : > { %12637 = vst [vmem:[#allocation59_spill] sm:$0xff] %v10813_v50  ;;  %12638 = vst [vmem:[#allocation60_spill] sm:$0xff] %v10815_v6 }
 0x1f3   : > { %12639 = vst [vmem:[#allocation61_spill] sm:$0xff] %v10817_v4  ;;  %v10819_v48 = vpop.f32.mrf.mxu1  ;;  %v8438_v49 = vpop.f32.mrf.mxu0 }
 0x1f4   : > { %12640 = vst [vmem:[#allocation62_spill] sm:$0xff] %v10819_v48  ;;  %v10822_v32 = vadd.f32 %v8438_v49, %v10685_v39 }
 0x1f5   : > { %v10824_v24 = vpop.f32.mrf.mxu1  ;;  %v10826_v27 = vpop.f32.mrf.mxu0 }
 0x1f6   : > { %12641 = vst [vmem:[#allocation63_spill] sm:$0xff] %v10822_v32  ;;  %12642 = vst [vmem:[#allocation64_spill] sm:$0xff] %v10824_v24 }
 0x1f7   : > { %12643 = vst [vmem:[#allocation65_spill] sm:$0xff] %v10826_v27  ;;  %v10828_v20 = vpop.f32.mrf.mxu1  ;;  %v8441_v45 = vpop.f32.mrf.mxu0  ;;  %v4385_v27 = vld [vmem:[#allocation10 + $0x300] sm:$0xff] }
 0x1f8   : > { %12644 = vst [vmem:[#allocation66_spill] sm:$0xff] %v10828_v20  ;;  %v10831_v6 = vadd.f32 %v8441_v45, %v10694_v7  ;;  %v10848_v45 = vld [vmem:[#allocation10 + $0xf8] sm:$0xff] }
 0x1f9   : > { %v10833_v50 = vpop.f32.mrf.mxu1  ;;  %v10835_v48 = vpop.f32.mrf.mxu0  ;;  %12653 = vst [vmem:[#allocation75_spill] sm:$0xff] %v10848_v45  ;;  %9014 = vmatprep.subr.mxu0 %v10848_v45  ;;  %v5112_v45 = vld [vmem:[#allocation10 + $0x278] sm:$0xff] }
 0x1fa   : > { %12645 = vst [vmem:[#allocation67_spill] sm:$0xff] %v10831_v6  ;;  %12646 = vst [vmem:[#allocation68_spill] sm:$0xff] %v10833_v50 }
 0x1fb   : > { %12647 = vst [vmem:[#allocation69_spill] sm:$0xff] %v10835_v48  ;;  %v10837_v39 = vpop.f32.mrf.mxu1  ;;  %v8444_v49 = vpop.f32.mrf.mxu0 }
 0x1fc   : > { %12648 = vst [vmem:[#allocation70_spill] sm:$0xff] %v10837_v39  ;;  %v10840_v24 = vadd.f32 %v8444_v49, %v10703_v2  ;;  %v4393_v2 = vld [vmem:[#allocation10 + $0x340] sm:$0xff] }
 0x1fd   : > { %v10842_v32 = vpop.f32.mrf.mxu1  ;;  %v10844_v20 = vpop.f32.mrf.mxu0  ;;  %8948 = vmatprep.subr.mxu1 %v4393_v2 }
 0x1fe   : > { %12649 = vst [vmem:[#allocation71_spill] sm:$0xff] %v10840_v24  ;;  %12650 = vst [vmem:[#allocation72_spill] sm:$0xff] %v10842_v32  ;;  %8949 = vmatpush3.msra.mxu1 %v4393_v2  ;;  %v4391_v2 = vld [vmem:[#allocation10 + $0x330] sm:$0xff] }
 0x1ff   : > { %12651 = vst [vmem:[#allocation73_spill] sm:$0xff] %v10844_v20  ;;  %v10846_v7 = vpop.f32.mrf.mxu1  ;;  %v8447_v50 = vpop.f32.mrf.mxu0  ;;  %v4392_v20 = vld [vmem:[#allocation10 + $0x338] sm:$0xff] }
 0x200   : > { %12652 = vst [vmem:[#allocation74_spill] sm:$0xff] %v10846_v7  ;;  %v10852_v29 = vadd.f32 %v8447_v50, %v10712_v38  ;;  %8950 = vmatprep.subr.mxu1 %v4392_v20 }
 0x201   : > { %v10854_v39 = vpop.f32.mrf.mxu1  ;;  %v10856_v49 = vpop.f32.mrf.mxu0  ;;  %8951 = vmatpush3.msra.mxu1 %v4392_v20 }
 0x202   : > { %12654 = vst [vmem:[#allocation76_spill] sm:$0xff] %v10852_v29  ;;  %12655 = vst [vmem:[#allocation77_spill] sm:$0xff] %v10854_v39  ;;  %8952 = vmatprep.subr.mxu1 %v4391_v2 }
 0x203   : > { %12656 = vst [vmem:[#allocation78_spill] sm:$0xff] %v10856_v49  ;;  %v10858_v32 = vpop.f32.mrf.mxu1  ;;  %v8450_v24 = vpop.f32.mrf.mxu0  ;;  %8953 = vmatpush3.msra.mxu1 %v4391_v2  ;;  %v4388_v2 = vld [vmem:[#allocation10 + $0x318] sm:$0xff]  ;;  %v4386_v49 = vld [vmem:[#allocation10 + $0x308] sm:$0xff] }
 0x204   : > { %12657 = vst [vmem:[#allocation79_spill] sm:$0xff] %v10858_v32  ;;  %v10861_v17 = vadd.f32 %v8450_v24, %v10720_v53 }
 0x205   : > { %v10863_v7 = vpop.f32.mrf.mxu1  ;;  %v10865_v6 = vpop.f32.mrf.mxu0 }
 0x206   : > { %12658 = vst [vmem:[#allocation80_spill] sm:$0xff] %v10861_v17  ;;  %12659 = vst [vmem:[#allocation81_spill] sm:$0xff] %v10863_v7  ;;  %v4390_v17 = vld [vmem:[#allocation10 + $0x328] sm:$0xff] }
 0x207   : > { %12660 = vst [vmem:[#allocation82_spill] sm:$0xff] %v10865_v6  ;;  %v10867_v38 = vpop.f32.mrf.mxu1  ;;  %v8453_v50 = vpop.f32.mrf.mxu0  ;;  %8954 = vmatprep.subr.mxu1 %v4390_v17 }
 0x208   : > { %12661 = vst [vmem:[#allocation83_spill] sm:$0xff] %v10867_v38  ;;  %v10870_v39 = vadd.f32 %v8453_v50, %v10727_v56  ;;  %8955 = vmatpush3.msra.mxu1 %v4390_v17 }
 0x209   : > { %v10872_v29 = vpop.f32.mrf.mxu1  ;;  %v10874_v32 = vpop.f32.mrf.mxu0 }
 0x20a   : > { %12662 = vst [vmem:[#allocation84_spill] sm:$0xff] %v10870_v39  ;;  %12663 = vst [vmem:[#allocation85_spill] sm:$0xff] %v10872_v29  ;;  %v4389_v29 = vld [vmem:[#allocation10 + $0x320] sm:$0xff] }
 0x20b   : > { %12664 = vst [vmem:[#allocation86_spill] sm:$0xff] %v10874_v32  ;;  %v10876_v53 = vpop.f32.mrf.mxu1  ;;  %v10878_v24 = vpop.f32.mrf.mxu0  ;;  %8956 = vmatprep.subr.mxu1 %v4389_v29 }
 0x20c   : > { %12665 = vst [vmem:[#allocation87_spill] sm:$0xff] %v10876_v53  ;;  %8957 = vmatpush3.msra.mxu1 %v4389_v29  ;;  %v4387_v53 = vld [vmem:[#allocation10 + $0x310] sm:$0xff] }
 0x20d   : > { %v10880_v7 = vpop.f32.mrf.mxu1  ;;  %v10882_v38 = vpop.f32.mrf.mxu0  ;;  %8958 = vmatprep.subr.mxu1 %v4388_v2 }
 0x20e   : > { %8959 = vmatpush3.msra.mxu1 %v4388_v2 }
 0x20f   : > { %v10884_v20 = vpop.f32.mrf.mxu1  ;;  %v10886_v56 = vpop.f32.mrf.mxu0  ;;  %8960 = vmatprep.subr.mxu1 %v4387_v53 }
 0x210   : > { %8961 = vmatpush3.msra.mxu1 %v4387_v53 }
 0x211   : > { %v10888_v50 = vpop.f32.mrf.mxu1  ;;  %v10890_v39 = vpop.f32.mrf.mxu0  ;;  %8962 = vmatprep.subr.mxu1 %v4386_v49 }
 0x212   : > { %12666 = vst [vmem:[#allocation88_spill] sm:$0xff] %v10888_v50  ;;  %8963 = vmatpush3.msra.mxu1 %v4386_v49  ;;  %v12717_v50 = vld [vmem:[#allocation29_spill] sm:$0xff] }
 0x213   : > { %v10892_v32 = vpop.f32.mrf.mxu0  ;;  %v10894_v6 = vpop.f32.mrf.mxu1  ;;  %8964 = vmatprep.subr.mxu1 %v4385_v27 }
 0x214   : > { %12667 = vst [vmem:[#allocation89_spill] sm:$0xff] %v10894_v6  ;;  %8965 = vmatpush3.msra.mxu1 %v4385_v27  ;;  %v12708_v6 = vld [vmem:[#allocation20_spill] sm:$0xff] }
 0x215   : > { %v10896_v48 = vpop.f32.mrf.mxu0  ;;  %v10900_v4 = vpop.f32.mrf.mxu1  ;;  %9094 = vmatprep.subr.mxu1 %v5112_v45 }
 0x216   : > { %12668 = vst [vmem:[#allocation90_spill] sm:$0xff] %v10896_v48  ;;  %12670 = vst [vmem:[#allocation92_spill] sm:$0xff] %v10900_v4  ;;  %v12707_v4 = vld [vmem:[#allocation19_spill] sm:$0xff]  ;;  %v12709_v48 = vld [vmem:[#allocation21_spill] sm:$0xff] }
 0x217   : > { %v10898_v17 = vpop.f32.mrf.mxu0  ;;  %v10906_v2 = vpop.f32.mrf.mxu1 }
 0x218   : > { %12669 = vst [vmem:[#allocation91_spill] sm:$0xff] %v10898_v17  ;;  %12673 = vst [vmem:[#allocation95_spill] sm:$0xff] %v10906_v2 }
 0x219   : > { %v10902_v29 = vpop.f32.mrf.mxu0  ;;  %v10912_v12 = vpop.f32.mrf.mxu1 }
 0x21a   : > { %12671 = vst [vmem:[#allocation93_spill] sm:$0xff] %v10902_v29  ;;  %12676 = vst [vmem:[#allocation98_spill] sm:$0xff] %v10912_v12 }
 0x21b   : > { %v10904_v25 = vpop.f32.mrf.mxu0  ;;  %v10918_v49 = vpop.f32.mrf.mxu1 }
 0x21c   : > { %12672 = vst [vmem:[#allocation94_spill] sm:$0xff] %v10904_v25  ;;  %12679 = vst [vmem:[#allocation101_spill] sm:$0xff] %v10918_v49 }
 0x21d   : > { %v10908_v60 = vpop.f32.mrf.mxu0  ;;  %v10924_v25 = vpop.f32.mrf.mxu1 }
 0x21e   : > { %12674 = vst [vmem:[#allocation96_spill] sm:$0xff] %v10908_v60  ;;  %12682 = vst [vmem:[#allocation104_spill] sm:$0xff] %v10924_v25 }
 0x21f   : > { %v10910_v53 = vpop.f32.mrf.mxu0  ;;  %v10930_v60 = vpop.f32.mrf.mxu1 }
 0x220   : > { %12675 = vst [vmem:[#allocation97_spill] sm:$0xff] %v10910_v53  ;;  %12685 = vst [vmem:[#allocation107_spill] sm:$0xff] %v10930_v60 }
 0x221   : > { %v10914_v54 = vpop.f32.mrf.mxu0 }
 0x222   : > { %12677 = vst [vmem:[#allocation99_spill] sm:$0xff] %v10914_v54  ;;  %v10936_v54 = vpop.f32.mrf.mxu1 }
 0x223   : > { %v10916_v55 = vpop.f32.mrf.mxu0  ;;  %12688 = vst [vmem:[#allocation110_spill] sm:$0xff] %v10936_v54 }
 0x224   : > { %12678 = vst [vmem:[#allocation100_spill] sm:$0xff] %v10916_v55 }
 0x225   : > { %v10920_v29 = vpop.f32.mrf.mxu0 }
 0x226   : > { %12680 = vst [vmem:[#allocation102_spill] sm:$0xff] %v10920_v29  ;;  %v10942_v29 = vpop.f32.mrf.mxu1 }
 0x227   : > { %v10922_v27 = vpop.f32.mrf.mxu0  ;;  %12691 = vst [vmem:[#allocation113_spill] sm:$0xff] %v10942_v29  ;;  %v12703_v29 = vld [vmem:[#allocation16_spill] sm:$0xff] }
 0x228   : > { %12681 = vst [vmem:[#allocation103_spill] sm:$0xff] %v10922_v27 }
 0x229   : > { %v10926_v2 = vpop.f32.mrf.mxu0 }
 0x22a   : > { %12683 = vst [vmem:[#allocation105_spill] sm:$0xff] %v10926_v2  ;;  %v10948_v2 = vpop.f32.mrf.mxu1 }
 0x22b   : > { %v10928_v45 = vpop.f32.mrf.mxu0  ;;  %12694 = vst [vmem:[#allocation116_spill] sm:$0xff] %v10948_v2  ;;  %v12702_v2 = vld [vmem:[#allocation15_spill] sm:$0xff] }
 0x22c   : > { %12684 = vst [vmem:[#allocation106_spill] sm:$0xff] %v10928_v45 }
 0x22d   : > { %v10932_v53 = vpop.f32.mrf.mxu0 }
 0x22e   : > { %12686 = vst [vmem:[#allocation108_spill] sm:$0xff] %v10932_v53  ;;  %v10954_v53 = vpop.f32.mrf.mxu1 }
 0x22f   : > { %v10934_v12 = vpop.f32.mrf.mxu0  ;;  %12697 = vst [vmem:[#allocation119_spill] sm:$0xff] %v10954_v53 }
 0x230   : > { %12687 = vst [vmem:[#allocation109_spill] sm:$0xff] %v10934_v12 }
 0x231   : > { %v10938_v55 = vpop.f32.mrf.mxu0 }
 0x232   : > { %12689 = vst [vmem:[#allocation111_spill] sm:$0xff] %v10938_v55  ;;  %v10962_v55 = vpop.f32.mrf.mxu1 }
 0x233   : > { %v10940_v49 = vpop.f32.mrf.mxu0  ;;  %12700 = vst [vmem:[#allocation122_spill] sm:$0xff] %v10962_v55  ;;  %v12714_v55 = vld [vmem:[#allocation26_spill] sm:$0xff] }
 0x234   : > { %12690 = vst [vmem:[#allocation112_spill] sm:$0xff] %v10940_v49  ;;  %v1772_v49 = vadd.f32 %v10590_v9, %v10586_v62  ;;  %v1082_v9 = vadd.f32 %v12709_v48, %v12708_v6  ;;  %v1774_v62 = vadd.f32 %v10600_v8, %v10596_v61  ;;  %v1776_v61 = vadd.f32 %v10610_v36, %v10606_v21 }
 0x235   : > { %v10944_v27 = vpop.f32.mrf.mxu0  ;;  %v11010_v21 = vadd.f32 %v10640_v52, %v10636_v1 }
 0x236   : > { %12692 = vst [vmem:[#allocation114_spill] sm:$0xff] %v10944_v27  ;;  %v1420_v1 = vadd.f32 %v10692_v23, %v1082_v9  ;;  %v2114_v52 = vadd.f32 %v10754_v43, %v1776_v61 }
 0x237   : > { %v10946_v25 = vpop.f32.mrf.mxu0 }
 0x238   : > { %12693 = vst [vmem:[#allocation115_spill] sm:$0xff] %v10946_v25  ;;  %v2110_v25 = vadd.f32 %v10736_v3, %v1772_v49  ;;  %v2449_v3 = vadd.f32 %v10734_v35, %v10732_v11  ;;  %v10981_v49 = vpop.f32.mrf.mxu1  ;;  %v2112_v11 = vadd.f32 %v10745_v10, %v1774_v62 }
 0x239   : > { %v10950_v45 = vpop.f32.mrf.mxu0 }
 0x23a   : > { %12695 = vst [vmem:[#allocation117_spill] sm:$0xff] %v10950_v45  ;;  %v1076_v45 = vadd.f32 %v12702_v2, %v10482_v14  ;;  %v12710_v14 = vld [vmem:[#allocation22_spill] sm:$0xff]  ;;  %v12711_v2 = vld [vmem:[#allocation23_spill] sm:$0xff]  ;;  %v2448_v8 = vadd.f32 %v10738_v30, %v2110_v25  ;;  %v2823_v35 = vadd.f32 %v10878_v24, %v2449_v3  ;;  %v2451_v30 = vadd.f32 %v10743_v41, %v10741_v22  ;;  %v12725_v3 = vld [vmem:[#allocation89_spill] sm:$0xff] }
 0x23b   : > { %v10952_v60 = vpop.f32.mrf.mxu0 }
 0x23c   : > { %12696 = vst [vmem:[#allocation118_spill] sm:$0xff] %v10952_v60  ;;  %v12704_v60 = vld [vmem:[#allocation17_spill] sm:$0xff]  ;;  %v3161_v22 = vadd.f32 %v10880_v7, %v2823_v35  ;;  %v2825_v41 = vadd.f32 %v10886_v56, %v2451_v30  ;;  %v12718_v7 = vld [vmem:[#allocation30_spill] sm:$0xff]  ;;  %v12720_v56 = vld [vmem:[#allocation31_spill] sm:$0xff] }
 0x23d   : > { %v10956_v12 = vpop.f32.mrf.mxu0  ;;  %v1078_v17 = vadd.f32 %v12704_v60, %v12703_v29  ;;  %v12712_v60 = vld [vmem:[#allocation24_spill] sm:$0xff]  ;;  %v12713_v29 = vld [vmem:[#allocation25_spill] sm:$0xff] }
 0x23e   : > { %12698 = vst [vmem:[#allocation120_spill] sm:$0xff] %v10956_v12  ;;  %v12706_v12 = vld [vmem:[#allocation18_spill] sm:$0xff] }
 0x23f   : > { %v10958_v54 = vpop.f32.mrf.mxu0 }
 0x240   : > { %12699 = vst [vmem:[#allocation121_spill] sm:$0xff] %v10958_v54  ;;  %v1080_v54 = vadd.f32 %v12707_v4, %v12706_v12  ;;  %v1088_v12 = vadd.f32 %v12715_v40, %v12714_v55  ;;  %v12716_v4 = vld [vmem:[#allocation28_spill] sm:$0xff]  ;;  %v1780_v40 = vadd.f32 %v10630_v26, %v10626_v31  ;;  %v1414_v55 = vadd.f32 %v10665_v37, %v1076_v45  ;;  %v12724_v45 = vld [vmem:[#allocation90_spill] sm:$0xff] }
 0x241   : > { %v10964_v27 = vpop.f32.mrf.mxu0  ;;  %v10991_v6 = vadd.f32 %v12717_v50, %v12716_v4  ;;  %v1416_v50 = vadd.f32 %v10674_v0, %v1078_v17  ;;  %v11020_v31 = vadd.f32 %v10650_v47, %v10646_v46  ;;  %v11024_v26 = vadd.f32 %v10660_v15, %v10656_v28 }
 0x242   : > { %12701 = vst [vmem:[#allocation123_spill] sm:$0xff] %v10964_v27  ;;  %v1084_v27 = vadd.f32 %v12711_v2, %v12710_v14  ;;  %v1778_v14 = vadd.f32 %v10620_v63, %v10616_v16  ;;  %v1418_v36 = vadd.f32 %v10683_v34, %v1080_v54  ;;  %v2822_v16 = vadd.f32 %v10882_v38, %v2448_v8  ;;  %v11016_v63 = vpop.f32.mrf.mxu1  ;;  %v12719_v38 = vld [vmem:[#allocation88_spill] sm:$0xff] }
 0x243   : > { %v10971_v53 = vpop.f32.mrf.mxu0  ;;  %v2450_v34 = vadd.f32 %v10747_v19, %v2112_v11  ;;  %v11035_v46 = vadd.f32 %v10669_v44, %v1414_v55  ;;  %v11038_v47 = vadd.f32 %v10678_v58, %v1416_v50  ;;  %v2453_v15 = vadd.f32 %v10752_v59, %v10750_v13  ;;  %v12726_v11 = vld [vmem:[#allocation38_spill] sm:$0xff]  ;;  %v12728_v55 = vld [vmem:[#allocation92_spill] sm:$0xff] }
 0x244   : > { %12705 = vst [vmem:[#allocation15_spill] sm:$0xff] %v10971_v53  ;;  %v1086_v53 = vadd.f32 %v12713_v29, %v12712_v60  ;;  %v1422_v0 = vadd.f32 %v10701_v57, %v1084_v27  ;;  %v11046_v57 = vld [vmem:[%s12520_s3] ss:$0 sm:$0xff]  ;;  %v11049_v43 = vadd.f32 %v10687_v18, %v1418_v36  ;;  %v3160_v44 = vadd.f32 %v10884_v20, %v2822_v16  ;;  %v11053_v58 = vpop.f32.mrf.mxu1 }
 0x245   : > { %v10993_v48 = vpop.f32.mrf.mxu0  ;;  %v2824_v10 = vadd.f32 %v10890_v39, %v2450_v34  ;;  %v2452_v13 = vadd.f32 %v10756_v51, %v2114_v52  ;;  %v2116_v59 = vadd.f32 %v10763_v33, %v1778_v14  ;;  %v2827_v54 = vadd.f32 %v10892_v32, %v2453_v15  ;;  %v11064_v18 = vld [vmem:[%s12521_s4] ss:$0 sm:$0xff]  ;;  %v12721_v33 = vld [vmem:[#allocation32_spill] sm:$0xff]  ;;  %v12727_v14 = vld [vmem:[#allocation41_spill] sm:$0xff] }
 0x246   : > { %v1424_v28 = vadd.f32 %v10710_v5, %v1086_v53  ;;  %v11056_v5 = vadd.f32 %v10696_v42, %v1420_v1  ;;  %v11067_v39 = vadd.f32 %v12718_v7, %v1422_v0  ;;  %v3163_v24 = vadd.f32 %v12719_v38, %v2825_v41  ;;  %v12722_v32 = vld [vmem:[#allocation36_spill] sm:$0xff]  ;;  %v12723_v53 = vld [vmem:[#allocation37_spill] sm:$0xff]  ;;  %v11079_v29 = vpop.f32.mrf.mxu1  ;;  %v12729_v36 = vld [vmem:[#allocation91_spill] sm:$0xff] }
 0x247   : > { %v11006_v2 = vpop.f32.mrf.mxu0  ;;  %v1426_v17 = vadd.f32 %v12721_v33, %v1088_v12  ;;  %v2455_v27 = vadd.f32 %v12723_v53, %v12722_v32  ;;  %v2826_v9 = vadd.f32 %v12724_v45, %v2452_v13  ;;  %v3162_v60 = vadd.f32 %v12725_v3, %v2824_v10  ;;  %v12732_v15 = vld [vmem:[#allocation40_spill] sm:$0xff]  ;;  %v12734_v10 = vld [vmem:[#allocation93_spill] sm:$0xff]  ;;  %v12737_v33 = vld [vmem:[#allocation98_spill] sm:$0xff] }
 0x248   : > { %v11072_v51 = vadd.f32 %v12720_v56, %v1424_v28  ;;  %v2454_v35 = vadd.f32 %v12726_v11, %v2116_v59  ;;  %v2118_v12 = vadd.f32 %v12727_v14, %v1780_v40  ;;  %v3165_v50 = vadd.f32 %v12728_v55, %v2827_v54  ;;  %v12731_v28 = vld [vmem:[#allocation39_spill] sm:$0xff]  ;;  %v11101_v59 = vpop.f32.mrf.mxu1  ;;  %v12738_v32 = vld [vmem:[#allocation94_spill] sm:$0xff] }
 0x249   : > { %v11028_v37 = vpop.f32.mrf.mxu0  ;;  %v2829_v30 = vadd.f32 %v12729_v36, %v2455_v27  ;;  %v12733_v40 = vld [vmem:[#allocation95_spill] sm:$0xff] }
 0x24a   : > { %v11128_v36 = vpop.f32.mrf.mxu1 }
 0x24b   : > { %v8728_v23 = vpop.f32.mrf.mxu0 }
 0x24c   : > { %v3499_v19 = vadd.f32 %v8728_v23, %v3161_v22  ;;  %v12730_v22 = vld [vmem:[#allocation33_spill] sm:$0xff]  ;;  %v2457_v23 = vadd.f32 %v12732_v15, %v12731_v28 }
 0x24d   : > { %v3307_v25 = vpop.f32.mrf.mxu0  ;;  %v11095_v41 = vadd.f32 %v12730_v22, %v1426_v17  ;;  %v3167_v17 = vadd.f32 %v12737_v33, %v2829_v30  ;;  %v12745_v28 = vld [vmem:[#allocation49_spill] sm:$0xff] }
 0x24e   : > { %v3602_v42 = vmul.f32 %v11046_v57, %v3499_v19  ;;  %v3498_v20 = vadd.f32 %v3307_v25, %v3160_v44  ;;  %v3164_v44 = vadd.f32 %v12733_v40, %v2826_v9  ;;  %v2828_v19 = vadd.f32 %v12734_v10, %v2454_v35  ;;  %v12742_v35 = vld [vmem:[#allocation101_spill] sm:$0xff] }
 0x24f   : > { %v8731_v62 = vpop.f32.mrf.mxu0  ;;  %v2831_v53 = vadd.f32 %v12738_v32, %v2457_v23  ;;  %v2122_v15 = vadd.f32 %v12745_v28, %v11020_v31  ;;  %v12746_v23 = vld [vmem:[#allocation104_spill] sm:$0xff]  ;;  %v12749_v31 = vld [vmem:[#allocation47_spill] sm:$0xff] }
 0x250   : > { %v11082_v4 = vadd.f32 %v11064_v18, %v3602_v42  ;;  %v3601_v61 = vmul.f32 %v11046_v57, %v3498_v20  ;;  %v3501_v8 = vadd.f32 %v8731_v62, %v3163_v24  ;;  %v12735_v24 = vld [vmem:[#allocation42_spill] sm:$0xff]  ;;  %v12736_v20 = vld [vmem:[#allocation45_spill] sm:$0xff]  ;;  %v3166_v14 = vadd.f32 %v12742_v35, %v2828_v19 }
 0x251   : > { %v3317_v16 = vpop.f32.mrf.mxu0  ;;  %v2456_v42 = vadd.f32 %v12735_v24, %v2118_v12  ;;  %v2120_v56 = vadd.f32 %v12736_v20, %v11010_v21  ;;  %v12740_v21 = vld [vmem:[#allocation43_spill] sm:$0xff]  ;;  %v12743_v12 = vld [vmem:[#allocation96_spill] sm:$0xff]  ;;  %v3169_v40 = vadd.f32 %v12746_v23, %v2831_v53 }
 0x252   : > { %v12551_v1 = vmax.f32 %v11082_v4, 0.0  ;;  %v11091_v52 = vadd.f32 %v11064_v18, %v3601_v61  ;;  %v3604_v0 = vmul.f32 %v11046_v57, %v3501_v8  ;;  %v3500_v34 = vadd.f32 %v3317_v16, %v3162_v60  ;;  %v12739_v60 = vld [vmem:[#allocation34_spill] sm:$0xff]  ;;  %v12741_v8 = vld [vmem:[#allocation44_spill] sm:$0xff]  ;;  %v12752_v53 = vld [vmem:[#allocation99_spill] sm:$0xff] }
 0x253   : > { %v8734_v13 = vpop.f32.mrf.mxu0  ;;  %v1428_v61 = vadd.f32 %v12739_v60, %v10991_v6  ;;  %v2459_v11 = vadd.f32 %v12741_v8, %v12740_v21  ;;  %v2830_v55 = vadd.f32 %v12743_v12, %v2456_v42  ;;  %v12748_v42 = vld [vmem:[#allocation35_spill] sm:$0xff] }
 0x254   : > { %3706 = vst [vmem:[#allocation3 + $0x21] sm:$0xff] %v12551_v1  ;;  %v12552_v54 = vmax.f32 %v11091_v52, 0.0  ;;  %v11107_v25 = vadd.f32 %v11064_v18, %v3604_v0  ;;  %v3603_v7 = vmul.f32 %v11046_v57, %v3500_v34  ;;  %v3503_v38 = vadd.f32 %v8734_v13, %v3165_v50  ;;  %v12744_v34 = vld [vmem:[#allocation46_spill] sm:$0xff] }
 0x255   : > { %v3327_v27 = vpop.f32.mrf.mxu0  ;;  %v2458_v22 = vadd.f32 %v12744_v34, %v2120_v56  ;;  %v11150_v20 = vadd.f32 %v12748_v42, %v1428_v61  ;;  %v12750_v56 = vld [vmem:[#allocation48_spill] sm:$0xff] }
 0x256   : > { %3705 = vst [vmem:[#allocation3 + $0x19] sm:$0xff] %v12552_v54  ;;  %v12549_v45 = vmax.f32 %v11107_v25, 0.0  ;;  %v11119_v9 = vadd.f32 %v11064_v18, %v3603_v7  ;;  %v3606_v62 = vmul.f32 %v11046_v57, %v3503_v38  ;;  %v3502_v3 = vadd.f32 %v3327_v27, %v3164_v44  ;;  %v12747_v44 = vld [vmem:[#allocation97_spill] sm:$0xff] }
 0x257   : > { %v8737_v50 = vpop.f32.mrf.mxu0  ;;  %v2833_v10 = vadd.f32 %v12747_v44, %v2459_v11  ;;  %v2461_v33 = vadd.f32 %v12750_v56, %v12749_v31  ;;  %v2832_v27 = vadd.f32 %v12752_v53, %v2458_v22  ;;  %v12753_v11 = vld [vmem:[#allocation50_spill] sm:$0xff] }
 0x258   : > { %3708 = vst [vmem:[#allocation3 + $0x39] sm:$0xff] %v12549_v45  ;;  %v12550_v30 = vmax.f32 %v11119_v9, 0.0  ;;  %v11134_v16 = vadd.f32 %v11064_v18, %v3606_v62  ;;  %v3605_v6 = vmul.f32 %v11046_v57, %v3502_v3  ;;  %v3505_v0 = vadd.f32 %v8737_v50, %v3167_v17  ;;  %v12751_v17 = vld [vmem:[#allocation107_spill] sm:$0xff]  ;;  %v11156_v3 = vpop.f32.mrf.mxu1  ;;  %v12760_v31 = vld [vmem:[#allocation102_spill] sm:$0xff] }
 0x259   : > { %v3337_v19 = vpop.f32.mrf.mxu0  ;;  %v3168_v32 = vadd.f32 %v12751_v17, %v2830_v55  ;;  %v2460_v35 = vadd.f32 %v12753_v11, %v2122_v15  ;;  %v12755_v55 = vld [vmem:[#allocation110_spill] sm:$0xff] }
 0x25a   : > { %3707 = vst [vmem:[#allocation3 + $0x31] sm:$0xff] %v12550_v30  ;;  %v12546_v13 = vmax.f32 %v11134_v16, 0.0  ;;  %v11146_v7 = vadd.f32 %v11064_v18, %v3605_v6  ;;  %v3608_v38 = vmul.f32 %v11046_v57, %v3505_v0  ;;  %v3504_v24 = vadd.f32 %v3337_v19, %v3166_v14  ;;  %v12754_v14 = vld [vmem:[#allocation53_spill] sm:$0xff]  ;;  %v12756_v6 = vld [vmem:[#allocation100_spill] sm:$0xff]  ;;  %v11181_v17 = vpop.f32.mrf.mxu1 }
 0x25b   : > { %v8740_v62 = vpop.f32.mrf.mxu0  ;;  %v2124_v12 = vadd.f32 %v12754_v14, %v11024_v26  ;;  %v3171_v50 = vadd.f32 %v12755_v55, %v2833_v10  ;;  %v2835_v0 = vadd.f32 %v12756_v6, %v2461_v33  ;;  %v4773_v26 = vld [vmem:[#allocation10 + $0xf0] sm:$0xff]  ;;  %v12757_v10 = vld [vmem:[#allocation51_spill] sm:$0xff]  ;;  %v12758_v19 = vld [vmem:[#allocation52_spill] sm:$0xff]  ;;  %v2834_v56 = vadd.f32 %v12760_v31, %v2460_v35 }
 0x25c   : > { %3710 = vst [vmem:[#allocation3 + $0x51] sm:$0xff] %v12546_v13  ;;  %v12548_v60 = vmax.f32 %v11146_v7, 0.0  ;;  %v11162_v21 = vadd.f32 %v11064_v18, %v3608_v38  ;;  %v3607_v61 = vmul.f32 %v11046_v57, %v3504_v24  ;;  %v3507_v8 = vadd.f32 %v8740_v62, %v3169_v40  ;;  %v12759_v24 = vld [vmem:[#allocation113_spill] sm:$0xff]  ;;  %v12764_v55 = vld [vmem:[#allocation116_spill] sm:$0xff]  ;;  %v12768_v31 = vld [vmem:[#allocation119_spill] sm:$0xff] }
 0x25d   : > { %v3347_v34 = vpop.f32.mrf.mxu0  ;;  %v3739_v22 = vld [vmem:[#allocation3 + $0x18] sm:$0xff]  ;;  %v3740_v28 = vld [vmem:[#allocation3 + $0x20] sm:$0xff]  ;;  %v2463_v38 = vadd.f32 %v12758_v19, %v12757_v10  ;;  %v3170_v42 = vadd.f32 %v12759_v24, %v2832_v27  ;;  %v12762_v27 = vld [vmem:[#allocation54_spill] sm:$0xff]  ;;  %v3173_v6 = vadd.f32 %v12764_v55, %v2835_v0 }
 0x25e   : > { %3709 = vst [vmem:[#allocation3 + $0x49] sm:$0xff] %v12548_v60  ;;  %v12544_v23 = vmax.f32 %v11162_v21, 0.0  ;;  %v11174_v44 = vadd.f32 %v11064_v18, %v3607_v61  ;;  %v3610_v15 = vmul.f32 %v11046_v57, %v3507_v8  ;;  %v3506_v40 = vadd.f32 %v3347_v34, %v3168_v32  ;;  %8809 = vmatprep.mubr.f32.mxu1 %v3739_v22  ;;  %v12761_v8 = vld [vmem:[#allocation75_spill] sm:$0xff]  ;;  %v12763_v35 = vld [vmem:[#allocation57_spill] sm:$0xff]  ;;  %v4772_v0 = vld [vmem:[#allocation10 + $0xe8] sm:$0xff] }
 0x25f   : > { %8886 = vmatprep.mubr.f32.mxu0 %v3739_v22  ;;  %v8743_v33 = vpop.f32.mrf.mxu0  ;;  %8810 = vmatmul.mubr.f32.gmra.mxu1 %v3740_v28  ;;  %v2462_v11 = vadd.f32 %v12762_v27, %v2124_v12  ;;  %v2126_v14 = vadd.f32 %v12763_v35, %v11035_v46  ;;  %v12765_v34 = vld [vmem:[#allocation103_spill] sm:$0xff] }
 0x260   : > { %8887 = vmatmul.mubr.f32.vlgmr.msra.gmra.mxu0 %v3740_v28  ;;  %3712 = vst [vmem:[#allocation3 + $0x69] sm:$0xff] %v12544_v23  ;;  %v12545_v32 = vmax.f32 %v11174_v44, 0.0  ;;  %v11187_v53 = vadd.f32 %v11064_v18, %v3610_v15  ;;  %v3609_v62 = vmul.f32 %v11046_v57, %v3506_v40  ;;  %v3509_v61 = vadd.f32 %v8743_v33, %v3171_v50  ;;  %v12766_v40 = vld [vmem:[#allocation55_spill] sm:$0xff] }
 0x261   : > { %9015 = vmatpush3.msra.mxu0 %v12761_v8  ;;  %v2837_v22 = vadd.f32 %v12765_v34, %v2463_v38  ;;  %v3357_v28 = vpop.f32.mrf.mxu0  ;;  %v11196_v10 = vld [vmem:[#allocation3 + $0x30] sm:$0xff]  ;;  %v11198_v19 = vld [vmem:[#allocation3 + $0x38] sm:$0xff]  ;;  %v3172_v33 = vadd.f32 %v12768_v31, %v2834_v56  ;;  %v12769_v8 = vld [vmem:[#allocation105_spill] sm:$0xff] }
 0x262   : > { %9016 = vmatprep.subr.mxu0 %v4773_v26  ;;  %3711 = vst [vmem:[#allocation3 + $0x61] sm:$0xff] %v12545_v32  ;;  %v12547_v50 = vmax.f32 %v11187_v53, 0.0  ;;  %v3648_v12 = vadd.f32 %v11064_v18, %v3609_v62  ;;  %v3612_v15 = vmul.f32 %v11046_v57, %v3509_v61  ;;  %v3508_v46 = vadd.f32 %v3357_v28, %v3170_v42  ;;  %v12767_v38 = vld [vmem:[#allocation56_spill] sm:$0xff]  ;;  %v11213_v62 = vpop.f32.mrf.mxu1  ;;  %v12770_v56 = vld [vmem:[#allocation58_spill] sm:$0xff]  ;;  %v12771_v28 = vld [vmem:[#allocation61_spill] sm:$0xff] }
 0x263   : > { %8812 = vmatprep.mubr.f32.mxu1 %v11196_v10  ;;  %8889 = vmatprep.mubr.f32.mxu0 %v11196_v10  ;;  %v2465_v24 = vadd.f32 %v12767_v38, %v12766_v40  ;;  %v2836_v27 = vadd.f32 %v12769_v8, %v2462_v11  ;;  %v8746_v35 = vpop.f32.mrf.mxu0  ;;  %v2464_v11 = vadd.f32 %v12770_v56, %v2126_v14  ;;  %v12772_v38 = vld [vmem:[#allocation122_spill] sm:$0xff]  ;;  %v12776_v56 = vld [vmem:[#allocation108_spill] sm:$0xff] }
 0x264   : > { %8813 = vmatmul.mubr.f32.gmra.mxu1 %v11198_v19  ;;  %8890 = vmatmul.mubr.f32.gmra.mxu0 %v11198_v19  ;;  %3714 = vst [vmem:[#allocation3 + $0x81] sm:$0xff] %v12547_v50  ;;  %v11217_v42 = vmax.f32 %v3648_v12, 0.0  ;;  %v3651_v61 = vadd.f32 %v11064_v18, %v3612_v15  ;;  %v3611_v55 = vmul.f32 %v11046_v57, %v3508_v46  ;;  %v12773_v8 = vld [vmem:[#allocation106_spill] sm:$0xff]  ;;  %v12775_v46 = vld [vmem:[#allocation60_spill] sm:$0xff] }
 0x265   : > { %v3511_v34 = vadd.f32 %v8746_v35, %v3173_v6  ;;  %9017 = vmatpush3.msra.mxu0 %v4773_v26  ;;  %v2128_v40 = vadd.f32 %v12771_v28, %v11038_v47  ;;  %v3175_v31 = vadd.f32 %v12772_v38, %v2837_v22  ;;  %v2839_v23 = vadd.f32 %v12773_v8, %v2465_v24  ;;  %v3367_v32 = vpop.f32.mrf.mxu0  ;;  %v11226_v13 = vld [vmem:[#allocation3 + $0x48] sm:$0xff]  ;;  %v11228_v12 = vld [vmem:[#allocation3 + $0x50] sm:$0xff] }
 0x266   : > { %9018 = vmatprep.subr.mxu0 %v4772_v0  ;;  %3713 = vst [vmem:[#allocation3 + $0x79] sm:$0xff] %v11217_v42  ;;  %v11231_v15 = vmax.f32 %v3651_v61, 0.0  ;;  %v3650_v26 = vadd.f32 %v11064_v18, %v3611_v55  ;;  %v3510_v6 = vadd.f32 %v3367_v32, %v3172_v33  ;;  %8815 = vmatprep.mubr.f32.mxu1 %v11226_v13  ;;  %v4771_v47 = vld [vmem:[#allocation10 + $0xe0] sm:$0xff]  ;;  %v11243_v61 = vpop.f32.mrf.mxu1 }
 0x267   : > { %v3614_v14 = vmul.f32 %v11046_v57, %v3511_v34  ;;  %8892 = vmatprep.mubr.f32.mxu0 %v11226_v13  ;;  %v12774_v22 = vld [vmem:[#allocation59_spill] sm:$0xff]  ;;  %v3174_v35 = vadd.f32 %v10981_v49, %v2836_v27  ;;  %v2838_v28 = vadd.f32 %v12776_v56, %v2464_v11  ;;  %v8749_v38 = vpop.f32.mrf.mxu0  ;;  %9019 = vmatpush3.msra.mxu0 %v4772_v0  ;;  %v12777_v49 = vld [vmem:[#allocation62_spill] sm:$0xff]  ;;  %v12778_v11 = vld [vmem:[#allocation65_spill] sm:$0xff] }
 0x268   : > { %v2467_v24 = vadd.f32 %v12775_v46, %v12774_v22  ;;  %8816 = vmatmul.mubr.f32.gmra.mxu1 %v11228_v12  ;;  %8893 = vmatmul.mubr.f32.gmra.mxu0 %v11228_v12  ;;  %3716 = vst [vmem:[#allocation3 + $0x99] sm:$0xff] %v11231_v15  ;;  %v11246_v32 = vmax.f32 %v3650_v26, 0.0  ;;  %v3613_v55 = vmul.f32 %v11046_v57, %v3510_v6  ;;  %v12779_v46 = vld [vmem:[#allocation109_spill] sm:$0xff] }
 0x269   : > { %v3653_v33 = vadd.f32 %v11064_v18, %v3614_v14  ;;  %v3513_v34 = vadd.f32 %v8749_v38, %v3175_v31  ;;  %v2466_v27 = vadd.f32 %v12777_v49, %v2128_v40  ;;  %v2130_v8 = vadd.f32 %v12778_v11, %v11049_v43  ;;  %v3377_v50 = vpop.f32.mrf.mxu0  ;;  %v11255_v60 = vld [vmem:[#allocation3 + $0x60] sm:$0xff]  ;;  %v11257_v26 = vld [vmem:[#allocation3 + $0x68] sm:$0xff]  ;;  %9020 = vmatprep.subr.mxu0 %v4771_v47  ;;  %v12780_v43 = vld [vmem:[#allocation63_spill] sm:$0xff] }
 0x26a   : > { %v3177_v22 = vadd.f32 %v11016_v63, %v2839_v23  ;;  %v2841_v56 = vadd.f32 %v12779_v46, %v2467_v24  ;;  %3715 = vst [vmem:[#allocation3 + $0x91] sm:$0xff] %v11246_v32  ;;  %v3652_v0 = vadd.f32 %v11064_v18, %v3613_v55  ;;  %v3512_v31 = vadd.f32 %v3377_v50, %v3174_v35  ;;  %v4770_v63 = vld [vmem:[#allocation10 + $0xd8] sm:$0xff]  ;;  %v12781_v23 = vld [vmem:[#allocation64_spill] sm:$0xff]  ;;  %v12782_v38 = vld [vmem:[#allocation111_spill] sm:$0xff] }
 0x26b   : > { %v11260_v14 = vmax.f32 %v3653_v33, 0.0  ;;  %v3616_v40 = vmul.f32 %v11046_v57, %v3513_v34  ;;  %8818 = vmatprep.mubr.f32.mxu1 %v11255_v60  ;;  %8895 = vmatprep.mubr.f32.mxu0 %v11255_v60  ;;  %v2469_v6 = vadd.f32 %v12781_v23, %v12780_v43  ;;  %v3176_v24 = vadd.f32 %v11053_v58, %v2838_v28  ;;  %v8752_v11 = vpop.f32.mrf.mxu0  ;;  %v11272_v33 = vpop.f32.mrf.mxu1  ;;  %v12783_v58 = vld [vmem:[#allocation66_spill] sm:$0xff]  ;;  %v12785_v23 = vld [vmem:[#allocation112_spill] sm:$0xff] }
 0x26c   : > { %v2840_v49 = vadd.f32 %v12782_v38, %v2466_v27  ;;  %8819 = vmatmul.mubr.f32.gmra.mxu1 %v11257_v26  ;;  %8896 = vmatmul.mubr.f32.gmra.mxu0 %v11257_v26  ;;  %v11275_v50 = vmax.f32 %v3652_v0, 0.0  ;;  %v3615_v55 = vmul.f32 %v11046_v57, %v3512_v31  ;;  %v3515_v34 = vadd.f32 %v8752_v11, %v3177_v22  ;;  %v12784_v27 = vld [vmem:[#allocation69_spill] sm:$0xff]  ;;  %v12789_v11 = vld [vmem:[#allocation114_spill] sm:$0xff] }
 0x26d   : > { %3718 = vst [vmem:[#allocation3 + $0xb1] sm:$0xff] %v11260_v14  ;;  %v3655_v35 = vadd.f32 %v11064_v18, %v3616_v40  ;;  %9021 = vmatpush3.msra.mxu0 %v4771_v47  ;;  %v2468_v28 = vadd.f32 %v12783_v58, %v2130_v8  ;;  %v2132_v46 = vadd.f32 %v12784_v27, %v11056_v5  ;;  %v3387_v45 = vpop.f32.mrf.mxu0  ;;  %v11284_v30 = vld [vmem:[#allocation3 + $0x78] sm:$0xff]  ;;  %v11286_v0 = vld [vmem:[#allocation3 + $0x80] sm:$0xff] }
 0x26e   : > { %v3179_v43 = vadd.f32 %v11079_v29, %v2841_v56  ;;  %v2843_v38 = vadd.f32 %v12785_v23, %v2469_v6  ;;  %9022 = vmatprep.subr.mxu0 %v4770_v63  ;;  %3717 = vst [vmem:[#allocation3 + $0xa9] sm:$0xff] %v11275_v50  ;;  %v3654_v47 = vadd.f32 %v11064_v18, %v3615_v55  ;;  %v4769_v5 = vld [vmem:[#allocation10 + $0xd0] sm:$0xff]  ;;  %v12787_v29 = vld [vmem:[#allocation67_spill] sm:$0xff]  ;;  %v12788_v56 = vld [vmem:[#allocation68_spill] sm:$0xff] }
 0x26f   : > { %v11289_v40 = vmax.f32 %v3655_v35, 0.0  ;;  %v3618_v8 = vmul.f32 %v11046_v57, %v3515_v34  ;;  %v3514_v22 = vadd.f32 %v3387_v45, %v3176_v24  ;;  %8821 = vmatprep.mubr.f32.mxu1 %v11284_v30  ;;  %8898 = vmatprep.mubr.f32.mxu0 %v11284_v30  ;;  %v2471_v31 = vadd.f32 %v12788_v56, %v12787_v29  ;;  %v8755_v27 = vpop.f32.mrf.mxu0  ;;  %v11301_v35 = vpop.f32.mrf.mxu1  ;;  %v12793_v56 = vld [vmem:[#allocation115_spill] sm:$0xff] }
 0x270   : > { %v3178_v6 = vadd.f32 %v11101_v59, %v2840_v49  ;;  %v2842_v58 = vadd.f32 %v12789_v11, %v2468_v28  ;;  %8822 = vmatmul.mubr.f32.gmra.mxu1 %v11286_v0  ;;  %8899 = vmatmul.mubr.f32.gmra.mxu0 %v11286_v0  ;;  %v11304_v45 = vmax.f32 %v3654_v47, 0.0  ;;  %v3517_v34 = vadd.f32 %v8755_v27, %v3179_v43  ;;  %v12791_v59 = vld [vmem:[#allocation70_spill] sm:$0xff]  ;;  %v12792_v28 = vld [vmem:[#allocation73_spill] sm:$0xff] }
 0x271   : > { %12786 = vst [vmem:[#allocation16_spill] sm:$0xff] %v11289_v40  ;;  %3720 = vst [vmem:[#allocation3 + $0xc9] sm:$0xff] %v11289_v40  ;;  %v3657_v24 = vadd.f32 %v11064_v18, %v3618_v8  ;;  %v3617_v55 = vmul.f32 %v11046_v57, %v3514_v22  ;;  %9023 = vmatpush3.msra.mxu0 %v4770_v63  ;;  %v2470_v49 = vadd.f32 %v12791_v59, %v2132_v46  ;;  %v3397_v1 = vpop.f32.mrf.mxu0  ;;  %v11313_v54 = vld [vmem:[#allocation3 + $0x90] sm:$0xff]  ;;  %v11315_v47 = vld [vmem:[#allocation3 + $0x98] sm:$0xff] }
 0x272   : > { %12790 = vst [vmem:[#allocation17_spill] sm:$0xff] %v11304_v45  ;;  %v2134_v23 = vadd.f32 %v12792_v28, %v11067_v39  ;;  %v3181_v29 = vadd.f32 %v11128_v36, %v2843_v38  ;;  %v2845_v11 = vadd.f32 %v12793_v56, %v2471_v31  ;;  %9024 = vmatprep.subr.mxu0 %v4769_v5  ;;  %3719 = vst [vmem:[#allocation3 + $0xc1] sm:$0xff] %v11304_v45  ;;  %v4768_v39 = vld [vmem:[#allocation10 + $0xc8] sm:$0xff]  ;;  %v12795_v36 = vld [vmem:[#allocation71_spill] sm:$0xff] }
 0x273   : > { %v11318_v8 = vmax.f32 %v3657_v24, 0.0  ;;  %v3656_v63 = vadd.f32 %v11064_v18, %v3617_v55  ;;  %v3620_v46 = vmul.f32 %v11046_v57, %v3517_v34  ;;  %v3516_v43 = vadd.f32 %v3397_v1, %v3178_v6  ;;  %8824 = vmatprep.mubr.f32.mxu1 %v11313_v54  ;;  %8901 = vmatprep.mubr.f32.mxu0 %v11313_v54  ;;  %v12796_v38 = vld [vmem:[#allocation72_spill] sm:$0xff]  ;;  %v12797_v27 = vld [vmem:[#allocation117_spill] sm:$0xff]  ;;  %v8758_v28 = vpop.f32.mrf.mxu0  ;;  %v11330_v24 = vpop.f32.mrf.mxu1 }
 0x274   : > { %v2473_v22 = vadd.f32 %v12796_v38, %v12795_v36  ;;  %v3180_v31 = vadd.f32 %v11156_v3, %v2842_v58  ;;  %v2844_v59 = vadd.f32 %v12797_v27, %v2470_v49  ;;  %8825 = vmatmul.mubr.f32.gmra.mxu1 %v11315_v47  ;;  %8902 = vmatmul.mubr.f32.gmra.mxu0 %v11315_v47  ;;  %v12799_v3 = vld [vmem:[#allocation74_spill] sm:$0xff] }
 0x275   : > { %12794 = vst [vmem:[#allocation18_spill] sm:$0xff] %v11318_v8  ;;  %3722 = vst [vmem:[#allocation3 + $0xe1] sm:$0xff] %v11318_v8  ;;  %v11333_v1 = vmax.f32 %v3656_v63, 0.0  ;;  %v3659_v6 = vadd.f32 %v11064_v18, %v3620_v46  ;;  %v3619_v55 = vmul.f32 %v11046_v57, %v3516_v43  ;;  %v3519_v34 = vadd.f32 %v8758_v28, %v3181_v29  ;;  %v12800_v49 = vld [vmem:[#allocation78_spill] sm:$0xff]  ;;  %v3407_v40 = vpop.f32.mrf.mxu0  ;;  %v11344_v63 = vld [vmem:[#allocation3 + $0xb0] sm:$0xff] }
 0x276   : > { %9025 = vmatpush3.msra.mxu0 %v4769_v5  ;;  %v2472_v58 = vadd.f32 %v12799_v3, %v2134_v23  ;;  %v2136_v56 = vadd.f32 %v12800_v49, %v11072_v51  ;;  %v3183_v36 = vadd.f32 %v11181_v17, %v2845_v11  ;;  %v12801_v38 = vld [vmem:[#allocation118_spill] sm:$0xff]  ;;  %v3518_v29 = vadd.f32 %v3407_v40, %v3180_v31  ;;  %v4767_v51 = vld [vmem:[#allocation10 + $0xc0] sm:$0xff]  ;;  %v12803_v17 = vld [vmem:[#allocation76_spill] sm:$0xff] }
 0x277   : > { %12798 = vst [vmem:[#allocation19_spill] sm:$0xff] %v11333_v1  ;;  %v2847_v27 = vadd.f32 %v12801_v38, %v2473_v22  ;;  %v11342_v45 = vld [vmem:[#allocation3 + $0xa8] sm:$0xff]  ;;  %9026 = vmatprep.subr.mxu0 %v4768_v39  ;;  %3721 = vst [vmem:[#allocation3 + $0xd9] sm:$0xff] %v11333_v1  ;;  %v11347_v46 = vmax.f32 %v3659_v6, 0.0  ;;  %v3658_v5 = vadd.f32 %v11064_v18, %v3619_v55  ;;  %v12804_v11 = vld [vmem:[#allocation77_spill] sm:$0xff]  ;;  %v8761_v49 = vpop.f32.mrf.mxu0  ;;  %v11359_v6 = vpop.f32.mrf.mxu1 }
 0x278   : > { %v3622_v23 = vmul.f32 %v11046_v57, %v3519_v34  ;;  %8827 = vmatprep.mubr.f32.mxu1 %v11342_v45  ;;  %8904 = vmatprep.mubr.f32.mxu0 %v11342_v45  ;;  %v2475_v43 = vadd.f32 %v12804_v11, %v12803_v17  ;;  %v3182_v22 = vadd.f32 %v11213_v62, %v2844_v59  ;;  %v12805_v28 = vld [vmem:[#allocation120_spill] sm:$0xff]  ;;  %v12807_v62 = vld [vmem:[#allocation79_spill] sm:$0xff]  ;;  %v12809_v11 = vld [vmem:[#allocation121_spill] sm:$0xff] }
 0x279   : > { %12802 = vst [vmem:[#allocation20_spill] sm:$0xff] %v11347_v46  ;;  %v2846_v3 = vadd.f32 %v12805_v28, %v2472_v58  ;;  %8828 = vmatmul.mubr.f32.gmra.mxu1 %v11344_v63  ;;  %8905 = vmatmul.mubr.f32.gmra.mxu0 %v11344_v63  ;;  %3724 = vst [vmem:[#allocation3 + $0xf9] sm:$0xff] %v11347_v46  ;;  %v11362_v40 = vmax.f32 %v3658_v5, 0.0  ;;  %v3621_v55 = vmul.f32 %v11046_v57, %v3518_v29  ;;  %v12808_v58 = vld [vmem:[#allocation82_spill] sm:$0xff]  ;;  %v3417_v8 = vpop.f32.mrf.mxu0  ;;  %v11371_v1 = vld [vmem:[#allocation3 + $0xc0] sm:$0xff] }
 0x27a   : > { %v3661_v31 = vadd.f32 %v11064_v18, %v3622_v23  ;;  %v3521_v34 = vadd.f32 %v8761_v49, %v3183_v36  ;;  %9027 = vmatpush3.msra.mxu0 %v4768_v39  ;;  %v2474_v59 = vadd.f32 %v12807_v62, %v2136_v56  ;;  %v2138_v38 = vadd.f32 %v12808_v58, %v11095_v41  ;;  %v11373_v5 = vld [vmem:[#allocation3 + $0xc8] sm:$0xff]  ;;  %v12812_v49 = vld [vmem:[#allocation123_spill] sm:$0xff] }
 0x27b   : > { %12806 = vst [vmem:[#allocation21_spill] sm:$0xff] %v11362_v40  ;;  %v3185_v17 = vadd.f32 %v11243_v61, %v2847_v27  ;;  %v2849_v28 = vadd.f32 %v12809_v11, %v2475_v43  ;;  %9028 = vmatprep.subr.mxu0 %v4767_v51  ;;  %3723 = vst [vmem:[#allocation3 + $0xf1] sm:$0xff] %v11362_v40  ;;  %v3660_v39 = vadd.f32 %v11064_v18, %v3621_v55  ;;  %v4766_v41 = vld [vmem:[#allocation10 + $0xb8] sm:$0xff]  ;;  %v12810_v61 = vld [vmem:[#allocation80_spill] sm:$0xff]  ;;  %v8764_v58 = vpop.f32.mrf.mxu0 }
 0x27c   : > { %v11376_v23 = vmax.f32 %v3661_v31, 0.0  ;;  %v3624_v56 = vmul.f32 %v11046_v57, %v3521_v34  ;;  %v3520_v36 = vadd.f32 %v3417_v8, %v3182_v22  ;;  %8830 = vmatprep.mubr.f32.mxu1 %v11371_v1  ;;  %8907 = vmatprep.mubr.f32.mxu0 %v11371_v1  ;;  %v12811_v27 = vld [vmem:[#allocation81_spill] sm:$0xff]  ;;  %v3184_v43 = vadd.f32 %v11272_v33, %v2846_v3  ;;  %v3109_v31 = vpop.f32.mrf.mxu1  ;;  %v12813_v11 = vld [vmem:[#allocation83_spill] sm:$0xff]  ;;  %v12814_v3 = vld [vmem:[#allocation86_spill] sm:$0xff] }
 0x27d   : > { %v2477_v29 = vadd.f32 %v12811_v27, %v12810_v61  ;;  %v2848_v62 = vadd.f32 %v12812_v49, %v2474_v59  ;;  %8831 = vmatmul.mubr.f32.gmra.mxu1 %v11373_v5  ;;  %8908 = vmatmul.mubr.f32.gmra.mxu0 %v11373_v5  ;;  %v11389_v8 = vmax.f32 %v3660_v39, 0.0  ;;  %v3523_v34 = vadd.f32 %v8764_v58, %v3185_v17  ;;  %v12815_v27 = vld [vmem:[#allocation15_spill] sm:$0xff]  ;;  %v3427_v46 = vpop.f32.mrf.mxu0 }
 0x27e   : > { %3726 = vst [vmem:[#allocation3 + $0x111] sm:$0xff] %v11376_v23  ;;  %v3663_v22 = vadd.f32 %v11064_v18, %v3624_v56  ;;  %v3623_v55 = vmul.f32 %v11046_v57, %v3520_v36  ;;  %9029 = vmatpush3.msra.mxu0 %v4767_v51  ;;  %v2476_v33 = vadd.f32 %v12813_v11, %v2138_v38  ;;  %v11398_v40 = vld [vmem:[#allocation3 + $0xd8] sm:$0xff]  ;;  %v11400_v39 = vld [vmem:[#allocation3 + $0xe0] sm:$0xff] }
 0x27f   : > { %v2140_v59 = vadd.f32 %v12814_v3, %v11150_v20  ;;  %v3187_v61 = vadd.f32 %v11301_v35, %v2849_v28  ;;  %v2851_v49 = vadd.f32 %v12815_v27, %v2477_v29  ;;  %9030 = vmatprep.subr.mxu0 %v4766_v41  ;;  %3725 = vst [vmem:[#allocation3 + $0x109] sm:$0xff] %v11389_v8  ;;  %v4765_v20 = vld [vmem:[#allocation10 + $0xb0] sm:$0xff]  ;;  %v12816_v35 = vld [vmem:[#allocation84_spill] sm:$0xff]  ;;  %v8767_v11 = vpop.f32.mrf.mxu0  ;;  %v12818_v3 = vld [vmem:[#allocation87_spill] sm:$0xff] }
 0x280   : > { %v11403_v56 = vmax.f32 %v3663_v22, 0.0  ;;  %v3662_v51 = vadd.f32 %v11064_v18, %v3623_v55  ;;  %v3626_v38 = vmul.f32 %v11046_v57, %v3523_v34  ;;  %v3522_v17 = vadd.f32 %v3427_v46, %v3184_v43  ;;  %8833 = vmatprep.mubr.f32.mxu1 %v11398_v40  ;;  %8910 = vmatprep.mubr.f32.mxu0 %v11398_v40  ;;  %v12817_v28 = vld [vmem:[#allocation85_spill] sm:$0xff]  ;;  %v8693_v22 = vpop.f32.mrf.mxu1 }
 0x281   : > { %v2479_v36 = vadd.f32 %v12817_v28, %v12816_v35  ;;  %v3186_v29 = vadd.f32 %v11330_v24, %v2848_v62  ;;  %v2850_v58 = vadd.f32 %v10993_v48, %v2476_v33  ;;  %8834 = vmatmul.mubr.f32.gmra.mxu1 %v11400_v39  ;;  %8911 = vmatmul.mubr.f32.gmra.mxu0 %v11400_v39  ;;  %v3437_v33 = vpop.f32.mrf.mxu0 }
 0x282   : > { %3728 = vst [vmem:[#allocation3 + $0x129] sm:$0xff] %v11403_v56  ;;  %v11416_v46 = vmax.f32 %v3662_v51, 0.0  ;;  %v3665_v43 = vadd.f32 %v11064_v18, %v3626_v38  ;;  %v3625_v55 = vmul.f32 %v11046_v57, %v3522_v17  ;;  %v3525_v34 = vadd.f32 %v8767_v11, %v3187_v61  ;;  %9031 = vmatpush3.msra.mxu0 %v4766_v41  ;;  %v11423_v27 = vld [vmem:[#allocation3 + $0xf0] sm:$0xff]  ;;  %v11425_v35 = vld [vmem:[#allocation3 + $0xf8] sm:$0xff]  ;;  %v3119_v17 = vpop.f32.mrf.mxu1 }
 0x283   : > { %v2478_v24 = vadd.f32 %v12818_v3, %v2140_v59  ;;  %v3189_v48 = vadd.f32 %v11359_v6, %v2851_v49  ;;  %v2853_v62 = vadd.f32 %v11006_v2, %v2479_v36  ;;  %9032 = vmatprep.subr.mxu0 %v4765_v20  ;;  %v3524_v61 = vadd.f32 %v3437_v33, %v3186_v29  ;;  %v4764_v2 = vld [vmem:[#allocation10 + $0xa8] sm:$0xff]  ;;  %v8770_v49 = vpop.f32.mrf.mxu0 }
 0x284   : > { %3727 = vst [vmem:[#allocation3 + $0x121] sm:$0xff] %v11416_v46  ;;  %v11428_v51 = vmax.f32 %v3665_v43, 0.0  ;;  %v3664_v38 = vadd.f32 %v11064_v18, %v3625_v55  ;;  %v3628_v41 = vmul.f32 %v11046_v57, %v3525_v34  ;;  %8836 = vmatprep.mubr.f32.mxu1 %v11423_v27  ;;  %8913 = vmatprep.mubr.f32.mxu0 %v11423_v27 }
 0x285   : > { %v3188_v6 = vadd.f32 %v3109_v31, %v2850_v58  ;;  %v2852_v59 = vadd.f32 %v11028_v37, %v2478_v24  ;;  %8837 = vmatmul.mubr.f32.gmra.mxu1 %v11425_v35  ;;  %8914 = vmatmul.mubr.f32.gmra.mxu0 %v11425_v35  ;;  %v3627_v29 = vmul.f32 %v11046_v57, %v3524_v61  ;;  %v3447_v31 = vpop.f32.mrf.mxu0 }
 0x286   : > { %3730 = vst [vmem:[#allocation3 + $0x141] sm:$0xff] %v11428_v51  ;;  %v11438_v28 = vmax.f32 %v3664_v38, 0.0  ;;  %v3667_v36 = vadd.f32 %v11064_v18, %v3628_v41  ;;  %v3527_v11 = vadd.f32 %v8770_v49, %v3189_v48  ;;  %9033 = vmatpush3.msra.mxu0 %v4765_v20  ;;  %v3191_v43 = vadd.f32 %v8693_v22, %v2853_v62  ;;  %v11442_v58 = vld [vmem:[#allocation3 + $0x108] sm:$0xff]  ;;  %v11444_v37 = vld [vmem:[#allocation3 + $0x110] sm:$0xff] }
 0x287   : > { %9034 = vmatprep.subr.mxu0 %v4764_v2  ;;  %v3666_v34 = vadd.f32 %v11064_v18, %v3627_v29  ;;  %v3526_v24 = vadd.f32 %v3447_v31, %v3188_v6  ;;  %8839 = vmatprep.mubr.f32.mxu1 %v11442_v58  ;;  %v4763_v20 = vld [vmem:[#allocation10 + $0xa0] sm:$0xff]  ;;  %v3190_v22 = vadd.f32 %v3119_v17, %v2852_v59  ;;  %v8773_v48 = vpop.f32.mrf.mxu0 }
 0x288   : > { %3729 = vst [vmem:[#allocation3 + $0x139] sm:$0xff] %v11438_v28  ;;  %v11447_v55 = vmax.f32 %v3667_v36, 0.0  ;;  %v3630_v3 = vmul.f32 %v11046_v57, %v3527_v11  ;;  %8916 = vmatprep.mubr.f32.mxu0 %v11442_v58  ;;  %v3529_v41 = vadd.f32 %v8773_v48, %v3191_v43  ;;  %9035 = vmatpush3.msra.mxu0 %v4764_v2  ;;  %v4762_v2 = vld [vmem:[#allocation10 + $0x98] sm:$0xff]  ;;  %v4761_v48 = vld [vmem:[#allocation10 + $0x90] sm:$0xff] }
 0x289   : > { %8840 = vmatmul.mubr.f32.gmra.mxu1 %v11444_v37  ;;  %8917 = vmatmul.mubr.f32.gmra.mxu0 %v11444_v37  ;;  %v11456_v62 = vmax.f32 %v3666_v34, 0.0  ;;  %v3629_v38 = vmul.f32 %v11046_v57, %v3526_v24  ;;  %v3457_v61 = vpop.f32.mrf.mxu0 }
 0x28a   : > { %3732 = vst [vmem:[#allocation3 + $0x159] sm:$0xff] %v11447_v55  ;;  %v3669_v33 = vadd.f32 %v11064_v18, %v3630_v3  ;;  %9036 = vmatprep.subr.mxu0 %v4763_v20  ;;  %v3632_v36 = vmul.f32 %v11046_v57, %v3529_v41  ;;  %v3528_v29 = vadd.f32 %v3457_v61, %v3190_v22  ;;  %v4759_v61 = vld [vmem:[#allocation10 + $0x80] sm:$0xff] }
 0x28b   : > { %v11460_v6 = vld [vmem:[#allocation3 + $0x120] sm:$0xff]  ;;  %v11462_v49 = vld [vmem:[#allocation3 + $0x128] sm:$0xff]  ;;  %3731 = vst [vmem:[#allocation3 + $0x151] sm:$0xff] %v11456_v62  ;;  %v3668_v17 = vadd.f32 %v11064_v18, %v3629_v38  ;;  %9037 = vmatpush3.msra.mxu0 %v4763_v20 }
 0x28c   : > { %v11465_v59 = vmax.f32 %v3669_v33, 0.0  ;;  %8842 = vmatprep.mubr.f32.mxu1 %v11460_v6  ;;  %8919 = vmatprep.mubr.f32.mxu0 %v11460_v6  ;;  %v3671_v43 = vadd.f32 %v11064_v18, %v3632_v36  ;;  %v3631_v31 = vmul.f32 %v11046_v57, %v3528_v29  ;;  %v4722_v29 = vld [vmem:[#allocation3 + $0x1] sm:$0xff] }
 0x28d   : > { %8843 = vmatmul.mubr.f32.gmra.mxu1 %v11462_v49  ;;  %8920 = vmatmul.mubr.f32.gmra.mxu0 %v11462_v49  ;;  %v11474_v11 = vmax.f32 %v3668_v17, 0.0 }
 0x28e   : > { %3734 = vst [vmem:[#allocation3 + $0x171] sm:$0xff] %v11465_v59  ;;  %9038 = vmatprep.subr.mxu0 %v4762_v2  ;;  %v11483_v24 = vmax.f32 %v3671_v43, 0.0  ;;  %v3670_v22 = vadd.f32 %v11064_v18, %v3631_v31  ;;  %v4760_v18 = vld [vmem:[#allocation10 + $0x88] sm:$0xff]  ;;  %v5450_v43 = vld [vmem:[#allocation10 + $0x3f8] sm:$0xff] }
 0x28f   : > { %v11478_v34 = vld [vmem:[#allocation3 + $0x138] sm:$0xff]  ;;  %v11480_v3 = vld [vmem:[#allocation3 + $0x140] sm:$0xff]  ;;  %3733 = vst [vmem:[#allocation3 + $0x169] sm:$0xff] %v11474_v11  ;;  %9039 = vmatpush3.msra.mxu0 %v4762_v2  ;;  %v9568_v31 = vld [vmem:[#allocation10 + $0x278] sm:$0xff] }
 0x290   : > { %8845 = vmatprep.mubr.f32.mxu1 %v11478_v34  ;;  %8922 = vmatprep.mubr.f32.mxu0 %v11478_v34  ;;  %3736 = vst [vmem:[#allocation3 + $0x189] sm:$0xff] %v11483_v24  ;;  %v11491_v57 = vmax.f32 %v3670_v22, 0.0  ;;  %v5111_v2 = vld [vmem:[#allocation10 + $0x270] sm:$0xff]  ;;  %v5110_v22 = vld [vmem:[#allocation10 + $0x268] sm:$0xff] }
 0x291   : > { %8846 = vmatmul.mubr.f32.gmra.mxu1 %v11480_v3  ;;  %8923 = vmatmul.mubr.f32.gmra.mxu0 %v11480_v3 }
 0x292   : > { %v11493_v20 = vld [vmem:[#allocation3 + $0x150] sm:$0xff]  ;;  %v11495_v33 = vld [vmem:[#allocation3 + $0x158] sm:$0xff]  ;;  %9040 = vmatprep.subr.mxu0 %v4761_v48  ;;  %3735 = vst [vmem:[#allocation3 + $0x181] sm:$0xff] %v11491_v57 }
 0x293   : > { %8848 = vmatprep.mubr.f32.mxu1 %v11493_v20  ;;  %8925 = vmatprep.mubr.f32.mxu0 %v11493_v20 }
 0x294   : > { %9041 = vmatpush3.msra.mxu0 %v4761_v48  ;;  %v5449_v48 = vld [vmem:[#allocation10 + $0x3f0] sm:$0xff] }
 0x295   : > { %8849 = vmatmul.mubr.f32.gmra.mxu1 %v11495_v33  ;;  %8926 = vmatmul.mubr.f32.gmra.mxu0 %v11495_v33 }
 0x296   : > { %v11502_v38 = vld [vmem:[#allocation3 + $0x168] sm:$0xff]  ;;  %v11504_v41 = vld [vmem:[#allocation3 + $0x170] sm:$0xff]  ;;  %9042 = vmatprep.subr.mxu0 %v4760_v18 }
 0x297   : > { %8851 = vmatprep.mubr.f32.mxu1 %v11502_v38  ;;  %8928 = vmatprep.mubr.f32.mxu0 %v11502_v38 }
 0x298   : > { %9043 = vmatpush3.msra.mxu0 %v4760_v18  ;;  %v12819_v18 = vmax.f32 %v11091_v52, 0.0  ;;  %v5108_v52 = vld [vmem:[#allocation10 + $0x258] sm:$0xff] }
 0x299   : > { %8852 = vmatmul.mubr.f32.gmra.mxu1 %v11504_v41  ;;  %8929 = vmatmul.mubr.f32.gmra.mxu0 %v11504_v41  ;;  %v11511_v17 = vld [vmem:[#allocation3 + $0x180] sm:$0xff]  ;;  %v11513_v36 = vld [vmem:[#allocation3 + $0x188] sm:$0xff] }
 0x29a   : > { %8966 = vmatprep.mubr.f32.mxu1 %v11196_v10  ;;  %9044 = vmatprep.subr.mxu0 %v4759_v61  ;;  %v4723_v10 = vld [vmem:[#allocation3 + $0x9] sm:$0xff] }
 0x29b   : > { %8931 = vmatprep.mubr.f32.mxu0 %v11511_v17  ;;  %9045 = vmatpush3.msra.mxu0 %v4759_v61  ;;  %v5448_v61 = vld [vmem:[#allocation10 + $0x3e8] sm:$0xff] }
 0x29c   : > { %9174 = vmatprep.subr.mxu0 %v5450_v43 }
 0x29d   : > { %8932 = vmatmul.mubr.f32.gmra.mxu0 %v11513_v36  ;;  %8967 = vmatmul.mubr.f32.vlgmr.msra.gmra.mxu1 %v11198_v19  ;;  %v12820_v19 = vmax.f32 %v11082_v4, 0.0  ;;  %v12823_v4 = vmax.f32 %v11146_v7, 0.0  ;;  %v12826_v7 = vmax.f32 %v11162_v21, 0.0  ;;  %v5104_v21 = vld [vmem:[#allocation10 + $0x238] sm:$0xff] }
 0x29e   : > { %8969 = vmatprep.mubr.f32.mxu1 %v11226_v13  ;;  %9095 = vmatpush3.msra.mxu1 %v9568_v31  ;;  %v5109_v13 = vld [vmem:[#allocation10 + $0x260] sm:$0xff] }
 0x29f   : > { %9046 = vmatprep.mubr.f32.mxu0 %v4722_v29  ;;  %9096 = vmatprep.subr.mxu1 %v5111_v2  ;;  %v12831_v29 = vld [vmem:[#allocation18_spill] sm:$0xff]  ;;  %v5439_v31 = vld [vmem:[#allocation10 + $0x3a0] sm:$0xff] }
 0x2a0   : > { %9097 = vmatpush3.msra.mxu1 %v5111_v2  ;;  %v5440_v2 = vld [vmem:[#allocation10 + $0x3a8] sm:$0xff] }
 0x2a1   : > { %8970 = vmatmul.mubr.f32.gmra.mxu1 %v11228_v12  ;;  %9047 = vmatmul.mubr.f32.vlgmr.msra.gmra.mxu0 %v4723_v10  ;;  %v12821_v12 = vmax.f32 %v11119_v9, 0.0  ;;  %v5107_v9 = vld [vmem:[#allocation10 + $0x250] sm:$0xff]  ;;  %v5436_v10 = vld [vmem:[#allocation10 + $0x388] sm:$0xff] }
 0x2a2   : > { %8972 = vmatprep.mubr.f32.mxu1 %v11255_v60  ;;  %9049 = vmatprep.mubr.f32.mxu0 %v12819_v18  ;;  %v12822_v60 = vmax.f32 %v11107_v25, 0.0  ;;  %v12825_v25 = vmax.f32 %v11174_v44, 0.0  ;;  %v12827_v44 = vmax.f32 %v11187_v53, 0.0  ;;  %v5103_v53 = vld [vmem:[#allocation10 + $0x230] sm:$0xff] }
 0x2a3   : > { %9098 = vmatprep.subr.mxu1 %v5110_v22  ;;  %9175 = vmatpush3.msra.mxu0 %v5450_v43  ;;  %v12833_v43 = vld [vmem:[#allocation20_spill] sm:$0xff]  ;;  %v5823_v18 = vld [vmem:[#allocation10 + $0x170] sm:$0xff] }
 0x2a4   : > { %9099 = vmatpush3.msra.mxu1 %v5110_v22  ;;  %9176 = vmatprep.subr.mxu0 %v5449_v48  ;;  %v5435_v22 = vld [vmem:[#allocation10 + $0x380] sm:$0xff] }
 0x2a5   : > { %8973 = vmatmul.mubr.f32.gmra.mxu1 %v11257_v26  ;;  %9050 = vmatmul.mubr.f32.gmra.mxu0 %v12820_v19  ;;  %v5447_v26 = vld [vmem:[#allocation10 + $0x3e0] sm:$0xff] }
 0x2a6   : > { %8975 = vmatprep.mubr.f32.mxu1 %v11284_v30  ;;  %9052 = vmatprep.mubr.f32.mxu0 %v12821_v12  ;;  %v12824_v30 = vmax.f32 %v11134_v16, 0.0  ;;  %v5105_v16 = vld [vmem:[#allocation10 + $0x240] sm:$0xff]  ;;  %v5822_v12 = vld [vmem:[#allocation10 + $0x168] sm:$0xff] }
 0x2a7   : > { %9100 = vmatprep.subr.mxu1 %v5109_v13  ;;  %9177 = vmatpush3.msra.mxu0 %v5449_v48  ;;  %v9570_v48 = vld [vmem:[#allocation3 + $0x19] sm:$0xff]  ;;  %v9572_v19 = vld [vmem:[#allocation3 + $0x31] sm:$0xff] }
 0x2a8   : > { %9101 = vmatpush3.msra.mxu1 %v5109_v13  ;;  %9178 = vmatprep.subr.mxu0 %v5448_v61  ;;  %v6162_v13 = vld [vmem:[#allocation10 + $0x2f8] sm:$0xff] }
 0x2a9   : > { %8976 = vmatmul.mubr.f32.gmra.mxu1 %v11286_v0  ;;  %9053 = vmatmul.mubr.f32.gmra.mxu0 %v12822_v60  ;;  %v5446_v0 = vld [vmem:[#allocation10 + $0x3d8] sm:$0xff] }
 0x2aa   : > { %8978 = vmatprep.mubr.f32.mxu1 %v11313_v54  ;;  %9055 = vmatprep.mubr.f32.mxu0 %v12823_v4  ;;  %v5106_v54 = vld [vmem:[#allocation10 + $0x248] sm:$0xff]  ;;  %v9574_v60 = vld [vmem:[#allocation3 + $0x49] sm:$0xff] }
 0x2ab   : > { %9102 = vmatprep.subr.mxu1 %v5108_v52  ;;  %9179 = vmatpush3.msra.mxu0 %v5448_v61  ;;  %v9573_v61 = vld [vmem:[#allocation3 + $0x39] sm:$0xff]  ;;  %v5821_v4 = vld [vmem:[#allocation10 + $0x160] sm:$0xff] }
 0x2ac   : > { %9103 = vmatpush3.msra.mxu1 %v5108_v52  ;;  %9180 = vmatprep.subr.mxu0 %v5447_v26  ;;  %v6161_v52 = vld [vmem:[#allocation10 + $0x2f0] sm:$0xff] }
 0x2ad   : > { %8979 = vmatmul.mubr.f32.gmra.mxu1 %v11315_v47  ;;  %9056 = vmatmul.mubr.f32.gmra.mxu0 %v12824_v30  ;;  %v5445_v47 = vld [vmem:[#allocation10 + $0x3d0] sm:$0xff] }
 0x2ae   : > { %8981 = vmatprep.mubr.f32.mxu1 %v11342_v45  ;;  %9058 = vmatprep.mubr.f32.mxu0 %v12825_v25  ;;  %v5444_v45 = vld [vmem:[#allocation10 + $0x3c8] sm:$0xff]  ;;  %v9576_v30 = vld [vmem:[#allocation3 + $0x61] sm:$0xff] }
 0x2af   : > { %9104 = vmatprep.subr.mxu1 %v5107_v9  ;;  %9181 = vmatpush3.msra.mxu0 %v5447_v26  ;;  %v9575_v26 = vld [vmem:[#allocation3 + $0x51] sm:$0xff]  ;;  %v5820_v25 = vld [vmem:[#allocation10 + $0x158] sm:$0xff] }
 0x2b0   : > { %9105 = vmatpush3.msra.mxu1 %v5107_v9  ;;  %9182 = vmatprep.subr.mxu0 %v5446_v0  ;;  %v6160_v9 = vld [vmem:[#allocation10 + $0x2e8] sm:$0xff] }
 0x2b1   : > { %8982 = vmatmul.mubr.f32.gmra.mxu1 %v11344_v63  ;;  %9059 = vmatmul.mubr.f32.gmra.mxu0 %v12826_v7  ;;  %v5442_v63 = vld [vmem:[#allocation10 + $0x3b8] sm:$0xff] }
 0x2b2   : > { %8984 = vmatprep.mubr.f32.mxu1 %v11371_v1  ;;  %9061 = vmatprep.mubr.f32.mxu0 %v11217_v42  ;;  %v5443_v1 = vld [vmem:[#allocation10 + $0x3c0] sm:$0xff]  ;;  %v9578_v7 = vld [vmem:[#allocation3 + $0x81] sm:$0xff] }
 0x2b3   : > { %9106 = vmatprep.subr.mxu1 %v5106_v54  ;;  %9183 = vmatpush3.msra.mxu0 %v5446_v0  ;;  %v9577_v0 = vld [vmem:[#allocation3 + $0x69] sm:$0xff] }
 0x2b4   : > { %9107 = vmatpush3.msra.mxu1 %v5106_v54  ;;  %9184 = vmatprep.subr.mxu0 %v5445_v47  ;;  %v6159_v54 = vld [vmem:[#allocation10 + $0x2e0] sm:$0xff] }
 0x2b5   : > { %8985 = vmatmul.mubr.f32.gmra.mxu1 %v11373_v5  ;;  %9062 = vmatmul.mubr.f32.gmra.mxu0 %v12827_v44  ;;  %v5102_v5 = vld [vmem:[#allocation10 + $0x228] sm:$0xff]  ;;  %v6157_v44 = vld [vmem:[#allocation10 + $0x2d0] sm:$0xff] }
 0x2b6   : > { %8987 = vmatprep.mubr.f32.mxu1 %v11398_v40  ;;  %9064 = vmatprep.mubr.f32.mxu0 %v11246_v32  ;;  %v12828_v40 = vld [vmem:[#allocation17_spill] sm:$0xff] }
 0x2b7   : > { %9108 = vmatprep.subr.mxu1 %v5105_v16  ;;  %9185 = vmatpush3.msra.mxu0 %v5445_v47  ;;  %v5819_v47 = vld [vmem:[#allocation10 + $0x150] sm:$0xff] }
 0x2b8   : > { %9109 = vmatpush3.msra.mxu1 %v5105_v16  ;;  %9186 = vmatprep.subr.mxu0 %v5444_v45  ;;  %v6158_v16 = vld [vmem:[#allocation10 + $0x2d8] sm:$0xff] }
 0x2b9   : > { %8988 = vmatmul.mubr.f32.gmra.mxu1 %v11400_v39  ;;  %9065 = vmatmul.mubr.f32.gmra.mxu0 %v11231_v15  ;;  %v12829_v39 = vld [vmem:[#allocation16_spill] sm:$0xff] }
 0x2ba   : > { %8990 = vmatprep.mubr.f32.mxu1 %v11423_v27  ;;  %9067 = vmatprep.mubr.f32.mxu0 %v11275_v50  ;;  %v5441_v27 = vld [vmem:[#allocation10 + $0x3b0] sm:$0xff] }
 0x2bb   : > { %9110 = vmatprep.subr.mxu1 %v5104_v21  ;;  %9187 = vmatpush3.msra.mxu0 %v5444_v45  ;;  %v6156_v45 = vld [vmem:[#allocation10 + $0x2c8] sm:$0xff] }
 0x2bc   : > { %9111 = vmatpush3.msra.mxu1 %v5104_v21  ;;  %9188 = vmatprep.subr.mxu0 %v5443_v1  ;;  %v6154_v21 = vld [vmem:[#allocation10 + $0x2b8] sm:$0xff] }
 0x2bd   : > { %8991 = vmatmul.mubr.f32.gmra.mxu1 %v11425_v35  ;;  %9068 = vmatmul.mubr.f32.gmra.mxu0 %v11260_v14  ;;  %v12830_v35 = vld [vmem:[#allocation19_spill] sm:$0xff] }
 0x2be   : > { %8993 = vmatprep.mubr.f32.mxu1 %v11442_v58  ;;  %9070 = vmatprep.mubr.f32.mxu0 %v12828_v40  ;;  %v5101_v58 = vld [vmem:[#allocation10 + $0x220] sm:$0xff] }
 0x2bf   : > { %9112 = vmatprep.subr.mxu1 %v5103_v53  ;;  %9189 = vmatpush3.msra.mxu0 %v5443_v1  ;;  %v5814_v1 = vld [vmem:[#allocation10 + $0x128] sm:$0xff] }
 0x2c0   : > { %9113 = vmatpush3.msra.mxu1 %v5103_v53  ;;  %9190 = vmatprep.subr.mxu0 %v5442_v63  ;;  %v6153_v53 = vld [vmem:[#allocation10 + $0x2b0] sm:$0xff] }
 0x2c1   : > { %8994 = vmatmul.mubr.f32.gmra.mxu1 %v11444_v37  ;;  %9071 = vmatmul.mubr.f32.gmra.mxu0 %v12829_v39  ;;  %v12832_v37 = vld [vmem:[#allocation21_spill] sm:$0xff] }
 0x2c2   : > { %8996 = vmatprep.mubr.f32.mxu1 %v11460_v6  ;;  %9073 = vmatprep.mubr.f32.mxu0 %v12830_v35  ;;  %v5100_v6 = vld [vmem:[#allocation10 + $0x218] sm:$0xff] }
 0x2c3   : > { %9114 = vmatprep.subr.mxu1 %v5102_v5  ;;  %9191 = vmatpush3.msra.mxu0 %v5442_v63  ;;  %v5813_v63 = vld [vmem:[#allocation10 + $0x120] sm:$0xff] }
 0x2c4   : > { %9115 = vmatpush3.msra.mxu1 %v5102_v5  ;;  %9192 = vmatprep.subr.mxu0 %v5441_v27  ;;  %v6151_v5 = vld [vmem:[#allocation10 + $0x2a0] sm:$0xff] }
 0x2c5   : > { %8997 = vmatmul.mubr.f32.gmra.mxu1 %v11462_v49  ;;  %9074 = vmatmul.mubr.f32.gmra.mxu0 %v12831_v29  ;;  %v5099_v49 = vld [vmem:[#allocation10 + $0x210] sm:$0xff] }
 0x2c6   : > { %8999 = vmatprep.mubr.f32.mxu1 %v11478_v34  ;;  %9076 = vmatprep.mubr.f32.mxu0 %v12832_v37  ;;  %v5438_v34 = vld [vmem:[#allocation10 + $0x398] sm:$0xff] }
 0x2c7   : > { %9116 = vmatprep.subr.mxu1 %v5101_v58  ;;  %9193 = vmatpush3.msra.mxu0 %v5441_v27  ;;  %v5773_v27 = vld [vmem:[#allocation3 + $0xa] sm:$0xff] }
 0x2c8   : > { %9117 = vmatpush3.msra.mxu1 %v5101_v58  ;;  %9194 = vmatprep.subr.mxu0 %v5440_v2  ;;  %v5774_v58 = vld [vmem:[#allocation3 + $0x1a] sm:$0xff] }
 0x2c9   : > { %9000 = vmatmul.mubr.f32.gmra.mxu1 %v11480_v3  ;;  %9077 = vmatmul.mubr.f32.gmra.mxu0 %v12833_v43  ;;  %v5098_v3 = vld [vmem:[#allocation10 + $0x208] sm:$0xff] }
 0x2ca   : > { %9002 = vmatprep.mubr.f32.mxu1 %v11493_v20  ;;  %9079 = vmatprep.mubr.f32.mxu0 %v11389_v8  ;;  %v5437_v20 = vld [vmem:[#allocation10 + $0x390] sm:$0xff] }
 0x2cb   : > { %9118 = vmatprep.subr.mxu1 %v5100_v6  ;;  %9195 = vmatpush3.msra.mxu0 %v5440_v2 }
 0x2cc   : > { %9119 = vmatpush3.msra.mxu1 %v5100_v6  ;;  %9196 = vmatprep.subr.mxu0 %v5439_v31 }
 0x2cd   : > { %9003 = vmatmul.mubr.f32.gmra.mxu1 %v11495_v33  ;;  %9080 = vmatmul.mubr.f32.gmra.mxu0 %v11376_v23  ;;  %v3771_v33 = vld [vmem:[#allocation3 + $0x198] sm:$0xff] }
 0x2ce   : > { %9005 = vmatprep.mubr.f32.mxu1 %v11502_v38  ;;  %9082 = vmatprep.mubr.f32.mxu0 %v11416_v46  ;;  %v5097_v38 = vld [vmem:[#allocation10 + $0x200] sm:$0xff] }
 0x2cf   : > { %9120 = vmatprep.subr.mxu1 %v5099_v49  ;;  %9197 = vmatpush3.msra.mxu0 %v5439_v31  ;;  %v6498_v31 = vld [vmem:[#allocation10 + $0x468] sm:$0xff] }
 0x2d0   : > { %9121 = vmatpush3.msra.mxu1 %v5099_v49  ;;  %9198 = vmatprep.subr.mxu0 %v5438_v34 }
 0x2d1   : > { %9006 = vmatmul.mubr.f32.gmra.mxu1 %v11504_v41  ;;  %9083 = vmatmul.mubr.f32.gmra.mxu0 %v11403_v56  ;;  %v5824_v41 = vld [vmem:[#allocation10 + $0x178] sm:$0xff] }
 0x2d2   : > { %9008 = vmatprep.mubr.f32.mxu1 %v11511_v17  ;;  %9085 = vmatprep.mubr.f32.mxu0 %v11438_v28  ;;  %v9569_v17 = vld [vmem:[#allocation2 + $0x8] sm:$0xff] }
 0x2d3   : > { %9122 = vmatprep.subr.mxu1 %v5098_v3  ;;  %9199 = vmatpush3.msra.mxu0 %v5438_v34 }
 0x2d4   : > { %9123 = vmatpush3.msra.mxu1 %v5098_v3  ;;  %9200 = vmatprep.subr.mxu0 %v5437_v20 }
 0x2d5   : > { %9009 = vmatmul.mubr.f32.gmra.mxu1 %v11513_v36  ;;  %9086 = vmatmul.mubr.f32.gmra.mxu0 %v11428_v51  ;;  %v9571_v36 = vld [vmem:[#allocation3 + $0x21] sm:$0xff] }
 0x2d6   : > { %9088 = vmatprep.mubr.f32.mxu0 %v11456_v62  ;;  %9011 = vmatprep.mubr.f32.mxu1 %v3771_v33 }
 0x2d7   : > { %9124 = vmatprep.subr.mxu1 %v5097_v38  ;;  %9201 = vmatpush3.msra.mxu0 %v5437_v20  ;;  %v11641_v20 = vld [vmem:[#allocation3 + $0x3a] sm:$0xff] }
 0x2d8   : > { %9125 = vmatpush3.msra.mxu1 %v5097_v38  ;;  %9202 = vmatprep.subr.mxu0 %v5436_v10 }
 0x2d9   : > { %9012 = vmatmul.mubr.f32.gmra.mxu1 %v9569_v17  ;;  %9089 = vmatmul.mubr.f32.gmra.mxu0 %v11447_v55 }
 0x2da   : > { %9091 = vmatprep.mubr.f32.mxu0 %v11474_v11  ;;  %9126 = vmatprep.mubr.f32.mxu1 %v9570_v48 }
 0x2db   : > { %9254 = vmatprep.subr.mxu1 %v5824_v41  ;;  %9203 = vmatpush3.msra.mxu0 %v5436_v10  ;;  %v11645_v10 = vld [vmem:[#allocation3 + $0x4a] sm:$0xff] }
 0x2dc   : > { %9204 = vmatprep.subr.mxu0 %v5435_v22 }
 0x2dd   : > { %9092 = vmatmul.mubr.f32.gmra.mxu0 %v11465_v59  ;;  %9127 = vmatmul.mubr.f32.vlgmr.msra.gmra.mxu1 %v9571_v36 }
 0x2de   : > { %9129 = vmatprep.mubr.f32.mxu1 %v9572_v19  ;;  %9206 = vmatprep.mubr.f32.mxu0 %v9572_v19 }
 0x2df   : > { %9255 = vmatpush3.msra.mxu1 %v5824_v41  ;;  %9205 = vmatpush3.msra.mxu0 %v5435_v22  ;;  %v6497_v41 = vld [vmem:[#allocation10 + $0x460] sm:$0xff] }
 0x2e0   : > { %9256 = vmatprep.subr.mxu1 %v5823_v18  ;;  %9334 = vmatprep.subr.mxu0 %v6162_v13 }
 0x2e1   : > { %9130 = vmatmul.mubr.f32.gmra.mxu1 %v9573_v61  ;;  %9207 = vmatmul.mubr.f32.vlgmr.msra.gmra.mxu0 %v9573_v61  ;;  %v11657_v61 = vld [vmem:[#allocation3 + $0x62] sm:$0xff] }
 0x2e2   : > { %9132 = vmatprep.mubr.f32.mxu1 %v9574_v60  ;;  %9209 = vmatprep.mubr.f32.mxu0 %v9574_v60 }
 0x2e3   : > { %9257 = vmatpush3.msra.mxu1 %v5823_v18  ;;  %9335 = vmatpush3.msra.mxu0 %v6162_v13  ;;  %v11653_v18 = vld [vmem:[#allocation3 + $0x52] sm:$0xff] }
 0x2e4   : > { %9258 = vmatprep.subr.mxu1 %v5822_v12  ;;  %9336 = vmatprep.subr.mxu0 %v6161_v52 }
 0x2e5   : > { %9133 = vmatmul.mubr.f32.gmra.mxu1 %v9575_v26  ;;  %9210 = vmatmul.mubr.f32.gmra.mxu0 %v9575_v26 }
 0x2e6   : > { %9135 = vmatprep.mubr.f32.mxu1 %v9576_v30  ;;  %9212 = vmatprep.mubr.f32.mxu0 %v9576_v30 }
 0x2e7   : > { %9259 = vmatpush3.msra.mxu1 %v5822_v12  ;;  %9337 = vmatpush3.msra.mxu0 %v6161_v52  ;;  %v6496_v12 = vld [vmem:[#allocation10 + $0x458] sm:$0xff] }
 0x2e8   : > { %9260 = vmatprep.subr.mxu1 %v5821_v4  ;;  %9338 = vmatprep.subr.mxu0 %v6160_v9 }
 0x2e9   : > { %9136 = vmatmul.mubr.f32.gmra.mxu1 %v9577_v0  ;;  %9213 = vmatmul.mubr.f32.gmra.mxu0 %v9577_v0 }
 0x2ea   : > { %9138 = vmatprep.mubr.f32.mxu1 %v11217_v42  ;;  %9215 = vmatprep.mubr.f32.mxu0 %v11217_v42  ;;  %v5818_v42 = vld [vmem:[#allocation10 + $0x148] sm:$0xff] }
 0x2eb   : > { %9261 = vmatpush3.msra.mxu1 %v5821_v4  ;;  %9339 = vmatpush3.msra.mxu0 %v6160_v9  ;;  %v11665_v9 = vld [vmem:[#allocation3 + $0x6a] sm:$0xff] }
 0x2ec   : > { %9262 = vmatprep.subr.mxu1 %v5820_v25  ;;  %9340 = vmatprep.subr.mxu0 %v6159_v54 }
 0x2ed   : > { %9139 = vmatmul.mubr.f32.gmra.mxu1 %v9578_v7  ;;  %9216 = vmatmul.mubr.f32.gmra.mxu0 %v9578_v7 }
 0x2ee   : > { %9141 = vmatprep.mubr.f32.mxu1 %v11246_v32  ;;  %9218 = vmatprep.mubr.f32.mxu0 %v11246_v32  ;;  %v5817_v32 = vld [vmem:[#allocation10 + $0x140] sm:$0xff] }
 0x2ef   : > { %9263 = vmatpush3.msra.mxu1 %v5820_v25  ;;  %9341 = vmatpush3.msra.mxu0 %v6159_v54  ;;  %v11669_v25 = vld [vmem:[#allocation3 + $0x7a] sm:$0xff] }
 0x2f0   : > { %9264 = vmatprep.subr.mxu1 %v5819_v47  ;;  %9342 = vmatprep.subr.mxu0 %v6158_v16  ;;  %v6495_v54 = vld [vmem:[#allocation10 + $0x450] sm:$0xff] }
 0x2f1   : > { %9142 = vmatmul.mubr.f32.gmra.mxu1 %v11231_v15  ;;  %9219 = vmatmul.mubr.f32.gmra.mxu0 %v11231_v15  ;;  %v5816_v15 = vld [vmem:[#allocation10 + $0x138] sm:$0xff] }
 0x2f2   : > { %9144 = vmatprep.mubr.f32.mxu1 %v11275_v50  ;;  %9221 = vmatprep.mubr.f32.mxu0 %v11275_v50  ;;  %v6155_v50 = vld [vmem:[#allocation10 + $0x2c0] sm:$0xff] }
 0x2f3   : > { %9265 = vmatpush3.msra.mxu1 %v5819_v47  ;;  %9343 = vmatpush3.msra.mxu0 %v6158_v16 }
 0x2f4   : > { %9266 = vmatprep.subr.mxu1 %v5818_v42  ;;  %9344 = vmatprep.subr.mxu0 %v6157_v44 }
 0x2f5   : > { %9145 = vmatmul.mubr.f32.gmra.mxu1 %v11260_v14  ;;  %9222 = vmatmul.mubr.f32.gmra.mxu0 %v11260_v14  ;;  %v5815_v14 = vld [vmem:[#allocation10 + $0x130] sm:$0xff] }
 0x2f6   : > { %9147 = vmatprep.mubr.f32.mxu1 %v12828_v40  ;;  %9224 = vmatprep.mubr.f32.mxu0 %v12828_v40  ;;  %v6152_v40 = vld [vmem:[#allocation10 + $0x2a8] sm:$0xff] }
 0x2f7   : > { %9267 = vmatpush3.msra.mxu1 %v5818_v42  ;;  %9345 = vmatpush3.msra.mxu0 %v6157_v44  ;;  %v11677_v44 = vld [vmem:[#allocation3 + $0x82] sm:$0xff] }
 0x2f8   : > { %9268 = vmatprep.subr.mxu1 %v5817_v32  ;;  %9346 = vmatprep.subr.mxu0 %v6156_v45 }
 0x2f9   : > { %9148 = vmatmul.mubr.f32.gmra.mxu1 %v12829_v39  ;;  %9225 = vmatmul.mubr.f32.gmra.mxu0 %v12829_v39  ;;  %v5772_v39 = vld [vmem:[#allocation3 + $0x2] sm:$0xff] }
 0x2fa   : > { %9150 = vmatprep.mubr.f32.mxu1 %v12830_v35  ;;  %9227 = vmatprep.mubr.f32.mxu0 %v12830_v35  ;;  %v11631_v35 = vpop.f32.mrf.mxu1 }
 0x2fb   : > { %9269 = vmatpush3.msra.mxu1 %v5817_v32  ;;  %9347 = vmatpush3.msra.mxu0 %v6156_v45 }
 0x2fc   : > { %9270 = vmatprep.subr.mxu1 %v5816_v15  ;;  %9348 = vmatprep.subr.mxu0 %v6155_v50  ;;  %v3855_v2 = vpop.f32.mrf.mxu1 }
 0x2fd   : > { %9151 = vmatmul.mubr.f32.gmra.mxu1 %v12831_v29  ;;  %9228 = vmatmul.mubr.f32.gmra.mxu0 %v12831_v29  ;;  %v6499_v29 = vld [vmem:[#allocation10 + $0x470] sm:$0xff] }
 0x2fe   : > { %9153 = vmatprep.mubr.f32.mxu1 %v12832_v37  ;;  %9230 = vmatprep.mubr.f32.mxu0 %v12832_v37 }
 0x2ff   : > { %9271 = vmatpush3.msra.mxu1 %v5816_v15  ;;  %9349 = vmatpush3.msra.mxu0 %v6155_v50  ;;  %v11681_v15 = vld [vmem:[#allocation3 + $0x92] sm:$0xff] }
 0x300   : > { %9272 = vmatprep.subr.mxu1 %v5815_v14  ;;  %9350 = vmatprep.subr.mxu0 %v6154_v21  ;;  %v6494_v50 = vld [vmem:[#allocation10 + $0x448] sm:$0xff] }
 0x301   : > { %9154 = vmatmul.mubr.f32.gmra.mxu1 %v12833_v43  ;;  %9231 = vmatmul.mubr.f32.gmra.mxu0 %v12833_v43  ;;  %v11635_v43 = vld [vmem:[#allocation3 + $0x32] sm:$0xff] }
 0x302   : > { %9156 = vmatprep.mubr.f32.mxu1 %v11389_v8  ;;  %9233 = vmatprep.mubr.f32.mxu0 %v11389_v8  ;;  %v5812_v8 = vld [vmem:[#allocation10 + $0x118] sm:$0xff] }
 0x303   : > { %9273 = vmatpush3.msra.mxu1 %v5815_v14  ;;  %9351 = vmatpush3.msra.mxu0 %v6154_v21 }
 0x304   : > { %9274 = vmatprep.subr.mxu1 %v5814_v1  ;;  %9352 = vmatprep.subr.mxu0 %v6153_v53 }
 0x305   : > { %9157 = vmatmul.mubr.f32.gmra.mxu1 %v11376_v23  ;;  %9234 = vmatmul.mubr.f32.gmra.mxu0 %v11376_v23  ;;  %v5811_v23 = vld [vmem:[#allocation10 + $0x110] sm:$0xff] }
 0x306   : > { %9159 = vmatprep.mubr.f32.mxu1 %v11416_v46  ;;  %9236 = vmatprep.mubr.f32.mxu0 %v11416_v46  ;;  %v6150_v46 = vld [vmem:[#allocation10 + $0x298] sm:$0xff] }
 0x307   : > { %9275 = vmatpush3.msra.mxu1 %v5814_v1  ;;  %9353 = vmatpush3.msra.mxu0 %v6153_v53 }
 0x308   : > { %9276 = vmatprep.subr.mxu1 %v5813_v63  ;;  %9354 = vmatprep.subr.mxu0 %v6152_v40 }
 0x309   : > { %9160 = vmatmul.mubr.f32.gmra.mxu1 %v11403_v56  ;;  %9237 = vmatmul.mubr.f32.gmra.mxu0 %v11403_v56  ;;  %v5810_v56 = vld [vmem:[#allocation10 + $0x108] sm:$0xff] }
 0x30a   : > { %9162 = vmatprep.mubr.f32.mxu1 %v11438_v28  ;;  %9239 = vmatprep.mubr.f32.mxu0 %v11438_v28  ;;  %v6149_v28 = vld [vmem:[#allocation10 + $0x290] sm:$0xff] }
 0x30b   : > { %9277 = vmatpush3.msra.mxu1 %v5813_v63  ;;  %9355 = vmatpush3.msra.mxu0 %v6152_v40  ;;  %v11689_v63 = vld [vmem:[#allocation3 + $0x9a] sm:$0xff] }
 0x30c   : > { %9278 = vmatprep.subr.mxu1 %v5812_v8  ;;  %9356 = vmatprep.subr.mxu0 %v6151_v5 }
 0x30d   : > { %9163 = vmatmul.mubr.f32.gmra.mxu1 %v11428_v51  ;;  %9240 = vmatmul.mubr.f32.gmra.mxu0 %v11428_v51  ;;  %v5809_v51 = vld [vmem:[#allocation10 + $0x100] sm:$0xff] }
 0x30e   : > { %9165 = vmatprep.mubr.f32.mxu1 %v11456_v62  ;;  %9242 = vmatprep.mubr.f32.mxu0 %v11456_v62  ;;  %v6148_v62 = vld [vmem:[#allocation10 + $0x288] sm:$0xff] }
 0x30f   : > { %9279 = vmatpush3.msra.mxu1 %v5812_v8  ;;  %9357 = vmatpush3.msra.mxu0 %v6151_v5  ;;  %v11693_v5 = vld [vmem:[#allocation3 + $0xaa] sm:$0xff] }
 0x310   : > { %9280 = vmatprep.subr.mxu1 %v5811_v23  ;;  %9358 = vmatprep.subr.mxu0 %v6150_v46 }
 0x311   : > { %9166 = vmatmul.mubr.f32.gmra.mxu1 %v11447_v55  ;;  %9243 = vmatmul.mubr.f32.gmra.mxu0 %v11447_v55  ;;  %v4756_v55 = vld [vmem:[#allocation3 + $0x199] sm:$0xff] }
 0x312   : > { %9168 = vmatprep.mubr.f32.mxu1 %v11474_v11  ;;  %9245 = vmatprep.mubr.f32.mxu0 %v11474_v11  ;;  %v6500_v11 = vld [vmem:[#allocation10 + $0x478] sm:$0xff] }
 0x313   : > { %9281 = vmatpush3.msra.mxu1 %v5811_v23  ;;  %9359 = vmatpush3.msra.mxu0 %v6150_v46  ;;  %v6493_v23 = vld [vmem:[#allocation10 + $0x440] sm:$0xff] }
 0x314   : > { %9282 = vmatprep.subr.mxu1 %v5810_v56  ;;  %9360 = vmatprep.subr.mxu0 %v6149_v28 }
 0x315   : > { %9169 = vmatmul.mubr.f32.gmra.mxu1 %v11465_v59  ;;  %9246 = vmatmul.mubr.f32.gmra.mxu0 %v11465_v59  ;;  %v4757_v59 = vld [vmem:[#allocation3 + $0x1a1] sm:$0xff] }
 0x316   : > { %9171 = vmatprep.mubr.f32.mxu1 %v11491_v57  ;;  %9248 = vmatprep.mubr.f32.mxu0 %v11491_v57  ;;  %v6147_v57 = vld [vmem:[#allocation10 + $0x280] sm:$0xff] }
 0x317   : > { %9283 = vmatpush3.msra.mxu1 %v5810_v56  ;;  %9361 = vmatpush3.msra.mxu0 %v6149_v28 }
 0x318   : > { %9284 = vmatprep.subr.mxu1 %v5809_v51  ;;  %9362 = vmatprep.subr.mxu0 %v6148_v62 }
 0x319   : > { %9172 = vmatmul.mubr.f32.gmra.mxu1 %v11483_v24  ;;  %9249 = vmatmul.mubr.f32.gmra.mxu0 %v11483_v24  ;;  %v5775_v24 = vld [vmem:[#allocation3 + $0x22] sm:$0xff] }
 0x31a   : > { %9285 = vmatpush3.msra.mxu1 %v5809_v51  ;;  %9251 = vmatprep.mubr.f32.mxu0 %v4756_v55 }
 0x31b   : > { %9286 = vmatprep.mubr.f32.mxu1 %v5772_v39  ;;  %9414 = vmatprep.subr.mxu1 %v6500_v11 }
 0x31c   : > { %9363 = vmatpush3.msra.mxu0 %v6148_v62  ;;  %v11701_v62 = vld [vmem:[#allocation3 + $0xb2] sm:$0xff] }
 0x31d   : > { %9252 = vmatmul.mubr.f32.gmra.mxu0 %v4757_v59  ;;  %9287 = vmatmul.mubr.f32.vlgmr.msra.gmra.mxu1 %v5773_v27  ;;  %v6492_v59 = vld [vmem:[#allocation10 + $0x438] sm:$0xff] }
 0x31e   : > { %9289 = vmatprep.mubr.f32.mxu1 %v5774_v58  ;;  %9366 = vmatprep.mubr.f32.mxu0 %v5774_v58 }
 0x31f   : > { %9415 = vmatpush3.msra.mxu1 %v6500_v11  ;;  %9364 = vmatprep.subr.mxu0 %v6147_v57  ;;  %v8811_v37 = vpop.f32.mrf.mxu1  ;;  %v11705_v11 = vld [vmem:[#allocation3 + $0xc2] sm:$0xff] }
 0x320   : > { %9365 = vmatpush3.msra.mxu0 %v6147_v57  ;;  %9416 = vmatprep.subr.mxu1 %v6499_v29  ;;  %v11633_v6 = vpop.f32.mrf.mxu0 }
 0x321   : > { %9290 = vmatmul.mubr.f32.gmra.mxu1 %v5775_v24  ;;  %9367 = vmatmul.mubr.f32.vlgmr.msra.gmra.mxu0 %v5775_v24  ;;  %v3865_v49 = vpop.f32.mrf.mxu1 }
 0x322   : > { %9292 = vmatprep.mubr.f32.mxu1 %v11635_v43  ;;  %9369 = vmatprep.mubr.f32.mxu0 %v11635_v43  ;;  %v4129_v34 = vpop.f32.mrf.mxu0 }
 0x323   : > { %9417 = vmatpush3.msra.mxu1 %v6499_v29  ;;  %v11639_v3 = vadd.f32 %v4129_v34, %v3855_v2  ;;  %v11713_v2 = vld [vmem:[#allocation3 + $0xca] sm:$0xff] }
 0x324   : > { %9418 = vmatprep.subr.mxu1 %v6498_v31  ;;  %v8814_v33 = vpop.f32.mrf.mxu1  ;;  %v8891_v38 = vpop.f32.mrf.mxu0 }
 0x325   : > { %9293 = vmatmul.mubr.f32.gmra.mxu1 %v11641_v20  ;;  %9370 = vmatmul.mubr.f32.gmra.mxu0 %v11641_v20  ;;  %v11647_v17 = vadd.f32 %v8891_v38, %v8811_v37 }
 0x326   : > { %9295 = vmatprep.mubr.f32.mxu1 %v11645_v10  ;;  %9372 = vmatprep.mubr.f32.mxu0 %v11645_v10  ;;  %v3875_v22 = vpop.f32.mrf.mxu1  ;;  %v4139_v48 = vpop.f32.mrf.mxu0 }
 0x327   : > { %9419 = vmatpush3.msra.mxu1 %v6498_v31  ;;  %v11651_v36 = vadd.f32 %v4139_v48, %v3865_v49  ;;  %v11717_v31 = vld [vmem:[#allocation3 + $0xda] sm:$0xff] }
 0x328   : > { %9420 = vmatprep.subr.mxu1 %v6497_v41  ;;  %v8817_v13 = vpop.f32.mrf.mxu1  ;;  %v8894_v19 = vpop.f32.mrf.mxu0  ;;  %v6491_v49 = vld [vmem:[#allocation10 + $0x430] sm:$0xff] }
 0x329   : > { %9296 = vmatmul.mubr.f32.gmra.mxu1 %v11653_v18  ;;  %9373 = vmatmul.mubr.f32.gmra.mxu0 %v11653_v18  ;;  %v11659_v52 = vadd.f32 %v8894_v19, %v8814_v33  ;;  %v11729_v19 = vld [vmem:[#allocation3 + $0xf2] sm:$0xff] }
 0x32a   : > { %9298 = vmatprep.mubr.f32.mxu1 %v11657_v61  ;;  %9375 = vmatprep.mubr.f32.mxu0 %v11657_v61  ;;  %v3885_v60 = vpop.f32.mrf.mxu1  ;;  %v4149_v26 = vpop.f32.mrf.mxu0 }
 0x32b   : > { %9421 = vmatpush3.msra.mxu1 %v6497_v41  ;;  %v11663_v4 = vadd.f32 %v4149_v26, %v3875_v22  ;;  %v11725_v22 = vld [vmem:[#allocation3 + $0xe2] sm:$0xff] }
 0x32c   : > { %9422 = vmatprep.subr.mxu1 %v6496_v12  ;;  %v8820_v30 = vpop.f32.mrf.mxu1  ;;  %v8897_v0 = vpop.f32.mrf.mxu0 }
 0x32d   : > { %9299 = vmatmul.mubr.f32.gmra.mxu1 %v11665_v9  ;;  %9376 = vmatmul.mubr.f32.gmra.mxu0 %v11665_v9  ;;  %v11671_v7 = vadd.f32 %v8897_v0, %v8817_v13 }
 0x32e   : > { %9301 = vmatprep.mubr.f32.mxu1 %v11669_v25  ;;  %9378 = vmatprep.mubr.f32.mxu0 %v11669_v25  ;;  %v3895_v47 = vpop.f32.mrf.mxu1  ;;  %v4159_v16 = vpop.f32.mrf.mxu0 }
 0x32f   : > { %9423 = vmatpush3.msra.mxu1 %v6496_v12  ;;  %v11675_v42 = vadd.f32 %v4159_v16, %v3885_v60  ;;  %v6490_v12 = vld [vmem:[#allocation10 + $0x428] sm:$0xff] }
 0x330   : > { %9424 = vmatprep.subr.mxu1 %v6495_v54  ;;  %v8823_v32 = vpop.f32.mrf.mxu1  ;;  %v8900_v45 = vpop.f32.mrf.mxu0 }
 0x331   : > { %9302 = vmatmul.mubr.f32.gmra.mxu1 %v11677_v44  ;;  %9379 = vmatmul.mubr.f32.gmra.mxu0 %v11677_v44  ;;  %v11683_v14 = vadd.f32 %v8900_v45, %v8820_v30  ;;  %v6489_v45 = vld [vmem:[#allocation10 + $0x420] sm:$0xff] }
 0x332   : > { %9304 = vmatprep.mubr.f32.mxu1 %v11681_v15  ;;  %9381 = vmatprep.mubr.f32.mxu0 %v11681_v15  ;;  %v3905_v21 = vpop.f32.mrf.mxu1  ;;  %v4169_v1 = vpop.f32.mrf.mxu0 }
 0x333   : > { %9425 = vmatpush3.msra.mxu1 %v6495_v54  ;;  %v11687_v53 = vadd.f32 %v4169_v1, %v3895_v47  ;;  %v11737_v54 = vld [vmem:[#allocation3 + $0xfa] sm:$0xff] }
 0x334   : > { %9426 = vmatprep.subr.mxu1 %v6494_v50  ;;  %v8826_v40 = vpop.f32.mrf.mxu1  ;;  %v8903_v8 = vpop.f32.mrf.mxu0 }
 0x335   : > { %9305 = vmatmul.mubr.f32.gmra.mxu1 %v11689_v63  ;;  %9382 = vmatmul.mubr.f32.gmra.mxu0 %v11689_v63  ;;  %v11695_v46 = vadd.f32 %v8903_v8, %v8823_v32  ;;  %v11741_v32 = vld [vmem:[#allocation3 + $0x10a] sm:$0xff]  ;;  %v11749_v8 = vld [vmem:[#allocation3 + $0x112] sm:$0xff] }
 0x336   : > { %9307 = vmatprep.mubr.f32.mxu1 %v11693_v5  ;;  %9384 = vmatprep.mubr.f32.mxu0 %v11693_v5  ;;  %v3915_v56 = vpop.f32.mrf.mxu1  ;;  %v4179_v28 = vpop.f32.mrf.mxu0 }
 0x337   : > { %9427 = vmatpush3.msra.mxu1 %v6494_v50  ;;  %v11699_v51 = vadd.f32 %v4179_v28, %v3905_v21  ;;  %v11753_v28 = vld [vmem:[#allocation3 + $0x122] sm:$0xff] }
 0x338   : > { %9428 = vmatprep.subr.mxu1 %v6493_v23 }
 0x339   : > { %v8829_v55 = vpop.f32.mrf.mxu1  ;;  %v8906_v39 = vpop.f32.mrf.mxu0  ;;  %9308 = vmatmul.mubr.f32.gmra.mxu1 %v11701_v62  ;;  %9385 = vmatmul.mubr.f32.gmra.mxu0 %v11701_v62 }
 0x33a   : > { %v11707_v27 = vadd.f32 %v8906_v39, %v8826_v40  ;;  %9310 = vmatprep.mubr.f32.mxu1 %v11705_v11  ;;  %9387 = vmatprep.mubr.f32.mxu0 %v11705_v11 }
 0x33b   : > { %9429 = vmatpush3.msra.mxu1 %v6493_v23  ;;  %v3925_v57 = vpop.f32.mrf.mxu1  ;;  %v4189_v58 = vpop.f32.mrf.mxu0 }
 0x33c   : > { %v11711_v29 = vadd.f32 %v4189_v58, %v3915_v56  ;;  %9430 = vmatprep.subr.mxu1 %v6492_v59 }
 0x33d   : > { %v8832_v24 = vpop.f32.mrf.mxu1  ;;  %v8909_v37 = vpop.f32.mrf.mxu0  ;;  %9311 = vmatmul.mubr.f32.gmra.mxu1 %v11713_v2  ;;  %9388 = vmatmul.mubr.f32.gmra.mxu0 %v11713_v2 }
 0x33e   : > { %v11719_v34 = vadd.f32 %v8909_v37, %v8829_v55  ;;  %9313 = vmatprep.mubr.f32.mxu1 %v11717_v31  ;;  %9390 = vmatprep.mubr.f32.mxu0 %v11717_v31  ;;  %v6488_v55 = vld [vmem:[#allocation10 + $0x418] sm:$0xff] }
 0x33f   : > { %9431 = vmatpush3.msra.mxu1 %v6492_v59  ;;  %v3935_v33 = vpop.f32.mrf.mxu1  ;;  %v4199_v38 = vpop.f32.mrf.mxu0 }
 0x340   : > { %v11723_v41 = vadd.f32 %v4199_v38, %v3925_v57  ;;  %9432 = vmatprep.subr.mxu1 %v6491_v49  ;;  %v6487_v38 = vld [vmem:[#allocation10 + $0x410] sm:$0xff] }
 0x341   : > { %v8835_v48 = vpop.f32.mrf.mxu1  ;;  %v8912_v13 = vpop.f32.mrf.mxu0  ;;  %9314 = vmatmul.mubr.f32.gmra.mxu1 %v11725_v22  ;;  %9391 = vmatmul.mubr.f32.gmra.mxu0 %v11725_v22 }
 0x342   : > { %v11731_v60 = vadd.f32 %v8912_v13, %v8832_v24  ;;  %9316 = vmatprep.mubr.f32.mxu1 %v11729_v19  ;;  %9393 = vmatprep.mubr.f32.mxu0 %v11729_v19  ;;  %v11761_v24 = vld [vmem:[#allocation3 + $0x12a] sm:$0xff] }
 0x343   : > { %9433 = vmatpush3.msra.mxu1 %v6491_v49  ;;  %v3945_v26 = vpop.f32.mrf.mxu1  ;;  %v4209_v30 = vpop.f32.mrf.mxu0 }
 0x344   : > { %v11735_v0 = vadd.f32 %v4209_v30, %v3935_v33  ;;  %9434 = vmatprep.subr.mxu1 %v6490_v12  ;;  %v11765_v33 = vld [vmem:[#allocation3 + $0x13a] sm:$0xff]  ;;  %v11773_v30 = vld [vmem:[#allocation3 + $0x142] sm:$0xff] }
 0x345   : > { %v8838_v47 = vpop.f32.mrf.mxu1  ;;  %v8915_v16 = vpop.f32.mrf.mxu0  ;;  %9317 = vmatmul.mubr.f32.gmra.mxu1 %v11737_v54  ;;  %9394 = vmatmul.mubr.f32.gmra.mxu0 %v11737_v54 }
 0x346   : > { %v11743_v50 = vadd.f32 %v8915_v16, %v8835_v48  ;;  %9319 = vmatprep.mubr.f32.mxu1 %v11741_v32  ;;  %9396 = vmatprep.mubr.f32.mxu0 %v11741_v32 }
 0x347   : > { %9435 = vmatpush3.msra.mxu1 %v6490_v12  ;;  %v3955_v21 = vpop.f32.mrf.mxu1  ;;  %v4219_v1 = vpop.f32.mrf.mxu0 }
 0x348   : > { %v11747_v40 = vadd.f32 %v4219_v1, %v3945_v26  ;;  %9436 = vmatprep.subr.mxu1 %v6489_v45 }
 0x349   : > { %v8841_v23 = vpop.f32.mrf.mxu1  ;;  %v8918_v56 = vpop.f32.mrf.mxu0  ;;  %9320 = vmatmul.mubr.f32.gmra.mxu1 %v11749_v8  ;;  %9397 = vmatmul.mubr.f32.gmra.mxu0 %v11749_v8 }
 0x34a   : > { %v11755_v39 = vadd.f32 %v8918_v56, %v8838_v47  ;;  %9322 = vmatprep.mubr.f32.mxu1 %v11753_v28  ;;  %9399 = vmatprep.mubr.f32.mxu0 %v11753_v28 }
 0x34b   : > { %9437 = vmatpush3.msra.mxu1 %v6489_v45  ;;  %v3965_v59 = vpop.f32.mrf.mxu1  ;;  %v4229_v57 = vpop.f32.mrf.mxu0  ;;  %v11777_v45 = vld [vmem:[#allocation3 + $0x152] sm:$0xff] }
 0x34c   : > { %v11759_v58 = vadd.f32 %v4229_v57, %v3955_v21  ;;  %9438 = vmatprep.subr.mxu1 %v6488_v55  ;;  %v6486_v21 = vld [vmem:[#allocation10 + $0x408] sm:$0xff] }
 0x34d   : > { %v8844_v37 = vpop.f32.mrf.mxu1  ;;  %v8921_v49 = vpop.f32.mrf.mxu0  ;;  %9323 = vmatmul.mubr.f32.gmra.mxu1 %v11761_v24  ;;  %9400 = vmatmul.mubr.f32.gmra.mxu0 %v11761_v24 }
 0x34e   : > { %v11767_v48 = vadd.f32 %v8921_v49, %v8841_v23  ;;  %9325 = vmatprep.mubr.f32.mxu1 %v11765_v33  ;;  %9402 = vmatprep.mubr.f32.mxu0 %v11765_v33 }
 0x34f   : > { %9439 = vmatpush3.msra.mxu1 %v6488_v55  ;;  %v3975_v13 = vpop.f32.mrf.mxu1  ;;  %v4239_v12 = vpop.f32.mrf.mxu0 }
 0x350   : > { %v11771_v26 = vadd.f32 %v4239_v12, %v3965_v59  ;;  %9440 = vmatprep.subr.mxu1 %v6487_v38  ;;  %v11785_v59 = vld [vmem:[#allocation3 + $0x15a] sm:$0xff]  ;;  %v6485_v12 = vld [vmem:[#allocation10 + $0x400] sm:$0xff] }
 0x351   : > { %v8847_v47 = vpop.f32.mrf.mxu1  ;;  %v8924_v16 = vpop.f32.mrf.mxu0  ;;  %9326 = vmatmul.mubr.f32.gmra.mxu1 %v11773_v30  ;;  %9403 = vmatmul.mubr.f32.gmra.mxu0 %v11773_v30 }
 0x352   : > { %12834 = vst [vmem:[#allocation22_spill] sm:$0xff] %v11771_v26  ;;  %v11779_v1 = vadd.f32 %v8924_v16, %v8844_v37  ;;  %9328 = vmatprep.mubr.f32.mxu1 %v11777_v45  ;;  %9405 = vmatprep.mubr.f32.mxu0 %v11777_v45  ;;  %v11789_v37 = vld [vmem:[#allocation3 + $0x16a] sm:$0xff] }
 0x353   : > { %9441 = vmatpush3.msra.mxu1 %v6487_v38  ;;  %v3985_v23 = vpop.f32.mrf.mxu1  ;;  %v4249_v56 = vpop.f32.mrf.mxu0  ;;  %12837 = vst [vmem:[#allocation25_spill] sm:$0xff] %v11789_v37 }
 0x354   : > { %12835 = vst [vmem:[#allocation23_spill] sm:$0xff] %v11779_v1  ;;  %v11783_v55 = vadd.f32 %v4249_v56, %v3975_v13  ;;  %9442 = vmatprep.subr.mxu1 %v6486_v21 }
 0x355   : > { %v8850_v57 = vpop.f32.mrf.mxu1  ;;  %v8927_v49 = vpop.f32.mrf.mxu0  ;;  %9329 = vmatmul.mubr.f32.gmra.mxu1 %v11785_v59  ;;  %9406 = vmatmul.mubr.f32.gmra.mxu0 %v11785_v59 }
 0x356   : > { %12836 = vst [vmem:[#allocation24_spill] sm:$0xff] %v11783_v55  ;;  %v11791_v16 = vadd.f32 %v8927_v49, %v8847_v47  ;;  %9331 = vmatprep.mubr.f32.mxu1 %v11789_v37  ;;  %9408 = vmatprep.mubr.f32.mxu0 %v11789_v37  ;;  %v11797_v55 = vld [vmem:[#allocation3 + $0x172] sm:$0xff]  ;;  %v11801_v47 = vld [vmem:[#allocation3 + $0x182] sm:$0xff] }
 0x357   : > { %9443 = vmatpush3.msra.mxu1 %v6486_v21  ;;  %v3995_v38 = vpop.f32.mrf.mxu1  ;;  %v4259_v13 = vpop.f32.mrf.mxu0  ;;  %12840 = vst [vmem:[#allocation28_spill] sm:$0xff] %v11797_v55 }
 0x358   : > { %12838 = vst [vmem:[#allocation26_spill] sm:$0xff] %v11791_v16  ;;  %v11795_v56 = vadd.f32 %v4259_v13, %v3985_v23  ;;  %9444 = vmatprep.subr.mxu1 %v6485_v12  ;;  %v4321_v13 = vadd.f32 %v11633_v6, %v11631_v35  ;;  %v11811_v16 = vld [vmem:[#allocation3 + $0x18a] sm:$0xff] }
 0x359   : > { %v8853_v1 = vpop.f32.mrf.mxu1  ;;  %v8930_v26 = vpop.f32.mrf.mxu0  ;;  %9332 = vmatmul.mubr.f32.gmra.mxu1 %v11797_v55  ;;  %9409 = vmatmul.mubr.f32.gmra.mxu0 %v11797_v55 }
 0x35a   : > { %12839 = vst [vmem:[#allocation27_spill] sm:$0xff] %v11795_v56  ;;  %v11803_v49 = vadd.f32 %v8930_v26, %v8850_v57  ;;  %9411 = vmatprep.mubr.f32.mxu0 %v11801_v47  ;;  %9445 = vmatpush3.msra.mxu1 %v6485_v12 }
 0x35b   : > { %9446 = vmatprep.mubr.f32.mxu1 %v11635_v43  ;;  %v4005_v21 = vpop.f32.mrf.mxu1  ;;  %v4269_v23 = vpop.f32.mrf.mxu0 }
 0x35c   : > { %12841 = vst [vmem:[#allocation29_spill] sm:$0xff] %v11803_v49  ;;  %v11809_v56 = vadd.f32 %v4269_v23, %v3995_v38 }
 0x35d   : > { %v8933_v37 = vpop.f32.mrf.mxu0  ;;  %v8968_v55 = vpop.f32.mrf.mxu1  ;;  %9412 = vmatmul.mubr.f32.gmra.mxu0 %v11811_v16  ;;  %9447 = vmatmul.mubr.f32.vlgmr.msra.gmra.mxu1 %v11641_v20 }
 0x35e   : > { %12842 = vst [vmem:[#allocation30_spill] sm:$0xff] %v11809_v56  ;;  %v11815_v26 = vadd.f32 %v8933_v37, %v8853_v1  ;;  %v4659_v57 = vadd.f32 %v8968_v55, %v4321_v13  ;;  %9449 = vmatprep.mubr.f32.mxu1 %v11645_v10 }
 0x35f   : > { %v4279_v43 = vpop.f32.mrf.mxu0  ;;  %v4467_v12 = vpop.f32.mrf.mxu1 }
 0x360   : > { %v11818_v49 = vadd.f32 %v4279_v43, %v4005_v21  ;;  %v4658_v35 = vadd.f32 %v4467_v12, %v11639_v3 }
 0x361   : > { %v8971_v6 = vpop.f32.mrf.mxu1  ;;  %v9048_v38 = vpop.f32.mrf.mxu0  ;;  %9450 = vmatmul.mubr.f32.gmra.mxu1 %v11653_v18 }
 0x362   : > { %v4661_v23 = vadd.f32 %v8971_v6, %v11647_v17  ;;  %v11823_v56 = vadd.f32 %v9048_v38, %v4659_v57  ;;  %9452 = vmatprep.mubr.f32.mxu1 %v11657_v61 }
 0x363   : > { %v4477_v20 = vpop.f32.mrf.mxu1  ;;  %v4841_v1 = vpop.f32.mrf.mxu0 }
 0x364   : > { %v4660_v10 = vadd.f32 %v4477_v20, %v11651_v36  ;;  %v11827_v55 = vadd.f32 %v4841_v1, %v4658_v35 }
 0x365   : > { %v8974_v37 = vpop.f32.mrf.mxu1  ;;  %v9051_v21 = vpop.f32.mrf.mxu0  ;;  %9453 = vmatmul.mubr.f32.gmra.mxu1 %v11665_v9 }
 0x366   : > { %v4663_v3 = vadd.f32 %v8974_v37, %v11659_v52  ;;  %v11831_v13 = vadd.f32 %v9051_v21, %v4661_v23  ;;  %9455 = vmatprep.mubr.f32.mxu1 %v11669_v25 }
 0x367   : > { %v4487_v17 = vpop.f32.mrf.mxu1  ;;  %v4851_v18 = vpop.f32.mrf.mxu0 }
 0x368   : > { %v4662_v61 = vadd.f32 %v4487_v17, %v11663_v4  ;;  %v11835_v57 = vadd.f32 %v4851_v18, %v4660_v10 }
 0x369   : > { %v8977_v43 = vpop.f32.mrf.mxu1  ;;  %v9054_v36 = vpop.f32.mrf.mxu0  ;;  %9456 = vmatmul.mubr.f32.gmra.mxu1 %v11677_v44 }
 0x36a   : > { %v4665_v12 = vadd.f32 %v8977_v43, %v11671_v7  ;;  %v11839_v35 = vadd.f32 %v9054_v36, %v4663_v3  ;;  %9458 = vmatprep.mubr.f32.mxu1 %v11681_v15 }
 0x36b   : > { %v4497_v52 = vpop.f32.mrf.mxu1  ;;  %v4861_v9 = vpop.f32.mrf.mxu0 }
 0x36c   : > { %v4664_v25 = vadd.f32 %v4497_v52, %v11675_v42  ;;  %v11843_v6 = vadd.f32 %v4861_v9, %v4662_v61 }
 0x36d   : > { %v8980_v38 = vpop.f32.mrf.mxu1  ;;  %v9057_v4 = vpop.f32.mrf.mxu0  ;;  %9459 = vmatmul.mubr.f32.gmra.mxu1 %v11689_v63 }
 0x36e   : > { %v4667_v23 = vadd.f32 %v8980_v38, %v11683_v14  ;;  %v11847_v20 = vadd.f32 %v9057_v4, %v4665_v12  ;;  %9461 = vmatprep.mubr.f32.mxu1 %v11693_v5 }
 0x36f   : > { %v4507_v7 = vpop.f32.mrf.mxu1  ;;  %v4871_v44 = vpop.f32.mrf.mxu0 }
 0x370   : > { %v4666_v15 = vadd.f32 %v4507_v7, %v11687_v53  ;;  %v11851_v1 = vadd.f32 %v4871_v44, %v4664_v25 }
 0x371   : > { %v8983_v10 = vpop.f32.mrf.mxu1  ;;  %v9060_v42 = vpop.f32.mrf.mxu0  ;;  %9462 = vmatmul.mubr.f32.gmra.mxu1 %v11701_v62 }
 0x372   : > { %v4669_v37 = vadd.f32 %v8983_v10, %v11695_v46  ;;  %v11855_v21 = vadd.f32 %v9060_v42, %v4667_v23  ;;  %9464 = vmatprep.mubr.f32.mxu1 %v11705_v11 }
 0x373   : > { %v4517_v14 = vpop.f32.mrf.mxu1  ;;  %v4881_v63 = vpop.f32.mrf.mxu0 }
 0x374   : > { %v4668_v5 = vadd.f32 %v4517_v14, %v11699_v51  ;;  %v11859_v3 = vadd.f32 %v4881_v63, %v4666_v15 }
 0x375   : > { %v8986_v17 = vpop.f32.mrf.mxu1  ;;  %v9063_v53 = vpop.f32.mrf.mxu0  ;;  %9465 = vmatmul.mubr.f32.gmra.mxu1 %v11713_v2 }
 0x376   : > { %v4671_v18 = vadd.f32 %v8986_v17, %v11707_v27  ;;  %v11863_v61 = vadd.f32 %v9063_v53, %v4669_v37  ;;  %9467 = vmatprep.mubr.f32.mxu1 %v11717_v31 }
 0x377   : > { %v4527_v46 = vpop.f32.mrf.mxu1  ;;  %v4891_v62 = vpop.f32.mrf.mxu0 }
 0x378   : > { %v4670_v11 = vadd.f32 %v4527_v46, %v11711_v29  ;;  %v11867_v43 = vadd.f32 %v4891_v62, %v4668_v5 }
 0x379   : > { %v8989_v36 = vpop.f32.mrf.mxu1  ;;  %v9066_v51 = vpop.f32.mrf.mxu0  ;;  %9468 = vmatmul.mubr.f32.gmra.mxu1 %v11725_v22 }
 0x37a   : > { %v4673_v12 = vadd.f32 %v8989_v36, %v11719_v34  ;;  %v11871_v52 = vadd.f32 %v9066_v51, %v4671_v18  ;;  %9470 = vmatprep.mubr.f32.mxu1 %v11729_v19  ;;  %v12843_v18 = vld [vmem:[#allocation22_spill] sm:$0xff] }
 0x37b   : > { %v4537_v27 = vpop.f32.mrf.mxu1  ;;  %v4901_v2 = vpop.f32.mrf.mxu0 }
 0x37c   : > { %v4672_v31 = vadd.f32 %v4537_v27, %v11723_v41  ;;  %v11875_v9 = vadd.f32 %v4901_v2, %v4670_v11  ;;  %v12844_v11 = vld [vmem:[#allocation23_spill] sm:$0xff]  ;;  %v12846_v27 = vld [vmem:[#allocation24_spill] sm:$0xff] }
 0x37d   : > { %v8992_v25 = vpop.f32.mrf.mxu1  ;;  %v9069_v29 = vpop.f32.mrf.mxu0  ;;  %9471 = vmatmul.mubr.f32.gmra.mxu1 %v11737_v54 }
 0x37e   : > { %v4675_v38 = vadd.f32 %v8992_v25, %v11731_v60  ;;  %v11879_v4 = vadd.f32 %v9069_v29, %v4673_v12  ;;  %9473 = vmatprep.mubr.f32.mxu1 %v11741_v32  ;;  %v12847_v29 = vld [vmem:[#allocation28_spill] sm:$0xff] }
 0x37f   : > { %v4547_v34 = vpop.f32.mrf.mxu1  ;;  %v4911_v22 = vpop.f32.mrf.mxu0 }
 0x380   : > { %v4674_v19 = vadd.f32 %v4547_v34, %v11735_v0  ;;  %v11883_v23 = vadd.f32 %v4911_v22, %v4672_v31 }
 0x381   : > { %v8995_v7 = vpop.f32.mrf.mxu1  ;;  %v9072_v41 = vpop.f32.mrf.mxu0  ;;  %9474 = vmatmul.mubr.f32.gmra.mxu1 %v11749_v8 }
 0x382   : > { %v4677_v44 = vadd.f32 %v8995_v7, %v11743_v50  ;;  %v11887_v15 = vadd.f32 %v9072_v41, %v4675_v38  ;;  %9476 = vmatprep.mubr.f32.mxu1 %v11753_v28  ;;  %v12848_v38 = vld [vmem:[#allocation26_spill] sm:$0xff]  ;;  %v5806_v7 = vld [vmem:[#allocation3 + $0x19a] sm:$0xff]  ;;  %v12849_v41 = vld [vmem:[#allocation27_spill] sm:$0xff] }
 0x383   : > { %v4557_v60 = vpop.f32.mrf.mxu1  ;;  %v4921_v54 = vpop.f32.mrf.mxu0 }
 0x384   : > { %v4676_v32 = vadd.f32 %v4557_v60, %v11747_v40  ;;  %v11891_v10 = vadd.f32 %v4921_v54, %v4674_v19 }
 0x385   : > { %v8998_v42 = vpop.f32.mrf.mxu1  ;;  %v9075_v0 = vpop.f32.mrf.mxu0  ;;  %9477 = vmatmul.mubr.f32.gmra.mxu1 %v11761_v24 }
 0x386   : > { %v4679_v37 = vadd.f32 %v8998_v42, %v11755_v39  ;;  %v11895_v14 = vadd.f32 %v9075_v0, %v4677_v44  ;;  %9479 = vmatprep.mubr.f32.mxu1 %v11765_v33  ;;  %v12850_v42 = vld [vmem:[#allocation29_spill] sm:$0xff] }
 0x387   : > { %v4567_v50 = vpop.f32.mrf.mxu1  ;;  %v4931_v8 = vpop.f32.mrf.mxu0 }
 0x388   : > { %v4678_v28 = vadd.f32 %v4567_v50, %v11759_v58  ;;  %v11899_v63 = vadd.f32 %v4931_v8, %v4676_v32  ;;  %v5807_v50 = vld [vmem:[#allocation3 + $0x1a2] sm:$0xff] }
 0x389   : > { %v9001_v5 = vpop.f32.mrf.mxu1  ;;  %v9078_v40 = vpop.f32.mrf.mxu0  ;;  %9480 = vmatmul.mubr.f32.gmra.mxu1 %v11773_v30  ;;  %v12845_v30 = vld [vmem:[#allocation25_spill] sm:$0xff] }
 0x38a   : > { %v4681_v17 = vadd.f32 %v9001_v5, %v11767_v48  ;;  %v11903_v53 = vadd.f32 %v9078_v40, %v4679_v37  ;;  %9482 = vmatprep.mubr.f32.mxu1 %v11777_v45 }
 0x38b   : > { %v4577_v39 = vpop.f32.mrf.mxu1  ;;  %v4941_v24 = vpop.f32.mrf.mxu0 }
 0x38c   : > { %v4680_v33 = vadd.f32 %v4577_v39, %v12843_v18  ;;  %v11907_v46 = vadd.f32 %v4941_v24, %v4678_v28 }
 0x38d   : > { %v9004_v62 = vpop.f32.mrf.mxu1  ;;  %v9081_v58 = vpop.f32.mrf.mxu0  ;;  %9483 = vmatmul.mubr.f32.gmra.mxu1 %v11785_v59 }
 0x38e   : > { %v4683_v36 = vadd.f32 %v9004_v62, %v12844_v11  ;;  %v11911_v51 = vadd.f32 %v9081_v58, %v4681_v17  ;;  %9485 = vmatprep.mubr.f32.mxu1 %v12845_v30 }
 0x38f   : > { %v4587_v48 = vpop.f32.mrf.mxu1  ;;  %v4951_v12 = vpop.f32.mrf.mxu0 }
 0x390   : > { %v4682_v45 = vadd.f32 %v4587_v48, %v12846_v27  ;;  %v11915_v2 = vadd.f32 %v4951_v12, %v4680_v33 }
 0x391   : > { %v9007_v31 = vpop.f32.mrf.mxu1  ;;  %v9084_v25 = vpop.f32.mrf.mxu0  ;;  %9486 = vmatmul.mubr.f32.gmra.mxu1 %v12847_v29 }
 0x392   : > { %v4685_v34 = vadd.f32 %v9007_v31, %v12848_v38  ;;  %v11919_v22 = vadd.f32 %v9084_v25, %v4683_v36  ;;  %9488 = vmatprep.mubr.f32.mxu1 %v11801_v47  ;;  %v12851_v47 = vld [vmem:[#allocation30_spill] sm:$0xff] }
 0x393   : > { %v4597_v59 = vpop.f32.mrf.mxu1  ;;  %v4961_v19 = vpop.f32.mrf.mxu0 }
 0x394   : > { %v4684_v44 = vadd.f32 %v4597_v59, %v12849_v41  ;;  %v11923_v60 = vadd.f32 %v4961_v19, %v4682_v45 }
 0x395   : > { %v9010_v54 = vpop.f32.mrf.mxu1  ;;  %v9087_v32 = vpop.f32.mrf.mxu0  ;;  %9489 = vmatmul.mubr.f32.gmra.mxu1 %v11811_v16 }
 0x396   : > { %v4687_v0 = vadd.f32 %v9010_v54, %v12850_v42  ;;  %v11927_v37 = vadd.f32 %v9087_v32, %v4685_v34  ;;  %9491 = vmatprep.mubr.f32.mxu1 %v5806_v7 }
 0x397   : > { %v4607_v8 = vpop.f32.mrf.mxu1  ;;  %v4971_v28 = vpop.f32.mrf.mxu0 }
 0x398   : > { %v4686_v5 = vadd.f32 %v4607_v8, %v12851_v47  ;;  %v11930_v40 = vadd.f32 %v4971_v28, %v4684_v44 }
 0x399   : > { %v9013_v17 = vpop.f32.mrf.mxu1  ;;  %v9090_v39 = vpop.f32.mrf.mxu0  ;;  %9492 = vmatmul.mubr.f32.gmra.mxu1 %v5807_v50 }
 0x39a   : > { %v4689_v24 = vadd.f32 %v9013_v17, %v11815_v26  ;;  %v11933_v18 = vadd.f32 %v9090_v39, %v4687_v0 }
 0x39b   : > { %v4617_v16 = vpop.f32.mrf.mxu1  ;;  %v4981_v33 = vpop.f32.mrf.mxu0 }
 0x39c   : > { %v4688_v62 = vadd.f32 %v4617_v16, %v11818_v49  ;;  %v11936_v58 = vadd.f32 %v4981_v33, %v4686_v5 }
 0x39d   : > { %v9093_v11 = vpop.f32.mrf.mxu0  ;;  %v9128_v36 = vpop.f32.mrf.mxu1 }
 0x39e   : > { %v11938_v30 = vadd.f32 %v9093_v11, %v4689_v24  ;;  %v11941_v48 = vadd.f32 %v9128_v36, %v11823_v56 }
 0x39f   : > { %v4991_v12 = vpop.f32.mrf.mxu0  ;;  %v5179_v27 = vpop.f32.mrf.mxu1 }
 0x3a0   : > { %v11943_v45 = vadd.f32 %v4991_v12, %v4688_v62  ;;  %v11946_v26 = vadd.f32 %v5179_v27, %v11827_v55 }
 0x3a1   : > { %v9131_v31 = vpop.f32.mrf.mxu1  ;;  %v11948_v25 = vpop.f32.mrf.mxu0 }
 0x3a2   : > { %v11951_v49 = vadd.f32 %v9131_v31, %v11831_v13 }
 0x3a3   : > { %v5189_v29 = vpop.f32.mrf.mxu1  ;;  %v11953_v38 = vpop.f32.mrf.mxu0 }
 0x3a4   : > { %v11956_v34 = vadd.f32 %v5189_v29, %v11835_v57 }
 0x3a5   : > { %v9134_v56 = vpop.f32.mrf.mxu1  ;;  %v11958_v59 = vpop.f32.mrf.mxu0 }
 0x3a6   : > { %v11961_v19 = vadd.f32 %v9134_v56, %v11839_v35 }
 0x3a7   : > { %v5199_v55 = vpop.f32.mrf.mxu1  ;;  %v11963_v7 = vpop.f32.mrf.mxu0 }
 0x3a8   : > { %v11966_v41 = vadd.f32 %v5199_v55, %v11843_v6 }
 0x3a9   : > { %v9137_v13 = vpop.f32.mrf.mxu1  ;;  %v11968_v44 = vpop.f32.mrf.mxu0 }
 0x3aa   : > { %v11971_v54 = vadd.f32 %v9137_v13, %v11847_v20 }
 0x3ab   : > { %v5209_v57 = vpop.f32.mrf.mxu1  ;;  %v11973_v32 = vpop.f32.mrf.mxu0 }
 0x3ac   : > { %v11976_v42 = vadd.f32 %v5209_v57, %v11851_v1 }
 0x3ad   : > { %v9140_v35 = vpop.f32.mrf.mxu1  ;;  %v11978_v0 = vpop.f32.mrf.mxu0 }
 0x3ae   : > { %v11981_v50 = vadd.f32 %v9140_v35, %v11855_v21 }
 0x3af   : > { %v5219_v6 = vpop.f32.mrf.mxu1  ;;  %v11983_v8 = vpop.f32.mrf.mxu0 }
 0x3b0   : > { %v11986_v28 = vadd.f32 %v5219_v6, %v11859_v3 }
 0x3b1   : > { %v9143_v20 = vpop.f32.mrf.mxu1  ;;  %v11988_v47 = vpop.f32.mrf.mxu0 }
 0x3b2   : > { %v11991_v5 = vadd.f32 %v9143_v20, %v11863_v61 }
 0x3b3   : > { %v5229_v1 = vpop.f32.mrf.mxu1  ;;  %v11993_v17 = vpop.f32.mrf.mxu0 }
 0x3b4   : > { %v11996_v39 = vadd.f32 %v5229_v1, %v11867_v43 }
 0x3b5   : > { %v9146_v21 = vpop.f32.mrf.mxu1  ;;  %v11998_v24 = vpop.f32.mrf.mxu0 }
 0x3b6   : > { %v12001_v16 = vadd.f32 %v9146_v21, %v11871_v52 }
 0x3b7   : > { %v5239_v3 = vpop.f32.mrf.mxu1  ;;  %v12003_v33 = vpop.f32.mrf.mxu0 }
 0x3b8   : > { %v12006_v62 = vadd.f32 %v5239_v3, %v11875_v9 }
 0x3b9   : > { %v9149_v61 = vpop.f32.mrf.mxu1  ;;  %v12008_v11 = vpop.f32.mrf.mxu0 }
 0x3ba   : > { %v12011_v36 = vadd.f32 %v9149_v61, %v11879_v4 }
 0x3bb   : > { %v5249_v43 = vpop.f32.mrf.mxu1  ;;  %v12013_v12 = vpop.f32.mrf.mxu0 }
 0x3bc   : > { %12852 = vst [vmem:[#allocation88_spill] sm:$0xff] %v12011_v36  ;;  %v12016_v27 = vadd.f32 %v5249_v43, %v11883_v23 }
 0x3bd   : > { %v9152_v52 = vpop.f32.mrf.mxu1  ;;  %v12018_v31 = vpop.f32.mrf.mxu0 }
 0x3be   : > { %12853 = vst [vmem:[#allocation31_spill] sm:$0xff] %v12016_v27  ;;  %12854 = vst [vmem:[#allocation32_spill] sm:$0xff] %v12018_v31  ;;  %v12021_v29 = vadd.f32 %v9152_v52, %v11887_v15 }
 0x3bf   : > { %v5259_v9 = vpop.f32.mrf.mxu1  ;;  %v12023_v56 = vpop.f32.mrf.mxu0 }
 0x3c0   : > { %12855 = vst [vmem:[#allocation36_spill] sm:$0xff] %v12021_v29  ;;  %12856 = vst [vmem:[#allocation37_spill] sm:$0xff] %v12023_v56  ;;  %v12026_v55 = vadd.f32 %v5259_v9, %v11891_v10 }
 0x3c1   : > { %v9155_v4 = vpop.f32.mrf.mxu1  ;;  %v12028_v13 = vpop.f32.mrf.mxu0 }
 0x3c2   : > { %12857 = vst [vmem:[#allocation90_spill] sm:$0xff] %v12026_v55  ;;  %12858 = vst [vmem:[#allocation89_spill] sm:$0xff] %v12028_v13  ;;  %v12031_v57 = vadd.f32 %v9155_v4, %v11895_v14 }
 0x3c3   : > { %v5269_v23 = vpop.f32.mrf.mxu1  ;;  %v12033_v35 = vpop.f32.mrf.mxu0 }
 0x3c4   : > { %12859 = vst [vmem:[#allocation38_spill] sm:$0xff] %v12031_v57  ;;  %12860 = vst [vmem:[#allocation41_spill] sm:$0xff] %v12033_v35  ;;  %v12036_v6 = vadd.f32 %v5269_v23, %v11899_v63 }
 0x3c5   : > { %v9158_v15 = vpop.f32.mrf.mxu1  ;;  %v12038_v20 = vpop.f32.mrf.mxu0 }
 0x3c6   : > { %12861 = vst [vmem:[#allocation92_spill] sm:$0xff] %v12036_v6  ;;  %12862 = vst [vmem:[#allocation91_spill] sm:$0xff] %v12038_v20  ;;  %v12041_v1 = vadd.f32 %v9158_v15, %v11903_v53 }
 0x3c7   : > { %v5279_v10 = vpop.f32.mrf.mxu1  ;;  %v12043_v21 = vpop.f32.mrf.mxu0 }
 0x3c8   : > { %12863 = vst [vmem:[#allocation33_spill] sm:$0xff] %v12041_v1  ;;  %12864 = vst [vmem:[#allocation39_spill] sm:$0xff] %v12043_v21  ;;  %v12046_v3 = vadd.f32 %v5279_v10, %v11907_v46 }
 0x3c9   : > { %v9161_v14 = vpop.f32.mrf.mxu1  ;;  %v12048_v61 = vpop.f32.mrf.mxu0 }
 0x3ca   : > { %12865 = vst [vmem:[#allocation40_spill] sm:$0xff] %v12046_v3  ;;  %12866 = vst [vmem:[#allocation95_spill] sm:$0xff] %v12048_v61  ;;  %v12051_v43 = vadd.f32 %v9161_v14, %v11911_v51 }
 0x3cb   : > { %v5289_v63 = vpop.f32.mrf.mxu1  ;;  %v12053_v52 = vpop.f32.mrf.mxu0 }
 0x3cc   : > { %12867 = vst [vmem:[#allocation93_spill] sm:$0xff] %v12051_v43  ;;  %12868 = vst [vmem:[#allocation42_spill] sm:$0xff] %v12053_v52  ;;  %v12056_v9 = vadd.f32 %v5289_v63, %v11915_v2 }
 0x3cd   : > { %v9164_v53 = vpop.f32.mrf.mxu1  ;;  %v12058_v4 = vpop.f32.mrf.mxu0 }
 0x3ce   : > { %12869 = vst [vmem:[#allocation45_spill] sm:$0xff] %v12056_v9  ;;  %12870 = vst [vmem:[#allocation98_spill] sm:$0xff] %v12058_v4  ;;  %v12061_v23 = vadd.f32 %v9164_v53, %v11919_v22 }
 0x3cf   : > { %v5299_v46 = vpop.f32.mrf.mxu1  ;;  %v12063_v15 = vpop.f32.mrf.mxu0 }
 0x3d0   : > { %12871 = vst [vmem:[#allocation94_spill] sm:$0xff] %v12061_v23  ;;  %12872 = vst [vmem:[#allocation34_spill] sm:$0xff] %v12063_v15  ;;  %v12066_v10 = vadd.f32 %v5299_v46, %v11923_v60 }
 0x3d1   : > { %v9167_v51 = vpop.f32.mrf.mxu1  ;;  %v12068_v14 = vpop.f32.mrf.mxu0 }
 0x3d2   : > { %12873 = vst [vmem:[#allocation43_spill] sm:$0xff] %v12066_v10  ;;  %12874 = vst [vmem:[#allocation44_spill] sm:$0xff] %v12068_v14  ;;  %v12071_v43 = vadd.f32 %v9167_v51, %v11927_v37 }
 0x3d3   : > { %v5309_v2 = vpop.f32.mrf.mxu1  ;;  %v12073_v63 = vpop.f32.mrf.mxu0 }
 0x3d4   : > { %12875 = vst [vmem:[#allocation101_spill] sm:$0xff] %v12071_v43  ;;  %12876 = vst [vmem:[#allocation96_spill] sm:$0xff] %v12073_v63  ;;  %v12076_v9 = vadd.f32 %v5309_v2, %v11930_v40 }
 0x3d5   : > { %v9170_v22 = vpop.f32.mrf.mxu1  ;;  %v12078_v53 = vpop.f32.mrf.mxu0 }
 0x3d6   : > { %12877 = vst [vmem:[#allocation46_spill] sm:$0xff] %v12076_v9  ;;  %12878 = vst [vmem:[#allocation49_spill] sm:$0xff] %v12078_v53  ;;  %v12081_v23 = vadd.f32 %v9170_v22, %v11933_v18 }
 0x3d7   : > { %v5319_v60 = vpop.f32.mrf.mxu1  ;;  %v12083_v46 = vpop.f32.mrf.mxu0 }
 0x3d8   : > { %12879 = vst [vmem:[#allocation104_spill] sm:$0xff] %v12081_v23  ;;  %12880 = vst [vmem:[#allocation97_spill] sm:$0xff] %v12083_v46  ;;  %v12086_v10 = vadd.f32 %v5319_v60, %v11936_v58 }
 0x3d9   : > { %v9173_v37 = vpop.f32.mrf.mxu1  ;;  %v12088_v51 = vpop.f32.mrf.mxu0 }
 0x3da   : > { %12881 = vst [vmem:[#allocation35_spill] sm:$0xff] %v12086_v10  ;;  %12882 = vst [vmem:[#allocation47_spill] sm:$0xff] %v12088_v51  ;;  %v12091_v43 = vadd.f32 %v9173_v37, %v11938_v30 }
 0x3db   : > { %v5329_v40 = vpop.f32.mrf.mxu1  ;;  %v12093_v2 = vpop.f32.mrf.mxu0 }
 0x3dc   : > { %12883 = vst [vmem:[#allocation48_spill] sm:$0xff] %v12091_v43  ;;  %12884 = vst [vmem:[#allocation107_spill] sm:$0xff] %v12093_v2  ;;  %v12096_v9 = vadd.f32 %v5329_v40, %v11943_v45 }
 0x3dd   : > { %v12098_v18 = vpop.f32.mrf.mxu0  ;;  %v9288_v22 = vpop.f32.mrf.mxu1 }
 0x3de   : > { %12885 = vst [vmem:[#allocation99_spill] sm:$0xff] %v12096_v9  ;;  %12886 = vst [vmem:[#allocation50_spill] sm:$0xff] %v12098_v18 }
 0x3df   : > { %v12100_v23 = vpop.f32.mrf.mxu0  ;;  %v5891_v46 = vpop.f32.mrf.mxu1 }
 0x3e0   : > { %12887 = vst [vmem:[#allocation53_spill] sm:$0xff] %v12100_v23 }
 0x3e1   : > { %v9291_v58 = vpop.f32.mrf.mxu1  ;;  %v9368_v60 = vpop.f32.mrf.mxu0 }
 0x3e3   : > { %v5901_v10 = vpop.f32.mrf.mxu1  ;;  %v6229_v53 = vpop.f32.mrf.mxu0 }
 0x3e5   : > { %v12102_v51 = vpop.f32.mrf.mxu1  ;;  %v9371_v30 = vpop.f32.mrf.mxu0 }
 0x3e7   : > { %v12104_v37 = vpop.f32.mrf.mxu1  ;;  %v12106_v43 = vpop.f32.mrf.mxu0 }
 0x3e9   : > { %v12108_v2 = vpop.f32.mrf.mxu1  ;;  %v12110_v45 = vpop.f32.mrf.mxu0 }
 0x3eb   : > { %v12112_v40 = vpop.f32.mrf.mxu1  ;;  %v12116_v23 = vpop.f32.mrf.mxu0 }
 0x3ed   : > { %v12114_v9 = vpop.f32.mrf.mxu1  ;;  %v12122_v14 = vpop.f32.mrf.mxu0 }
 0x3ef   : > { %v12118_v18 = vpop.f32.mrf.mxu1  ;;  %v12128_v52 = vpop.f32.mrf.mxu0 }
 0x3f1   : > { %v12120_v63 = vpop.f32.mrf.mxu1  ;;  %v12134_v1 = vpop.f32.mrf.mxu0 }
 0x3f3   : > { %v12124_v15 = vpop.f32.mrf.mxu1  ;;  %v12140_v20 = vpop.f32.mrf.mxu0 }
 0x3f5   : > { %v12126_v4 = vpop.f32.mrf.mxu1  ;;  %v12146_v55 = vpop.f32.mrf.mxu0 }
 0x3f7   : > { %v12130_v3 = vpop.f32.mrf.mxu1  ;;  %v12152_v56 = vpop.f32.mrf.mxu0 }
 0x3f8   : > { %12888 = vst [vmem:[#allocation110_spill] sm:$0xff] %v12130_v3 }
 0x3f9   : > { %v12132_v61 = vpop.f32.mrf.mxu1 }
 0x3fa   : > { %12889 = vst [vmem:[#allocation100_spill] sm:$0xff] %v12132_v61 }
 0x3fb   : > { %v12136_v21 = vpop.f32.mrf.mxu1 }
 0x3fc   : > { %12890 = vst [vmem:[#allocation51_spill] sm:$0xff] %v12136_v21  ;;  %v12158_v21 = vpop.f32.mrf.mxu0 }
 0x3fd   : > { %v12138_v6 = vpop.f32.mrf.mxu1 }
 0x3fe   : > { %12891 = vst [vmem:[#allocation52_spill] sm:$0xff] %v12138_v6 }
 0x3ff   : > { %v12142_v57 = vpop.f32.mrf.mxu1 }
 0x400   : > { %12892 = vst [vmem:[#allocation113_spill] sm:$0xff] %v12142_v57  ;;  %v12164_v57 = vpop.f32.mrf.mxu0 }
 0x401   : > { %v12144_v35 = vpop.f32.mrf.mxu1  ;;  %12900 = vst [vmem:[#allocation56_spill] sm:$0xff] %v12164_v57 }
 0x402   : > { %12893 = vst [vmem:[#allocation102_spill] sm:$0xff] %v12144_v35 }
 0x403   : > { %v12148_v13 = vpop.f32.mrf.mxu1 }
 0x404   : > { %12894 = vst [vmem:[#allocation75_spill] sm:$0xff] %v12148_v13  ;;  %v12170_v13 = vpop.f32.mrf.mxu0 }
 0x405   : > { %v12150_v29 = vpop.f32.mrf.mxu1  ;;  %12903 = vst [vmem:[#allocation58_spill] sm:$0xff] %v12170_v13 }
 0x406   : > { %12895 = vst [vmem:[#allocation54_spill] sm:$0xff] %v12150_v29 }
 0x407   : > { %v12154_v61 = vpop.f32.mrf.mxu1 }
 0x408   : > { %12896 = vst [vmem:[#allocation57_spill] sm:$0xff] %v12154_v61  ;;  %v12176_v61 = vpop.f32.mrf.mxu0 }
 0x409   : > { %v12156_v27 = vpop.f32.mrf.mxu1  ;;  %12906 = vst [vmem:[#allocation106_spill] sm:$0xff] %v12176_v61 }
 0x40a   : > { %12897 = vst [vmem:[#allocation116_spill] sm:$0xff] %v12156_v27 }
 0x40b   : > { %v12160_v6 = vpop.f32.mrf.mxu1 }
 0x40c   : > { %12898 = vst [vmem:[#allocation103_spill] sm:$0xff] %v12160_v6  ;;  %v5709_v6 = vadd.f32 %v11948_v25, %v11941_v48  ;;  %v12195_v48 = vld [vmem:[%s12522_s5] ss:$0 sm:$0xff] }
 0x40d   : > { %v12162_v3 = vpop.f32.mrf.mxu1 }
 0x40e   : > { %12899 = vst [vmem:[#allocation55_spill] sm:$0xff] %v12162_v3  ;;  %v6083_v57 = vadd.f32 %v9288_v22, %v5709_v6 }
 0x40f   : > { %v12166_v35 = vpop.f32.mrf.mxu1 }
 0x410   : > { %12901 = vst [vmem:[#allocation119_spill] sm:$0xff] %v12166_v35  ;;  %v5708_v35 = vadd.f32 %v11953_v38, %v11946_v26  ;;  %v6421_v61 = vadd.f32 %v9368_v60, %v6083_v57  ;;  %v5710_v26 = vadd.f32 %v11963_v7, %v11956_v34  ;;  %v5713_v34 = vadd.f32 %v11968_v44, %v11961_v19 }
 0x411   : > { %v12168_v31 = vpop.f32.mrf.mxu1  ;;  %v5712_v7 = vadd.f32 %v11973_v32, %v11966_v41  ;;  %v6822_v41 = vld [vmem:[%s9920_s10] sm:$0xff] }
 0x412   : > { %12902 = vst [vmem:[#allocation105_spill] sm:$0xff] %v12168_v31  ;;  %v12186_v31 = vpop.f32.mrf.mxu0  ;;  %v6084_v57 = vadd.f32 %v5901_v10, %v5710_v26  ;;  %v6087_v19 = vadd.f32 %v12102_v51, %v5713_v34  ;;  %v6825_v51 = vld [vmem:[%s9920_s10 + $0x18] sm:$0xff] }
 0x413   : > { %v12172_v29 = vpop.f32.mrf.mxu1  ;;  %v6086_v44 = vadd.f32 %v12104_v37, %v5712_v7 }
 0x414   : > { %12904 = vst [vmem:[#allocation61_spill] sm:$0xff] %v12172_v29  ;;  %v6082_v29 = vadd.f32 %v5891_v46, %v5708_v35  ;;  %v12199_v6 = vpop.f32.mrf.mxu0 }
 0x415   : > { %v12174_v36 = vpop.f32.mrf.mxu1 }
 0x416   : > { %12905 = vst [vmem:[#allocation122_spill] sm:$0xff] %v12174_v36  ;;  %v5711_v36 = vadd.f32 %v11958_v59, %v11951_v49  ;;  %v6420_v38 = vadd.f32 %v6229_v53, %v6082_v29  ;;  %v12204_v49 = vld [vmem:[%s12523_s6] ss:$0 sm:$0xff]  ;;  %v6422_v29 = vadd.f32 %v12106_v43, %v6084_v57 }
 0x417   : > { %v12178_v27 = vpop.f32.mrf.mxu1 }
 0x418   : > { %12907 = vst [vmem:[#allocation59_spill] sm:$0xff] %v12178_v27  ;;  %v6085_v25 = vadd.f32 %v9291_v58, %v5711_v36  ;;  %v6823_v36 = vld [vmem:[%s9920_s10 + $0x8] sm:$0xff] }
 0x419   : > { %v12182_v3 = vpop.f32.mrf.mxu1 }
 0x41a   : > { %v6423_v35 = vadd.f32 %v9371_v30, %v6085_v25  ;;  %v5715_v30 = vadd.f32 %v11978_v0, %v11971_v54  ;;  %v6425_v54 = vadd.f32 %v12110_v45, %v6087_v19  ;;  %v6424_v0 = vadd.f32 %v12116_v23, %v6086_v44  ;;  %v6824_v45 = vld [vmem:[%s9920_s10 + $0x10] sm:$0xff]  ;;  %v6827_v44 = vld [vmem:[%s9920_s10 + $0x28] sm:$0xff] }
 0x41b   : > { %v12188_v13 = vpop.f32.mrf.mxu1 }
 0x41d   : > { %v9448_v27 = vpop.f32.mrf.mxu1 }
 0x41e   : > { %v6759_v22 = vadd.f32 %v9448_v27, %v6421_v61  ;;  %v12213_v61 = vpop.f32.mrf.mxu0 }
 0x41f   : > { %v6567_v59 = vpop.f32.mrf.mxu1 }
 0x420   : > { %v6894_v46 = vmul.f32 %v12195_v48, %v6759_v22  ;;  %v6758_v60 = vadd.f32 %v6567_v59, %v6420_v38  ;;  %v5714_v22 = vadd.f32 %v11983_v8, %v11976_v42  ;;  %v6089_v59 = vadd.f32 %v12108_v2, %v5715_v30  ;;  %v12230_v57 = vpop.f32.mrf.mxu0 }
 0x421   : > { %v9451_v27 = vpop.f32.mrf.mxu1  ;;  %v5717_v42 = vadd.f32 %v11988_v47, %v11981_v50  ;;  %v5716_v50 = vadd.f32 %v11993_v17, %v11986_v28  ;;  %v5719_v28 = vadd.f32 %v11998_v24, %v11991_v5  ;;  %v5718_v17 = vadd.f32 %v12003_v33, %v11996_v39 }
 0x422   : > { %v6933_v53 = vadd.f32 %v12204_v49, %v6894_v46  ;;  %v6893_v10 = vmul.f32 %v12195_v48, %v6758_v60  ;;  %v6761_v58 = vadd.f32 %v9451_v27, %v6423_v35  ;;  %v6088_v8 = vadd.f32 %v12112_v40, %v5714_v22 }
 0x423   : > { %v6577_v32 = vpop.f32.mrf.mxu1  ;;  %v6427_v2 = vadd.f32 %v12122_v14, %v6089_v59  ;;  %v6091_v47 = vadd.f32 %v12114_v9, %v5717_v42  ;;  %v5721_v5 = vadd.f32 %v12008_v11, %v12001_v16  ;;  %v6090_v39 = vadd.f32 %v12118_v18, %v5716_v50 }
 0x424   : > { %v6965_v26 = vadd.f32 %v6933_v53, %v6823_v36  ;;  %v6932_v43 = vadd.f32 %v12204_v49, %v6893_v10  ;;  %v6896_v25 = vmul.f32 %v12195_v48, %v6761_v58  ;;  %v6760_v38 = vadd.f32 %v6577_v32, %v6422_v29  ;;  %v12250_v58 = vpop.f32.mrf.mxu0 }
 0x425   : > { %v9454_v37 = vpop.f32.mrf.mxu1  ;;  %v6426_v14 = vadd.f32 %v12128_v52, %v6088_v8  ;;  %v6429_v52 = vadd.f32 %v12134_v1, %v6091_v47  ;;  %v6093_v24 = vadd.f32 %v12120_v63, %v5719_v28  ;;  %v6829_v1 = vld [vmem:[%s9920_s10 + $0x38] sm:$0xff]  ;;  %v6092_v16 = vadd.f32 %v12124_v15, %v5718_v17  ;;  %v12911_v17 = vld [vmem:[#allocation31_spill] sm:$0xff] }
 0x426   : > { %v6997_v35 = vmax.f32 %v6965_v26, 0.0  ;;  %v6964_v46 = vadd.f32 %v6932_v43, %v6822_v41  ;;  %v6935_v60 = vadd.f32 %v12204_v49, %v6896_v25  ;;  %v6895_v34 = vmul.f32 %v12195_v48, %v6760_v38  ;;  %v6826_v26 = vld [vmem:[%s9920_s10 + $0x20] sm:$0xff] }
 0x427   : > { %v6763_v7 = vadd.f32 %v9454_v37, %v6425_v54  ;;  %v6587_v23 = vpop.f32.mrf.mxu1  ;;  %v6428_v11 = vadd.f32 %v12140_v20, %v6090_v39  ;;  %v6431_v63 = vadd.f32 %v12146_v55, %v6093_v24  ;;  %v6430_v15 = vadd.f32 %v12152_v56, %v6092_v16  ;;  %v6831_v55 = vld [vmem:[%s9920_s10 + $0x48] sm:$0xff] }
 0x428   : > { %7029 = vst [vmem:[%s12241_s14 + $0x8] sm:$0xff] %v6997_v35  ;;  %v6996_v36 = vmax.f32 %v6964_v46, 0.0  ;;  %v6967_v27 = vadd.f32 %v6935_v60, %v6825_v51  ;;  %v6934_v29 = vadd.f32 %v12204_v49, %v6895_v34  ;;  %v6762_v53 = vadd.f32 %v6587_v23, %v6424_v0  ;;  %v12270_v0 = vpop.f32.mrf.mxu0  ;;  %v6828_v60 = vld [vmem:[%s9920_s10 + $0x30] sm:$0xff] }
 0x429   : > { %v6898_v40 = vmul.f32 %v12195_v48, %v6763_v7  ;;  %v9457_v10 = vpop.f32.mrf.mxu1  ;;  %v5720_v7 = vadd.f32 %v12013_v12, %v12006_v62  ;;  %v6095_v23 = vadd.f32 %v12126_v4, %v5721_v5  ;;  %v12909_v62 = vld [vmem:[#allocation32_spill] sm:$0xff]  ;;  %v12910_v4 = vld [vmem:[#allocation110_spill] sm:$0xff] }
 0x42a   : > { %7028 = vst [vmem:[%s12241_s14] sm:$0xff] %v6996_v36  ;;  %v6999_v30 = vmax.f32 %v6967_v27, 0.0  ;;  %v6966_v19 = vadd.f32 %v6934_v29, %v6824_v45  ;;  %v6897_v41 = vmul.f32 %v12195_v48, %v6762_v53  ;;  %v6765_v32 = vadd.f32 %v9457_v10, %v6427_v2  ;;  %v12287_v27 = vpop.f32.mrf.mxu0 }
 0x42b   : > { %v6937_v9 = vadd.f32 %v12204_v49, %v6898_v40  ;;  %v6597_v43 = vpop.f32.mrf.mxu1  ;;  %v6094_v56 = vadd.f32 %v12910_v4, %v5720_v7  ;;  %v6433_v40 = vadd.f32 %v12158_v21, %v6095_v23  ;;  %v12920_v7 = vld [vmem:[#allocation52_spill] sm:$0xff] }
 0x42c   : > { %7031 = vst [vmem:[%s12241_s14 + $0x18] sm:$0xff] %v6999_v30  ;;  %v6998_v25 = vmax.f32 %v6966_v19, 0.0  ;;  %v6936_v38 = vadd.f32 %v12204_v49, %v6897_v41  ;;  %v6900_v22 = vmul.f32 %v12195_v48, %v6765_v32  ;;  %v6764_v59 = vadd.f32 %v6597_v43, %v6426_v14  ;;  %v12908_v14 = vld [vmem:[#allocation88_spill] sm:$0xff]  ;;  %v6830_v41 = vld [vmem:[%s9920_s10 + $0x40] sm:$0xff]  ;;  %v12914_v43 = vld [vmem:[#allocation89_spill] sm:$0xff]  ;;  %v12306_v39 = vpop.f32.mrf.mxu0 }
 0x42d   : > { %v6969_v33 = vadd.f32 %v6937_v9, %v6827_v44  ;;  %v9460_v54 = vpop.f32.mrf.mxu1  ;;  %v5723_v12 = vadd.f32 %v12909_v62, %v12908_v14 }
 0x42e   : > { %7030 = vst [vmem:[%s12241_s14 + $0x10] sm:$0xff] %v6998_v25  ;;  %v6968_v51 = vadd.f32 %v6936_v38, %v6826_v26  ;;  %v6939_v37 = vadd.f32 %v12204_v49, %v6900_v22  ;;  %v6899_v35 = vmul.f32 %v12195_v48, %v6764_v59  ;;  %v6767_v46 = vadd.f32 %v9460_v54, %v6429_v52  ;;  %v12912_v52 = vld [vmem:[#allocation37_spill] sm:$0xff]  ;;  %v12913_v26 = vld [vmem:[#allocation36_spill] sm:$0xff]  ;;  %v6833_v59 = vld [vmem:[%s9920_s10 + $0x58] sm:$0xff] }
 0x42f   : > { %v7001_v18 = vmax.f32 %v6969_v33, 0.0  ;;  %v6607_v34 = vpop.f32.mrf.mxu1  ;;  %v5722_v9 = vadd.f32 %v12912_v52, %v12911_v17  ;;  %v5725_v25 = vadd.f32 %v12914_v43, %v12913_v26  ;;  %v12915_v38 = vld [vmem:[#allocation56_spill] sm:$0xff] }
 0x430   : > { %v7000_v42 = vmax.f32 %v6968_v51, 0.0  ;;  %v6971_v8 = vadd.f32 %v6939_v37, %v6829_v1  ;;  %v6938_v2 = vadd.f32 %v12204_v49, %v6899_v35  ;;  %v6902_v45 = vmul.f32 %v12195_v48, %v6767_v46  ;;  %v12916_v51 = vld [vmem:[#allocation90_spill] sm:$0xff]  ;;  %v12917_v37 = vld [vmem:[#allocation41_spill] sm:$0xff]  ;;  %v12918_v46 = vld [vmem:[#allocation100_spill] sm:$0xff] }
 0x431   : > { %7033 = vst [vmem:[%s12241_s14 + $0x28] sm:$0xff] %v7001_v18  ;;  %v6766_v20 = vadd.f32 %v6607_v34, %v6428_v11  ;;  %v9463_v36 = vpop.f32.mrf.mxu1  ;;  %v6432_v21 = vadd.f32 %v12915_v38, %v6094_v56  ;;  %v5724_v35 = vadd.f32 %v12917_v37, %v12916_v51  ;;  %v6097_v16 = vadd.f32 %v12918_v46, %v5723_v12  ;;  %v12919_v11 = vld [vmem:[#allocation51_spill] sm:$0xff]  ;;  %v12923_v56 = vld [vmem:[#allocation38_spill] sm:$0xff]  ;;  %v12926_v43 = vld [vmem:[#allocation92_spill] sm:$0xff] }
 0x432   : > { %7032 = vst [vmem:[%s12241_s14 + $0x20] sm:$0xff] %v7000_v42  ;;  %v7003_v29 = vmax.f32 %v6971_v8, 0.0  ;;  %v6970_v53 = vadd.f32 %v6938_v2, %v6828_v60  ;;  %v6941_v50 = vadd.f32 %v12204_v49, %v6902_v45  ;;  %v6769_v47 = vadd.f32 %v9463_v36, %v6431_v63  ;;  %v6832_v60 = vld [vmem:[%s9920_s10 + $0x50] sm:$0xff]  ;;  %v12930_v46 = vld [vmem:[#allocation95_spill] sm:$0xff] }
 0x433   : > { %v6901_v10 = vmul.f32 %v12195_v48, %v6766_v20  ;;  %v6617_v30 = vpop.f32.mrf.mxu1  ;;  %v6096_v63 = vadd.f32 %v12919_v11, %v5722_v9  ;;  %v6099_v23 = vadd.f32 %v12920_v7, %v5725_v25  ;;  %v12922_v20 = vld [vmem:[#allocation106_spill] sm:$0xff]  ;;  %v12927_v25 = vld [vmem:[#allocation39_spill] sm:$0xff]  ;;  %v12931_v11 = vld [vmem:[#allocation40_spill] sm:$0xff] }
 0x434   : > { %7035 = vst [vmem:[%s12241_s14 + $0x38] sm:$0xff] %v7003_v29  ;;  %v7002_v19 = vmax.f32 %v6970_v53, 0.0  ;;  %v6973_v44 = vadd.f32 %v6941_v50, %v6831_v55  ;;  %v6904_v32 = vmul.f32 %v12195_v48, %v6769_v47  ;;  %v6768_v28 = vadd.f32 %v6617_v30, %v6430_v15  ;;  %v12921_v15 = vld [vmem:[#allocation58_spill] sm:$0xff]  ;;  %v6835_v53 = vld [vmem:[%s9920_s10 + $0x68] sm:$0xff]  ;;  %v12323_v47 = vpop.f32.mrf.mxu0  ;;  %v12925_v30 = vld [vmem:[#allocation113_spill] sm:$0xff] }
 0x435   : > { %v6940_v22 = vadd.f32 %v12204_v49, %v6901_v10  ;;  %v9466_v5 = vpop.f32.mrf.mxu1  ;;  %v6435_v55 = vadd.f32 %v12921_v15, %v6097_v16  ;;  %v6434_v36 = vadd.f32 %v12922_v20, %v6096_v63  ;;  %v5726_v38 = vadd.f32 %v12927_v25, %v12926_v43  ;;  %v12932_v63 = vld [vmem:[#allocation42_spill] sm:$0xff]  ;;  %v12935_v20 = vld [vmem:[#allocation75_spill] sm:$0xff]  ;;  %v12938_v43 = vld [vmem:[#allocation45_spill] sm:$0xff] }
 0x436   : > { %7034 = vst [vmem:[%s12241_s14 + $0x30] sm:$0xff] %v7002_v19  ;;  %v7005_v24 = vmax.f32 %v6973_v44, 0.0  ;;  %v6943_v33 = vadd.f32 %v12204_v49, %v6904_v32  ;;  %v6903_v1 = vmul.f32 %v12195_v48, %v6768_v28  ;;  %v6771_v54 = vadd.f32 %v9466_v5, %v6433_v40  ;;  %v12924_v40 = vld [vmem:[#allocation91_spill] sm:$0xff]  ;;  %v12934_v15 = vld [vmem:[#allocation98_spill] sm:$0xff] }
 0x437   : > { %v6972_v18 = vadd.f32 %v6940_v22, %v6830_v41  ;;  %v6627_v34 = vpop.f32.mrf.mxu1  ;;  %v5727_v10 = vadd.f32 %v12924_v40, %v12923_v56  ;;  %v6098_v19 = vadd.f32 %v12925_v30, %v5724_v35  ;;  %v6437_v44 = vadd.f32 %v12186_v31, %v6099_v23  ;;  %v6834_v41 = vld [vmem:[%s9920_s10 + $0x60] sm:$0xff]  ;;  %v12929_v35 = vld [vmem:[#allocation33_spill] sm:$0xff]  ;;  %v12939_v25 = vld [vmem:[#allocation34_spill] sm:$0xff] }
 0x438   : > { %7037 = vst [vmem:[%s12241_s14 + $0x48] sm:$0xff] %v7005_v24  ;;  %v6975_v42 = vadd.f32 %v6943_v33, %v6833_v59  ;;  %v6942_v8 = vadd.f32 %v12204_v49, %v6903_v1  ;;  %v6906_v2 = vmul.f32 %v12195_v48, %v6771_v54  ;;  %v6770_v45 = vadd.f32 %v6627_v34, %v6432_v21  ;;  %v12928_v21 = vld [vmem:[#allocation102_spill] sm:$0xff]  ;;  %v12340_v24 = vpop.f32.mrf.mxu0  ;;  %v6836_v34 = vld [vmem:[%s9920_s10 + $0x70] sm:$0xff] }
 0x439   : > { %v7004_v29 = vmax.f32 %v6972_v18, 0.0  ;;  %v9469_v50 = vpop.f32.mrf.mxu1  ;;  %v6101_v22 = vadd.f32 %v12928_v21, %v5727_v10  ;;  %v6436_v31 = vadd.f32 %v12199_v6, %v6098_v19  ;;  %v6837_v54 = vld [vmem:[%s9920_s10 + $0x78] sm:$0xff]  ;;  %v5729_v16 = vadd.f32 %v12930_v46, %v12929_v35  ;;  %v12933_v23 = vld [vmem:[#allocation93_spill] sm:$0xff]  ;;  %v12940_v21 = vld [vmem:[#allocation116_spill] sm:$0xff] }
 0x43a   : > { %v7007_v14 = vmax.f32 %v6975_v42, 0.0  ;;  %v6974_v62 = vadd.f32 %v6942_v8, %v6832_v60  ;;  %v6945_v12 = vadd.f32 %v12204_v49, %v6906_v2  ;;  %v6905_v4 = vmul.f32 %v12195_v48, %v6770_v45  ;;  %v12937_v10 = vld [vmem:[#allocation57_spill] sm:$0xff]  ;;  %v12942_v35 = vld [vmem:[#allocation44_spill] sm:$0xff] }
 0x43b   : > { %7036 = vst [vmem:[%s12241_s14 + $0x40] sm:$0xff] %v7004_v29  ;;  %v6773_v32 = vadd.f32 %v9469_v50, %v6435_v55  ;;  %v6637_v28 = vpop.f32.mrf.mxu1  ;;  %v5728_v6 = vadd.f32 %v12932_v63, %v12931_v11  ;;  %v6439_v18 = vadd.f32 %v12213_v61, %v6101_v22  ;;  %v5731_v55 = vadd.f32 %v12934_v15, %v12933_v23  ;;  %v12936_v29 = vld [vmem:[#allocation54_spill] sm:$0xff]  ;;  %v6839_v50 = vld [vmem:[%s9920_s10 + $0x88] sm:$0xff]  ;;  %v12946_v23 = vld [vmem:[#allocation101_spill] sm:$0xff] }
 0x43c   : > { %7039 = vst [vmem:[%s12241_s14 + $0x58] sm:$0xff] %v7007_v14  ;;  %v7006_v17 = vmax.f32 %v6974_v62, 0.0  ;;  %v6977_v52 = vadd.f32 %v6945_v12, %v6835_v53  ;;  %v6944_v9 = vadd.f32 %v12204_v49, %v6905_v4  ;;  %v6772_v26 = vadd.f32 %v6637_v28, %v6434_v36  ;;  %v12360_v62 = vpop.f32.mrf.mxu0  ;;  %v12947_v15 = vld [vmem:[#allocation49_spill] sm:$0xff] }
 0x43d   : > { %v6908_v59 = vmul.f32 %v12195_v48, %v6773_v32  ;;  %v9472_v5 = vpop.f32.mrf.mxu1  ;;  %v6100_v36 = vadd.f32 %v12935_v20, %v5726_v38  ;;  %v6103_v61 = vadd.f32 %v12936_v29, %v5729_v16  ;;  %v6102_v30 = vadd.f32 %v12937_v10, %v5728_v6  ;;  %v6838_v32 = vld [vmem:[%s9920_s10 + $0x80] sm:$0xff] }
 0x43e   : > { %7038 = vst [vmem:[%s12241_s14 + $0x50] sm:$0xff] %v7006_v17  ;;  %v7009_v33 = vmax.f32 %v6977_v52, 0.0  ;;  %v6976_v1 = vadd.f32 %v6944_v9, %v6834_v41  ;;  %v6907_v51 = vmul.f32 %v12195_v48, %v6772_v26  ;;  %v6775_v37 = vadd.f32 %v9472_v5, %v6437_v44  ;;  %v12377_v5 = vpop.f32.mrf.mxu0  ;;  %v12943_v16 = vld [vmem:[#allocation103_spill] sm:$0xff] }
 0x43f   : > { %v6947_v60 = vadd.f32 %v12204_v49, %v6908_v59  ;;  %v6647_v42 = vpop.f32.mrf.mxu1  ;;  %v6438_v19 = vadd.f32 %v12230_v57, %v6100_v36  ;;  %v6441_v44 = vadd.f32 %v12250_v58, %v6103_v61  ;;  %v5730_v38 = vadd.f32 %v12939_v25, %v12938_v43  ;;  %v6841_v57 = vld [vmem:[%s9920_s10 + $0x98] sm:$0xff]  ;;  %v6843_v36 = vld [vmem:[%s9920_s10 + $0xa8] sm:$0xff]  ;;  %v12950_v10 = vld [vmem:[#allocation55_spill] sm:$0xff] }
 0x440   : > { %7041 = vst [vmem:[%s12241_s14 + $0x68] sm:$0xff] %v7009_v33  ;;  %v7008_v8 = vmax.f32 %v6976_v1, 0.0  ;;  %v6946_v2 = vadd.f32 %v12204_v49, %v6907_v51  ;;  %v6910_v45 = vmul.f32 %v12195_v48, %v6775_v37  ;;  %v6774_v7 = vadd.f32 %v6647_v42, %v6436_v31  ;;  %v12941_v37 = vld [vmem:[#allocation94_spill] sm:$0xff]  ;;  %v9410_v61 = vpop.f32.mrf.mxu0 }
 0x441   : > { %v6979_v53 = vadd.f32 %v6947_v60, %v6837_v54  ;;  %v9475_v14 = vpop.f32.mrf.mxu1  ;;  %v6105_v22 = vadd.f32 %v12940_v21, %v5731_v55  ;;  %v6440_v31 = vadd.f32 %v12270_v0, %v6102_v30  ;;  %v5733_v46 = vadd.f32 %v12942_v35, %v12941_v37  ;;  %v12955_v35 = vld [vmem:[#allocation61_spill] sm:$0xff] }
 0x442   : > { %7040 = vst [vmem:[%s12241_s14 + $0x60] sm:$0xff] %v7008_v8  ;;  %v6978_v12 = vadd.f32 %v6946_v2, %v6836_v34  ;;  %v6949_v4 = vadd.f32 %v12204_v49, %v6910_v45  ;;  %v6909_v56 = vmul.f32 %v12195_v48, %v6774_v7  ;;  %v6777_v40 = vadd.f32 %v9475_v14, %v6439_v18  ;;  %v6840_v34 = vld [vmem:[%s9920_s10 + $0x90] sm:$0xff]  ;;  %v12944_v2 = vld [vmem:[#allocation43_spill] sm:$0xff]  ;;  %v12945_v45 = vld [vmem:[#allocation96_spill] sm:$0xff] }
 0x443   : > { %v7011_v41 = vmax.f32 %v6979_v53, 0.0  ;;  %v6657_v28 = vpop.f32.mrf.mxu1  ;;  %v6104_v0 = vadd.f32 %v12943_v16, %v5730_v38  ;;  %v6443_v11 = vadd.f32 %v12287_v27, %v6105_v22  ;;  %v5732_v7 = vadd.f32 %v12945_v45, %v12944_v2  ;;  %v6845_v22 = vld [vmem:[%s9920_s10 + $0xb8] sm:$0xff] }
 0x444   : > { %v7010_v17 = vmax.f32 %v6978_v12, 0.0  ;;  %v6981_v52 = vadd.f32 %v6949_v4, %v6839_v50  ;;  %v6948_v9 = vadd.f32 %v12204_v49, %v6909_v56  ;;  %v6912_v26 = vmul.f32 %v12195_v48, %v6777_v40  ;;  %v12948_v4 = vld [vmem:[#allocation46_spill] sm:$0xff]  ;;  %v12949_v56 = vld [vmem:[#allocation97_spill] sm:$0xff] }
 0x445   : > { %7043 = vst [vmem:[%s12241_s14 + $0x78] sm:$0xff] %v7011_v41  ;;  %v6776_v58 = vadd.f32 %v6657_v28, %v6438_v19  ;;  %v9478_v59 = vpop.f32.mrf.mxu1  ;;  %v5735_v55 = vadd.f32 %v12947_v15, %v12946_v23  ;;  %v6442_v27 = vadd.f32 %v12306_v39, %v6104_v0  ;;  %v5734_v40 = vadd.f32 %v12949_v56, %v12948_v4  ;;  %v12951_v39 = vld [vmem:[#allocation119_spill] sm:$0xff]  ;;  %v6847_v23 = vld [vmem:[%s9920_s10 + $0xc8] sm:$0xff] }
 0x446   : > { %7042 = vst [vmem:[%s12241_s14 + $0x70] sm:$0xff] %v7010_v17  ;;  %v7013_v33 = vmax.f32 %v6981_v52, 0.0  ;;  %v6980_v1 = vadd.f32 %v6948_v9, %v6838_v32  ;;  %v6951_v54 = vadd.f32 %v12204_v49, %v6912_v26  ;;  %v6779_v51 = vadd.f32 %v9478_v59, %v6441_v44  ;;  %v6842_v41 = vld [vmem:[%s9920_s10 + $0xa0] sm:$0xff]  ;;  %v12952_v26 = vld [vmem:[#allocation105_spill] sm:$0xff] }
 0x447   : > { %v6911_v63 = vmul.f32 %v12195_v48, %v6776_v58  ;;  %v6667_v6 = vpop.f32.mrf.mxu1  ;;  %v6107_v30 = vadd.f32 %v12950_v10, %v5733_v46  ;;  %v6106_v19 = vadd.f32 %v12951_v39, %v5732_v7  ;;  %v6109_v43 = vadd.f32 %v12952_v26, %v5735_v55  ;;  %v12961_v39 = vld [vmem:[#allocation99_spill] sm:$0xff] }
 0x448   : > { %7045 = vst [vmem:[%s12241_s14 + $0x88] sm:$0xff] %v7013_v33  ;;  %v7012_v18 = vmax.f32 %v6980_v1, 0.0  ;;  %v6983_v60 = vadd.f32 %v6951_v54, %v6841_v57  ;;  %v6914_v42 = vmul.f32 %v12195_v48, %v6779_v51  ;;  %v6778_v8 = vadd.f32 %v6667_v6, %v6440_v31  ;;  %v6369_v57 = vpop.f32.mrf.mxu0  ;;  %v12953_v54 = vld [vmem:[#allocation104_spill] sm:$0xff]  ;;  %v12954_v51 = vld [vmem:[#allocation47_spill] sm:$0xff] }
 0x449   : > { %v6950_v20 = vadd.f32 %v12204_v49, %v6911_v63  ;;  %v9481_v29 = vpop.f32.mrf.mxu1  ;;  %v6445_v25 = vadd.f32 %v12323_v47, %v6107_v30  ;;  %v6444_v38 = vadd.f32 %v12340_v24, %v6106_v19  ;;  %v5737_v37 = vadd.f32 %v12954_v51, %v12953_v54  ;;  %v6844_v24 = vld [vmem:[%s9920_s10 + $0xb0] sm:$0xff] }
 0x44a   : > { %7044 = vst [vmem:[%s12241_s14 + $0x80] sm:$0xff] %v7012_v18  ;;  %v7015_v53 = vmax.f32 %v6983_v60, 0.0  ;;  %v6953_v50 = vadd.f32 %v12204_v49, %v6914_v42  ;;  %v6913_v14 = vmul.f32 %v12195_v48, %v6778_v8  ;;  %v6781_v12 = vadd.f32 %v9481_v29, %v6443_v11  ;;  %v12956_v60 = vld [vmem:[#allocation122_spill] sm:$0xff]  ;;  %v9413_v2 = vpop.f32.mrf.mxu0  ;;  %v12959_v29 = vld [vmem:[#allocation48_spill] sm:$0xff]  ;;  %v12962_v19 = vld [vmem:[#allocation53_spill] sm:$0xff] }
 0x44b   : > { %v6982_v44 = vadd.f32 %v6950_v20, %v6840_v34  ;;  %v6677_v32 = vpop.f32.mrf.mxu1  ;;  %v6108_v46 = vadd.f32 %v12955_v35, %v5734_v40  ;;  %v6447_v47 = vadd.f32 %v12360_v62, %v6109_v43  ;;  %v6111_v34 = vadd.f32 %v12956_v60, %v5737_v37  ;;  %v12958_v20 = vld [vmem:[#allocation107_spill] sm:$0xff]  ;;  %v6851_v35 = vld [vmem:[%s9920_s10 + $0xe8] sm:$0xff] }
 0x44c   : > { %7047 = vst [vmem:[%s12241_s14 + $0x98] sm:$0xff] %v7015_v53  ;;  %v6985_v28 = vadd.f32 %v6953_v50, %v6843_v36  ;;  %v6952_v17 = vadd.f32 %v12204_v49, %v6913_v14  ;;  %v6916_v52 = vmul.f32 %v12195_v48, %v6781_v12  ;;  %v6780_v9 = vadd.f32 %v6677_v32, %v6442_v27  ;;  %v12957_v27 = vld [vmem:[#allocation35_spill] sm:$0xff]  ;;  %v12960_v53 = vld [vmem:[#allocation50_spill] sm:$0xff] }
 0x44d   : > { %v7014_v21 = vmax.f32 %v6982_v44, 0.0  ;;  %v9484_v31 = vpop.f32.mrf.mxu1  ;;  %v6446_v42 = vadd.f32 %v12377_v5, %v6108_v46  ;;  %v5736_v36 = vadd.f32 %v12958_v20, %v12957_v27  ;;  %v5739_v50 = vadd.f32 %v12960_v53, %v12959_v29  ;;  %v6846_v12 = vld [vmem:[%s9920_s10 + $0xc0] sm:$0xff] }
 0x44e   : > { %v7017_v58 = vmax.f32 %v6985_v28, 0.0  ;;  %v6984_v59 = vadd.f32 %v6952_v17, %v6842_v41  ;;  %v6955_v33 = vadd.f32 %v12204_v49, %v6916_v52  ;;  %v6915_v1 = vmul.f32 %v12195_v48, %v6780_v9  ;;  %v12963_v41 = vld [vmem:[#allocation59_spill] sm:$0xff]  ;;  %v6849_v17 = vld [vmem:[%s9920_s10 + $0xd8] sm:$0xff]  ;;  %v6379_v9 = vpop.f32.mrf.mxu0 }
 0x44f   : > { %7046 = vst [vmem:[%s12241_s14 + $0x90] sm:$0xff] %v7014_v21  ;;  %v6783_v16 = vadd.f32 %v9484_v31, %v6445_v25  ;;  %v6687_v0 = vpop.f32.mrf.mxu1  ;;  %v6449_v5 = vadd.f32 %v9410_v61, %v6111_v34  ;;  %v5738_v44 = vadd.f32 %v12962_v19, %v12961_v39  ;;  %v6110_v32 = vadd.f32 %v12963_v41, %v5736_v36 }
 0x450   : > { %7049 = vst [vmem:[%s12241_s14 + $0xa8] sm:$0xff] %v7017_v58  ;;  %v7016_v11 = vmax.f32 %v6984_v59, 0.0  ;;  %v6987_v63 = vadd.f32 %v6955_v33, %v6845_v22  ;;  %v6954_v6 = vadd.f32 %v12204_v49, %v6915_v1  ;;  %v6782_v18 = vadd.f32 %v6687_v0, %v6444_v38 }
 0x451   : > { %v6918_v8 = vmul.f32 %v12195_v48, %v6783_v16  ;;  %v9487_v62 = vpop.f32.mrf.mxu1  ;;  %v6113_v61 = vadd.f32 %v12182_v3, %v5739_v50  ;;  %v6112_v21 = vadd.f32 %v12188_v13, %v5738_v44  ;;  %v6448_v22 = vadd.f32 %v6369_v57, %v6110_v32  ;;  %v6848_v3 = vld [vmem:[%s9920_s10 + $0xd0] sm:$0xff] }
 0x452   : > { %7048 = vst [vmem:[%s12241_s14 + $0xa0] sm:$0xff] %v7016_v11  ;;  %v7019_v45 = vmax.f32 %v6987_v63, 0.0  ;;  %v6986_v7 = vadd.f32 %v6954_v6, %v6844_v24  ;;  %v6917_v15 = vmul.f32 %v12195_v48, %v6782_v18  ;;  %v6785_v55 = vadd.f32 %v9487_v62, %v6447_v47  ;;  %v6850_v18 = vld [vmem:[%s9920_s10 + $0xe0] sm:$0xff] }
 0x453   : > { %v6957_v14 = vadd.f32 %v12204_v49, %v6918_v8  ;;  %v6697_v4 = vpop.f32.mrf.mxu1  ;;  %v6451_v31 = vadd.f32 %v9413_v2, %v6113_v61  ;;  %v6450_v37 = vadd.f32 %v6379_v9, %v6112_v21  ;;  %v6853_v8 = vld [vmem:[%s9920_s10 + $0xf8] sm:$0xff] }
 0x454   : > { %7051 = vst [vmem:[%s12241_s14 + $0xb8] sm:$0xff] %v7019_v45  ;;  %v7018_v56 = vmax.f32 %v6986_v7, 0.0  ;;  %v6956_v40 = vadd.f32 %v12204_v49, %v6917_v15  ;;  %v6920_v10 = vmul.f32 %v12195_v48, %v6785_v55  ;;  %v6784_v30 = vadd.f32 %v6697_v4, %v6446_v42 }
 0x455   : > { %v6989_v28 = vadd.f32 %v6957_v14, %v6847_v23  ;;  %v9490_v52 = vpop.f32.mrf.mxu1  ;;  %v6852_v23 = vld [vmem:[%s9920_s10 + $0xf0] sm:$0xff]  ;;  %s7061_s10 = scalar_lea.sflag [#allocation7], %s9914_s17 }
 0x456   : > { %7050 = vst [vmem:[%s12241_s14 + $0xb0] sm:$0xff] %v7018_v56  ;;  %v6988_v26 = vadd.f32 %v6956_v40, %v6846_v12  ;;  %v6959_v43 = vadd.f32 %v12204_v49, %v6920_v10  ;;  %v6919_v25 = vmul.f32 %v12195_v48, %v6784_v30  ;;  %v6787_v38 = vadd.f32 %v9490_v52, %v6449_v5 }
 0x457   : > { %v7021_v58 = vmax.f32 %v6989_v28, 0.0  ;;  %v6707_v59 = vpop.f32.mrf.mxu1 }
 0x458   : > { %v7020_v33 = vmax.f32 %v6988_v26, 0.0  ;;  %v6991_v1 = vadd.f32 %v6959_v43, %v6849_v17  ;;  %v6958_v54 = vadd.f32 %v12204_v49, %v6919_v25  ;;  %v6922_v51 = vmul.f32 %v12195_v48, %v6787_v38 }
 0x459   : > { %7053 = vst [vmem:[%s12241_s14 + $0xc8] sm:$0xff] %v7021_v58  ;;  %v6786_v46 = vadd.f32 %v6707_v59, %v6448_v22  ;;  %v9493_v47 = vpop.f32.mrf.mxu1 }
 0x45a   : > { %7052 = vst [vmem:[%s12241_s14 + $0xc0] sm:$0xff] %v7020_v33  ;;  %v7023_v13 = vmax.f32 %v6991_v1, 0.0  ;;  %v6990_v57 = vadd.f32 %v6958_v54, %v6848_v3  ;;  %v6961_v24 = vadd.f32 %v12204_v49, %v6922_v51  ;;  %v6789_v16 = vadd.f32 %v9493_v47, %v6451_v31 }
 0x45b   : > { %v6921_v0 = vmul.f32 %v12195_v48, %v6786_v46  ;;  %v6717_v11 = vpop.f32.mrf.mxu1 }
 0x45c   : > { %7055 = vst [vmem:[%s12241_s14 + $0xd8] sm:$0xff] %v7023_v13  ;;  %v7022_v63 = vmax.f32 %v6990_v57, 0.0  ;;  %v6993_v6 = vadd.f32 %v6961_v24, %v6851_v35  ;;  %v6924_v60 = vmul.f32 %v12195_v48, %v6789_v16  ;;  %v6788_v34 = vadd.f32 %v6717_v11, %v6450_v37 }
 0x45d   : > { %v6960_v42 = vadd.f32 %v12204_v49, %v6921_v0 }
 0x45e   : > { %7054 = vst [vmem:[%s12241_s14 + $0xd0] sm:$0xff] %v7022_v63  ;;  %v7025_v62 = vmax.f32 %v6993_v6, 0.0  ;;  %v6963_v2 = vadd.f32 %v12204_v49, %v6924_v60  ;;  %v6923_v45 = vmul.f32 %v12195_v48, %v6788_v34 }
 0x45f   : > { %v6992_v7 = vadd.f32 %v6960_v42, %v6850_v18 }
 0x460   : > { %7057 = vst [vmem:[%s12241_s14 + $0xe8] sm:$0xff] %v7025_v62  ;;  %v6995_v15 = vadd.f32 %v6963_v2, %v6853_v8  ;;  %v6962_v55 = vadd.f32 %v12204_v49, %v6923_v45 }
 0x461   : > { %v7024_v27 = vmax.f32 %v6992_v7, 0.0 }
 0x462   : > { %v7027_v20 = vmax.f32 %v6995_v15, 0.0  ;;  %v6994_v36 = vadd.f32 %v6962_v55, %v6852_v23 }
 0x463   : > { %7056 = vst [vmem:[%s12241_s14 + $0xe0] sm:$0xff] %v7024_v27 }
 0x464   : > { %7059 = vst [vmem:[%s12241_s14 + $0xf8] sm:$0xff] %v7027_v20  ;;  %v7026_v48 = vmax.f32 %v6994_v36, 0.0 }
 0x466   : > { %7058 = vst [vmem:[%s12241_s14 + $0xf0] sm:$0xff] %v7026_v48 }
 0x467   : > { %9672 = shalt.err (!%p9669_p3)
}
 0x468   : > { %s9673_s29 = scalar_lea.hbm %s12470_s30, 4096  ;;  %s9677_s13 = scalar_lea.hbm %s12524_s7, 8192 }
 0x469   : > { %p9674_p11 = scmp.ne.s32.totalorder %s12470_s30, %s9673_s29  ;;  %p9678_p4 = scmp.lt.s32.totalorder %s12470_s30, %s12524_s7 }
 0x46a   : > { %p9679_p6 = scmp.lt.s32.totalorder %s9677_s13, %s9673_s29 }
 0x46b   : > { %p9675_p9 = pnand %p9674_p11, %p12964_p2 }
 0x46c   : > { %p9680_p8 = por %p9679_p6, %p9678_p4 }
 0x46d   : > { %p9676_p1 = pneg %p9675_p9 }
 0x46f   : > { %p9681_p5 = pnand %p9680_p8, %p9676_p1 }
 0x471   : > { %9684 = shalt.err (!%p9681_p5)
}
 0x472   : > { %s9736_s1 = smov 128   ;;  %s9737_s15 = smov 8  }
 0x473   : > { %9504 = dma.vmem_to_hbm [thread:$0]  (%p12964_p2), %s12472_s18, 4096, %s12470_s30, %s7061_s10, %s9736_s1, %s9736_s1, %s9737_s15  }
 0x474 PF: > { %s7089_s28 = sand.u32 1, %s9715_s24   ;;  %p12965_p7 = scmp.ne.s32.totalorder %s12569_s8, 0 }
 0x475   : > { %p12966_p12 = scmp.ge.s32.totalorder %s9727_s27, 2  ;;  %s7090_s9 = scalar_lea.sflag [#allocation7], %s7089_s28 }
 0x477   : > { %p9518_p13 = pnand %p12966_p12, %p12965_p7 }
 0x479   : > { %p9519_p0 = pneg %p9518_p13 }
 0x47b   : > { %9710 = dma.done.wait (%p9519_p0), %s7090_s9, 4096  }
 0x47c   : > { %9712 = vsyncadd (%p9519_p0), %s7090_s9, 4294963200  ;;  %p21_p10 = scmp.ge.s32.totalorder %s9856_s23, 4   ;;  %s12967_s24 = smov %s9719_s25 }
 0x47d   : > { %s12968_s25 = smov %s9723_s26  ;;  %s12969_s26 = smov %s9872_s12 }
 0x47e   : > { %s12970_s27 = smov %s9856_s23  ;;  %23 = sbr.rel (!%p21_p10) target bundleno = 8 (0x8), region = 121 }
 0x483   :  { %7095 = vsyncpa [#allocation6], 1 }
 0x484   :  { %7097 = vsyncpa [#allocation6 + $0x1], 1 }
 0x485   :  { %7098 = vsyncpa [#allocation9], 1 }
 0x486   :  { %7099 = vsyncpa [#allocation7], 1 }
 0x487   :  { %7101 = vsyncpa [#allocation7 + $0x1], 1 }

</bundles_post_ra>
